<compile_context>
chip_gen: v7x
topology: tpu7x:2x2x1
jax: 0.10.0
libtpu: 0.0.40
codegen_flags: <defaults>
</compile_context>

<pallas_src>
import functools
import math

import jax
import jax.numpy as jnp
from jax import lax
from jax.experimental import pallas as pl
from jax.experimental.pallas import tpu as pltpu


def _layernorm(x, gamma, beta, eps):
    mu = jnp.mean(x, axis=-1, keepdims=True)
    var = jnp.mean(jnp.square(x - mu), axis=-1, keepdims=True)
    return (x - mu) * lax.rsqrt(var + eps) * gamma + beta


def _encoder_kernel(hid_ref, enc_ref,
                    ln_qk_ref, wq_ref, bq_ref, wkv_ref, bkv_ref,
                    wo_ref, bo_ref, ln2_ref,
                    w13_ref, b13_ref, ln_ffn_ref,
                    w2_ref, b2_ref,
                    out_ref, *,
                    num_layers, num_heads, head_dim, d_model, d_ffn,
                    eps_ln, eps_ffn):
    """All L layers for one batch element; grid = (B,)."""
    sq = hid_ref.shape[1]
    x = hid_ref[0].astype(jnp.float32)   # (Sq, D) running hidden state (f32)
    e = enc_ref[0].astype(jnp.float32)   # (Sk, D) original encoder states
    sk = e.shape[0]

    # Trace-time layer loop: L is tiny, so layer indices are concrete and all
    # weight reads below are zero-cost static slices of the resident refs.
    for layer in range(num_layers):
        # norm1 (queries) / normk (keys) -- f32 VPU math.
        xn = _layernorm(x, ln_qk_ref[layer, 0], ln_qk_ref[layer, 1], eps_ln)
        en = _layernorm(e, ln_qk_ref[layer, 2], ln_qk_ref[layer, 3], eps_ln)

        # Q projection (softmax scale pre-folded into Wq/bq) + fused KV proj.
        q = (jnp.dot(xn.astype(jnp.bfloat16), wq_ref[layer],
                     preferred_element_type=jnp.float32) + bq_ref[layer])
        kv = (jnp.dot(en.astype(jnp.bfloat16), wkv_ref[layer],
                      preferred_element_type=jnp.float32) + bkv_ref[layer])
        k = kv[:, :d_model]
        v = kv[:, d_model:]

        # Multi-head cross-attention, batched over heads (leading-batch
        # dot_general; arrays are tiny so the head split/merge relayouts are
        # negligible next to the MXU work).
        qh = q.astype(jnp.bfloat16).reshape(sq, num_heads, head_dim).transpose(1, 0, 2)
        kh = k.astype(jnp.bfloat16).reshape(sk, num_heads, head_dim).transpose(1, 0, 2)
        vh = v.astype(jnp.bfloat16).reshape(sk, num_heads, head_dim).transpose(1, 0, 2)
        s = jnp.einsum('hqd,hkd->hqk', qh, kh,
                       preferred_element_type=jnp.float32)          # (H, Sq, Sk)
        s = s - jnp.max(s, axis=-1, keepdims=True)
        p = jnp.exp(s)
        p = p * pl.reciprocal(jnp.sum(p, axis=-1, keepdims=True), approx=False)
        o = jnp.einsum('hqk,hkd->hqd', p.astype(jnp.bfloat16), vh,
                       preferred_element_type=jnp.float32)          # (H, Sq, hd)
        attn = o.transpose(1, 0, 2).reshape(sq, d_model)            # 's h d -> s (h d)'

        # VisualCrossOutput: residual on the *normed* query states (as in ref).
        y = xn + (jnp.dot(attn.astype(jnp.bfloat16), wo_ref[layer],
                          preferred_element_type=jnp.float32) + bo_ref[layer])

        # SwiGLU MLP (UlusageDocDetVisualMLP); w1/w3 fused into one (D,2F) matmul.
        yn = _layernorm(y, ln2_ref[layer, 0], ln2_ref[layer, 1], eps_ln)
        h13 = (jnp.dot(yn.astype(jnp.bfloat16), w13_ref[layer],
                       preferred_element_type=jnp.float32) + b13_ref[layer])
        h1 = h13[:, :d_ffn]
        h3 = h13[:, d_ffn:]
        hh = (h1 * jax.nn.sigmoid(h1)) * h3                          # SiLU(w1 x) * (w3 x)
        hh = _layernorm(hh, ln_ffn_ref[layer, 0], ln_ffn_ref[layer, 1], eps_ffn)
        x = y + (jnp.dot(hh.astype(jnp.bfloat16), w2_ref[layer],
                         preferred_element_type=jnp.float32) + b2_ref[layer])

    out_ref[0] = x.astype(out_ref.dtype)


def stack_params(layer_params, *, num_heads, matmul_dtype=jnp.bfloat16):
    """One-time (hoisted) parameter stacking: leading L axis, KV / w1-w3 fusion,
    softmax scale folded into Wq/bq, matmul weights cast to bf16."""
    d = layer_params[0]["wq"].shape[0]
    head_dim = d // num_heads
    scale = 1.0 / math.sqrt(head_dim)

    def stack(fn, dtype=None):
        a = jnp.stack([fn(p) for p in layer_params], axis=0)
        return a.astype(dtype) if dtype is not None else a

    ln_qk  = stack(lambda p: jnp.stack([p["n1g"], p["n1b"], p["nkg"], p["nkb"]], 0))
    wq     = stack(lambda p: p["wq"] * scale, matmul_dtype)
    bq     = stack(lambda p: (p["bq"] * scale)[None, :])
    wkv    = stack(lambda p: jnp.concatenate([p["wk"], p["wv"]], 1), matmul_dtype)
    bkv    = stack(lambda p: jnp.concatenate([p["bk"], p["bv"]], 0)[None, :])
    wo     = stack(lambda p: p["wo"], matmul_dtype)
    bo     = stack(lambda p: p["bo"][None, :])
    ln2    = stack(lambda p: jnp.stack([p["n2g"], p["n2b"]], 0))
    w13    = stack(lambda p: jnp.concatenate([p["w1"], p["w3"]], 1), matmul_dtype)
    b13    = stack(lambda p: jnp.concatenate([p["b1"], p["b3"]], 0)[None, :])
    ln_ffn = stack(lambda p: jnp.stack([p["lng"], p["lnb"]], 0))
    w2     = stack(lambda p: p["w2"], matmul_dtype)
    b2     = stack(lambda p: p["b2"][None, :])
    return [ln_qk, wq, bq, wkv, bkv, wo, bo, ln2, w13, b13, ln_ffn, w2, b2]


def encoder_forward(hidden, encoder, stacked, *, num_heads, num_layers, d_ffn,
                    eps_ln=1e-5, eps_ffn=1e-6):
    """Full UlusageDocDetVisualCrossAttentionEncoder forward in ONE pallas_call."""
    B, Sq, D = hidden.shape
    _, Sk, _ = encoder.shape
    assert D % num_heads == 0
    head_dim = D // num_heads

    def resident_spec(arr):
        # Whole-array block + constant index_map -> the (L, ...) stack is
        # DMA'd into VMEM once and stays resident across the whole (B,) grid.
        return pl.BlockSpec(arr.shape, lambda b: (0,) * arr.ndim)

    kernel = functools.partial(
        _encoder_kernel,
        num_layers=num_layers, num_heads=num_heads, head_dim=head_dim,
        d_model=D, d_ffn=d_ffn, eps_ln=eps_ln, eps_ffn=eps_ffn)

    return pl.pallas_call(
        kernel,
        out_shape=jax.ShapeDtypeStruct((B, Sq, D), hidden.dtype),
        grid_spec=pltpu.PrefetchScalarGridSpec(
            num_scalar_prefetch=0,
            grid=(B,),
            in_specs=[pl.BlockSpec((1, Sq, D), lambda b: (b, 0, 0)),
                      pl.BlockSpec((1, Sk, D), lambda b: (b, 0, 0))]
                     + [resident_spec(a) for a in stacked],
            out_specs=pl.BlockSpec((1, Sq, D), lambda b: (b, 0, 0)),
        ),
        compiler_params=pltpu.CompilerParams(
            dimension_semantics=("parallel",)),
    )(hidden, encoder, *stacked)


def ffn_hidden_size(d):
    f = int(2 * 4 * d / 3)
    multiple_of = 256
    return multiple_of * ((f + multiple_of - 1) // multiple_of)


def init_layer_params(key, d, f, dtype=jnp.float32):
    keys = jax.random.split(key, 7)

    def w(k, shape):
        return (jax.random.normal(k, shape, dtype) * 0.02).astype(dtype)

    ones = lambda n: jnp.ones((n,), dtype)
    zeros = lambda n: jnp.zeros((n,), dtype)
    return dict(
        n1g=ones(d), n1b=zeros(d),
        nkg=ones(d), nkb=zeros(d),
        wq=w(keys[0], (d, d)), bq=zeros(d),    # biases zero-initialized as in module
        wk=w(keys[1], (d, d)), bk=zeros(d),
        wv=w(keys[2], (d, d)), bv=zeros(d),
        wo=w(keys[3], (d, d)), bo=zeros(d),
        n2g=ones(d), n2b=zeros(d),
        w1=w(keys[4], (d, f)), b1=zeros(f),
        w3=w(keys[5], (d, f)), b3=zeros(f),
        lng=ones(f), lnb=zeros(f),
        w2=w(keys[6], (f, d)), b2=zeros(d),
    )


def _reference_forward(hidden, encoder, layer_params, *, num_heads,
                       eps_ln=1e-5, eps_ffn=1e-6):
    """Pure-JAX f32 reference mirroring the PyTorch module (eval mode)."""
    def ln(x, g, b, eps):
        mu = x.mean(-1, keepdims=True)
        var = ((x - mu) ** 2).mean(-1, keepdims=True)
        return (x - mu) / jnp.sqrt(var + eps) * g + b

    B, Sq, D = hidden.shape
    Sk = encoder.shape[1]
    H = num_heads
    hd = D // H
    scale = 1.0 / math.sqrt(hd)
    x = hidden
    for p in layer_params:
        xn = ln(x, p["n1g"], p["n1b"], eps_ln)
        en = ln(encoder, p["nkg"], p["nkb"], eps_ln)
        q = (xn @ p["wq"] + p["bq"]).reshape(B, Sq, H, hd)
        k = (en @ p["wk"] + p["bk"]).reshape(B, Sk, H, hd)
        v = (en @ p["wv"] + p["bv"]).reshape(B, Sk, H, hd)
        s = jnp.einsum("bqhd,bkhd->bhqk", q, k) * scale
        pw = jax.nn.softmax(s, axis=-1)
        attn = jnp.einsum("bhqk,bkhd->bqhd", pw, v).reshape(B, Sq, D)
        y = xn + attn @ p["wo"] + p["bo"]
        yn = ln(y, p["n2g"], p["n2b"], eps_ln)
        hh = jax.nn.silu(yn @ p["w1"] + p["b1"]) * (yn @ p["w3"] + p["b3"])
        hh = ln(hh, p["lng"], p["lnb"], eps_ffn)
        x = y + hh @ p["w2"] + p["b2"]
    return x


if __name__ == "__main__":
    # config: high_reso_cross_hid_size=128, high_reso_cross_num_att_heads=4,
    #         layer=2, layer_norm_eps=1e-6 (ffn_ln), high_reso_cross_dropout=0.0
    B, Sq, Sk, D, H, L = 2, 8, 16, 128, 4, 2
    F = ffn_hidden_size(D)  # 512

    root = jax.random.PRNGKey(0)
    k_hid, k_enc, k_params = jax.random.split(root, 3)
    hidden = jax.random.normal(k_hid, (B, Sq, D), jnp.float32)
    encoder = jax.random.normal(k_enc, (B, Sk, D), jnp.float32)

    layer_keys = jax.random.split(k_params, L)
    layer_params = [init_layer_params(layer_keys[i], D, F) for i in range(L)]

    # Hoisted one-time parameter stacking (not re-executed per forward call).
    stacked = [jax.block_until_ready(a) for a in
               stack_params(layer_params, num_heads=H)]

    out = encoder_forward(hidden, encoder, stacked, num_heads=H, num_layers=L,
                          d_ffn=F, eps_ln=1e-5, eps_ffn=1e-6)
    out = jax.block_until_ready(out)

    ref = _reference_forward(hidden, encoder, layer_params, num_heads=H,
                             eps_ln=1e-5, eps_ffn=1e-6)
    assert out.shape == (B, Sq, D)
    assert bool(jnp.all(jnp.isfinite(out)))
    # Only bf16 matmul-operand rounding remains (exact reciprocal, f32 accum).
    max_err = float(jnp.max(jnp.abs(out - ref)))
    assert max_err < 5e-2, f"mismatch vs reference: {max_err}"
    print("KERNEL_OK")
</pallas_src>

<mosaic_0001>
module attributes {stable_mosaic.version = 11 : i64} {
  func.func @_encoder_kernel(%arg0: i32, %arg1: memref<1x8x128xf32, #tpu.memory_space<vmem>>, %arg2: memref<1x16x128xf32, #tpu.memory_space<vmem>>, %arg3: memref<2x4x128xf32, #tpu.memory_space<vmem>>, %arg4: memref<2x128x128xbf16, #tpu.memory_space<vmem>>, %arg5: memref<2x1x128xf32, #tpu.memory_space<vmem>>, %arg6: memref<2x128x256xbf16, #tpu.memory_space<vmem>>, %arg7: memref<2x1x256xf32, #tpu.memory_space<vmem>>, %arg8: memref<2x128x128xbf16, #tpu.memory_space<vmem>>, %arg9: memref<2x1x128xf32, #tpu.memory_space<vmem>>, %arg10: memref<2x2x128xf32, #tpu.memory_space<vmem>>, %arg11: memref<2x128x1024xbf16, #tpu.memory_space<vmem>>, %arg12: memref<2x1x1024xf32, #tpu.memory_space<vmem>>, %arg13: memref<2x2x512xf32, #tpu.memory_space<vmem>>, %arg14: memref<2x512x128xbf16, #tpu.memory_space<vmem>>, %arg15: memref<2x1x128xf32, #tpu.memory_space<vmem>>, %arg16: memref<1x8x128xf32, #tpu.memory_space<vmem>>) attributes {dimension_semantics = [#tpu.dimension_semantics<parallel>], iteration_bounds = array<i64: 2>, scalar_prefetch = 0 : i64, scratch_operands = 0 : i64, tpu.core_type = #tpu.core_type<tc>, window_params = [{transform_indices = @transform_0, window_bounds = array<i64: 1, 8, 128>}, {transform_indices = @transform_1, window_bounds = array<i64: 1, 16, 128>}, {pipeline_mode = #tpu.pipeline_mode<synchronous>, transform_indices = @transform_2, window_bounds = array<i64: 2, 4, 128>}, {pipeline_mode = #tpu.pipeline_mode<synchronous>, transform_indices = @transform_3, window_bounds = array<i64: 2, 128, 128>}, {pipeline_mode = #tpu.pipeline_mode<synchronous>, transform_indices = @transform_4, window_bounds = array<i64: 2, 1, 128>}, {pipeline_mode = #tpu.pipeline_mode<synchronous>, transform_indices = @transform_5, window_bounds = array<i64: 2, 128, 256>}, {pipeline_mode = #tpu.pipeline_mode<synchronous>, transform_indices = @transform_6, window_bounds = array<i64: 2, 1, 256>}, {pipeline_mode = #tpu.pipeline_mode<synchronous>, transform_indices = @transform_7, window_bounds = array<i64: 2, 128, 128>}, {pipeline_mode = #tpu.pipeline_mode<synchronous>, transform_indices = @transform_8, window_bounds = array<i64: 2, 1, 128>}, {pipeline_mode = #tpu.pipeline_mode<synchronous>, transform_indices = @transform_9, window_bounds = array<i64: 2, 2, 128>}, {pipeline_mode = #tpu.pipeline_mode<synchronous>, transform_indices = @transform_10, window_bounds = array<i64: 2, 128, 1024>}, {pipeline_mode = #tpu.pipeline_mode<synchronous>, transform_indices = @transform_11, window_bounds = array<i64: 2, 1, 1024>}, {pipeline_mode = #tpu.pipeline_mode<synchronous>, transform_indices = @transform_12, window_bounds = array<i64: 2, 2, 512>}, {pipeline_mode = #tpu.pipeline_mode<synchronous>, transform_indices = @transform_13, window_bounds = array<i64: 2, 512, 128>}, {pipeline_mode = #tpu.pipeline_mode<synchronous>, transform_indices = @transform_14, window_bounds = array<i64: 2, 1, 128>}, {transform_indices = @transform_15, window_bounds = array<i64: 1, 8, 128>}]} {
    %c0 = arith.constant 0 : index
    %c0_0 = arith.constant 0 : index
    %c0_1 = arith.constant 0 : index
    %0 = vector.load %arg1[%c0, %c0_0, %c0_1] : memref<1x8x128xf32, #tpu.memory_space<vmem>>, vector<1x8x128xf32>
    %1 = vector.shape_cast %0 : vector<1x8x128xf32> to vector<8x128xf32>
    %c0_2 = arith.constant 0 : index
    %c0_3 = arith.constant 0 : index
    %c0_4 = arith.constant 0 : index
    %2 = vector.load %arg2[%c0_2, %c0_3, %c0_4] : memref<1x16x128xf32, #tpu.memory_space<vmem>>, vector<1x16x128xf32>
    %3 = vector.shape_cast %2 : vector<1x16x128xf32> to vector<16x128xf32>
    %c0_5 = arith.constant 0 : index
    %c0_6 = arith.constant 0 : index
    %c0_7 = arith.constant 0 : index
    %4 = vector.load %arg3[%c0_5, %c0_6, %c0_7] : memref<2x4x128xf32, #tpu.memory_space<vmem>>, vector<1x1x128xf32>
    %5 = vector.shape_cast %4 : vector<1x1x128xf32> to vector<128xf32>
    %c0_8 = arith.constant 0 : index
    %c1 = arith.constant 1 : index
    %c0_9 = arith.constant 0 : index
    %6 = vector.load %arg3[%c0_8, %c1, %c0_9] : memref<2x4x128xf32, #tpu.memory_space<vmem>>, vector<1x1x128xf32>
    %7 = vector.shape_cast %6 : vector<1x1x128xf32> to vector<128xf32>
    %cst = arith.constant dense<0.000000e+00> : vector<8xf32>
    %8 = vector.multi_reduction <add>, %1, %cst [1] : vector<8x128xf32> to vector<8xf32>
    %9 = vector.shape_cast %8 : vector<8xf32> to vector<8x1xf32>
    %cst_10 = arith.constant 1.280000e+02 : f32
    %10 = vector.broadcast %cst_10 : f32 to vector<8x1xf32>
    %11 = arith.divf %9, %10 : vector<8x1xf32>
    %12 = vector.broadcast %11 : vector<8x1xf32> to vector<8x128xf32>
    %13 = arith.subf %1, %12 : vector<8x128xf32>
    %14 = arith.mulf %13, %13 : vector<8x128xf32>
    %cst_11 = arith.constant dense<0.000000e+00> : vector<8xf32>
    %15 = vector.multi_reduction <add>, %14, %cst_11 [1] : vector<8x128xf32> to vector<8xf32>
    %16 = vector.shape_cast %15 : vector<8xf32> to vector<8x1xf32>
    %cst_12 = arith.constant 1.280000e+02 : f32
    %17 = vector.broadcast %cst_12 : f32 to vector<8x1xf32>
    %18 = arith.divf %16, %17 : vector<8x1xf32>
    %19 = vector.broadcast %11 : vector<8x1xf32> to vector<8x128xf32>
    %20 = arith.subf %1, %19 : vector<8x128xf32>
    %cst_13 = arith.constant 9.99999974E-6 : f32
    %21 = vector.broadcast %cst_13 : f32 to vector<8x1xf32>
    %22 = arith.addf %18, %21 : vector<8x1xf32>
    %23 = math.rsqrt %22 : vector<8x1xf32>
    %24 = vector.broadcast %23 : vector<8x1xf32> to vector<8x128xf32>
    %25 = arith.mulf %20, %24 : vector<8x128xf32>
    %26 = vector.shape_cast %5 : vector<128xf32> to vector<1x128xf32>
    %27 = vector.broadcast %26 : vector<1x128xf32> to vector<8x128xf32>
    %28 = arith.mulf %25, %27 : vector<8x128xf32>
    %29 = vector.shape_cast %7 : vector<128xf32> to vector<1x128xf32>
    %30 = vector.broadcast %29 : vector<1x128xf32> to vector<8x128xf32>
    %31 = arith.addf %28, %30 : vector<8x128xf32>
    %c0_14 = arith.constant 0 : index
    %c2 = arith.constant 2 : index
    %c0_15 = arith.constant 0 : index
    %32 = vector.load %arg3[%c0_14, %c2, %c0_15] : memref<2x4x128xf32, #tpu.memory_space<vmem>>, vector<1x1x128xf32>
    %33 = vector.shape_cast %32 : vector<1x1x128xf32> to vector<128xf32>
    %c0_16 = arith.constant 0 : index
    %c3 = arith.constant 3 : index
    %c0_17 = arith.constant 0 : index
    %34 = vector.load %arg3[%c0_16, %c3, %c0_17] : memref<2x4x128xf32, #tpu.memory_space<vmem>>, vector<1x1x128xf32>
    %35 = vector.shape_cast %34 : vector<1x1x128xf32> to vector<128xf32>
    %cst_18 = arith.constant dense<0.000000e+00> : vector<16xf32>
    %36 = vector.multi_reduction <add>, %3, %cst_18 [1] : vector<16x128xf32> to vector<16xf32>
    %37 = vector.shape_cast %36 : vector<16xf32> to vector<16x1xf32>
    %cst_19 = arith.constant 1.280000e+02 : f32
    %38 = vector.broadcast %cst_19 : f32 to vector<16x1xf32>
    %39 = arith.divf %37, %38 : vector<16x1xf32>
    %40 = vector.broadcast %39 : vector<16x1xf32> to vector<16x128xf32>
    %41 = arith.subf %3, %40 : vector<16x128xf32>
    %42 = arith.mulf %41, %41 : vector<16x128xf32>
    %cst_20 = arith.constant dense<0.000000e+00> : vector<16xf32>
    %43 = vector.multi_reduction <add>, %42, %cst_20 [1] : vector<16x128xf32> to vector<16xf32>
    %44 = vector.shape_cast %43 : vector<16xf32> to vector<16x1xf32>
    %cst_21 = arith.constant 1.280000e+02 : f32
    %45 = vector.broadcast %cst_21 : f32 to vector<16x1xf32>
    %46 = arith.divf %44, %45 : vector<16x1xf32>
    %47 = vector.broadcast %39 : vector<16x1xf32> to vector<16x128xf32>
    %48 = arith.subf %3, %47 : vector<16x128xf32>
    %cst_22 = arith.constant 9.99999974E-6 : f32
    %49 = vector.broadcast %cst_22 : f32 to vector<16x1xf32>
    %50 = arith.addf %46, %49 : vector<16x1xf32>
    %51 = math.rsqrt %50 : vector<16x1xf32>
    %52 = vector.broadcast %51 : vector<16x1xf32> to vector<16x128xf32>
    %53 = arith.mulf %48, %52 : vector<16x128xf32>
    %54 = vector.shape_cast %33 : vector<128xf32> to vector<1x128xf32>
    %55 = vector.broadcast %54 : vector<1x128xf32> to vector<16x128xf32>
    %56 = arith.mulf %53, %55 : vector<16x128xf32>
    %57 = vector.shape_cast %35 : vector<128xf32> to vector<1x128xf32>
    %58 = vector.broadcast %57 : vector<1x128xf32> to vector<16x128xf32>
    %59 = arith.addf %56, %58 : vector<16x128xf32>
    %60 = arith.truncf %31 : vector<8x128xf32> to vector<8x128xbf16>
    %c0_23 = arith.constant 0 : index
    %c0_24 = arith.constant 0 : index
    %c0_25 = arith.constant 0 : index
    %61 = vector.load %arg4[%c0_23, %c0_24, %c0_25] : memref<2x128x128xbf16, #tpu.memory_space<vmem>>, vector<1x128x128xbf16>
    %62 = vector.shape_cast %61 : vector<1x128x128xbf16> to vector<128x128xbf16>
    %cst_26 = arith.constant dense<0.000000e+00> : vector<8x128xf32>
    %63 = tpu.matmul %60, %62, %cst_26 {dimension_numbers = #tpu.dot_dimension_numbers<[1], [0], [0], [1], [0, 0, 1, 1], [], []>} : vector<8x128xbf16>, vector<128x128xbf16>, vector<8x128xf32> -> vector<8x128xf32>
    %c0_27 = arith.constant 0 : index
    %c0_28 = arith.constant 0 : index
    %c0_29 = arith.constant 0 : index
    %64 = vector.load %arg5[%c0_27, %c0_28, %c0_29] : memref<2x1x128xf32, #tpu.memory_space<vmem>>, vector<1x1x128xf32>
    %65 = vector.shape_cast %64 : vector<1x1x128xf32> to vector<1x128xf32>
    %66 = vector.broadcast %65 : vector<1x128xf32> to vector<8x128xf32>
    %67 = arith.addf %63, %66 : vector<8x128xf32>
    %68 = arith.truncf %59 : vector<16x128xf32> to vector<16x128xbf16>
    %c0_30 = arith.constant 0 : index
    %c0_31 = arith.constant 0 : index
    %c0_32 = arith.constant 0 : index
    %69 = vector.load %arg6[%c0_30, %c0_31, %c0_32] : memref<2x128x256xbf16, #tpu.memory_space<vmem>>, vector<1x128x256xbf16>
    %70 = vector.shape_cast %69 : vector<1x128x256xbf16> to vector<128x256xbf16>
    %cst_33 = arith.constant dense<0.000000e+00> : vector<16x256xf32>
    %71 = tpu.matmul %68, %70, %cst_33 {dimension_numbers = #tpu.dot_dimension_numbers<[1], [0], [0], [1], [0, 0, 1, 1], [], []>} : vector<16x128xbf16>, vector<128x256xbf16>, vector<16x256xf32> -> vector<16x256xf32>
    %c0_34 = arith.constant 0 : index
    %c0_35 = arith.constant 0 : index
    %c0_36 = arith.constant 0 : index
    %72 = vector.load %arg7[%c0_34, %c0_35, %c0_36] : memref<2x1x256xf32, #tpu.memory_space<vmem>>, vector<1x1x256xf32>
    %73 = vector.shape_cast %72 : vector<1x1x256xf32> to vector<1x256xf32>
    %74 = vector.broadcast %73 : vector<1x256xf32> to vector<16x256xf32>
    %75 = arith.addf %71, %74 : vector<16x256xf32>
    %76 = vector.extract_strided_slice %75 {offsets = [0, 0], sizes = [16, 128], strides = [1, 1]} : vector<16x256xf32> to vector<16x128xf32>
    %77 = vector.extract_strided_slice %75 {offsets = [0, 128], sizes = [16, 128], strides = [1, 1]} : vector<16x256xf32> to vector<16x128xf32>
    %78 = arith.truncf %67 : vector<8x128xf32> to vector<8x128xbf16>
    %79 = vector.shape_cast %78 : vector<8x128xbf16> to vector<8x4x32xbf16>
    %80 = tpu.transpose %79, [1, 0, 2] : vector<8x4x32xbf16> -> vector<4x8x32xbf16>
    %81 = arith.truncf %76 : vector<16x128xf32> to vector<16x128xbf16>
    %82 = vector.shape_cast %81 : vector<16x128xbf16> to vector<16x4x32xbf16>
    %83 = tpu.transpose %82, [1, 0, 2] : vector<16x4x32xbf16> -> vector<4x16x32xbf16>
    %84 = arith.truncf %77 : vector<16x128xf32> to vector<16x128xbf16>
    %85 = vector.shape_cast %84 : vector<16x128xbf16> to vector<16x4x32xbf16>
    %86 = tpu.transpose %85, [1, 0, 2] : vector<16x4x32xbf16> -> vector<4x16x32xbf16>
    "tpu.trace_start"() <{level = 10 : i32, message = "hqd,hkd->hqk"}> : () -> ()
    %cst_37 = arith.constant dense<0.000000e+00> : vector<4x8x16xf32>
    %87 = tpu.matmul %80, %83, %cst_37 {dimension_numbers = #tpu.dot_dimension_numbers<[2], [2], [1], [1], [0, 0, 0, 1, 1, 1], [0], [0]>} : vector<4x8x32xbf16>, vector<4x16x32xbf16>, vector<4x8x16xf32> -> vector<4x8x16xf32>
    "tpu.trace_stop"() : () -> ()
    %cst_38 = arith.constant dense<0xFF800000> : vector<4x8xf32>
    %88 = vector.multi_reduction <maximumf>, %87, %cst_38 [2] : vector<4x8x16xf32> to vector<4x8xf32>
    %89 = vector.shape_cast %88 : vector<4x8xf32> to vector<4x8x1xf32>
    %90 = vector.broadcast %89 : vector<4x8x1xf32> to vector<4x8x16xf32>
    %91 = arith.subf %87, %90 : vector<4x8x16xf32>
    %92 = math.exp %91 : vector<4x8x16xf32>
    %cst_39 = arith.constant dense<0.000000e+00> : vector<4x8xf32>
    %93 = vector.multi_reduction <add>, %92, %cst_39 [2] : vector<4x8x16xf32> to vector<4x8xf32>
    %94 = vector.shape_cast %93 : vector<4x8xf32> to vector<4x8x1xf32>
    %95 = tpu.reciprocal %94 : vector<4x8x1xf32> -> vector<4x8x1xf32>
    %96 = vector.broadcast %95 : vector<4x8x1xf32> to vector<4x8x16xf32>
    %97 = arith.mulf %92, %96 : vector<4x8x16xf32>
    %98 = arith.truncf %97 : vector<4x8x16xf32> to vector<4x8x16xbf16>
    "tpu.trace_start"() <{level = 10 : i32, message = "hqk,hkd->hqd"}> : () -> ()
    %cst_40 = arith.constant dense<0.000000e+00> : vector<4x8x32xf32>
    %99 = tpu.matmul %98, %86, %cst_40 {dimension_numbers = #tpu.dot_dimension_numbers<[2], [1], [1], [2], [0, 0, 0, 1, 1, 2], [0], [0]>} : vector<4x8x16xbf16>, vector<4x16x32xbf16>, vector<4x8x32xf32> -> vector<4x8x32xf32>
    "tpu.trace_stop"() : () -> ()
    %100 = tpu.transpose %99, [1, 0, 2] : vector<4x8x32xf32> -> vector<8x4x32xf32>
    %101 = vector.shape_cast %100 : vector<8x4x32xf32> to vector<8x128xf32>
    %102 = arith.truncf %101 : vector<8x128xf32> to vector<8x128xbf16>
    %c0_41 = arith.constant 0 : index
    %c0_42 = arith.constant 0 : index
    %c0_43 = arith.constant 0 : index
    %103 = vector.load %arg8[%c0_41, %c0_42, %c0_43] : memref<2x128x128xbf16, #tpu.memory_space<vmem>>, vector<1x128x128xbf16>
    %104 = vector.shape_cast %103 : vector<1x128x128xbf16> to vector<128x128xbf16>
    %cst_44 = arith.constant dense<0.000000e+00> : vector<8x128xf32>
    %105 = tpu.matmul %102, %104, %cst_44 {dimension_numbers = #tpu.dot_dimension_numbers<[1], [0], [0], [1], [0, 0, 1, 1], [], []>} : vector<8x128xbf16>, vector<128x128xbf16>, vector<8x128xf32> -> vector<8x128xf32>
    %c0_45 = arith.constant 0 : index
    %c0_46 = arith.constant 0 : index
    %c0_47 = arith.constant 0 : index
    %106 = vector.load %arg9[%c0_45, %c0_46, %c0_47] : memref<2x1x128xf32, #tpu.memory_space<vmem>>, vector<1x1x128xf32>
    %107 = vector.shape_cast %106 : vector<1x1x128xf32> to vector<1x128xf32>
    %108 = vector.broadcast %107 : vector<1x128xf32> to vector<8x128xf32>
    %109 = arith.addf %105, %108 : vector<8x128xf32>
    %110 = arith.addf %31, %109 : vector<8x128xf32>
    %c0_48 = arith.constant 0 : index
    %c0_49 = arith.constant 0 : index
    %c0_50 = arith.constant 0 : index
    %111 = vector.load %arg10[%c0_48, %c0_49, %c0_50] : memref<2x2x128xf32, #tpu.memory_space<vmem>>, vector<1x1x128xf32>
    %112 = vector.shape_cast %111 : vector<1x1x128xf32> to vector<128xf32>
    %c0_51 = arith.constant 0 : index
    %c1_52 = arith.constant 1 : index
    %c0_53 = arith.constant 0 : index
    %113 = vector.load %arg10[%c0_51, %c1_52, %c0_53] : memref<2x2x128xf32, #tpu.memory_space<vmem>>, vector<1x1x128xf32>
    %114 = vector.shape_cast %113 : vector<1x1x128xf32> to vector<128xf32>
    %cst_54 = arith.constant dense<0.000000e+00> : vector<8xf32>
    %115 = vector.multi_reduction <add>, %110, %cst_54 [1] : vector<8x128xf32> to vector<8xf32>
    %116 = vector.shape_cast %115 : vector<8xf32> to vector<8x1xf32>
    %cst_55 = arith.constant 1.280000e+02 : f32
    %117 = vector.broadcast %cst_55 : f32 to vector<8x1xf32>
    %118 = arith.divf %116, %117 : vector<8x1xf32>
    %119 = vector.broadcast %118 : vector<8x1xf32> to vector<8x128xf32>
    %120 = arith.subf %110, %119 : vector<8x128xf32>
    %121 = arith.mulf %120, %120 : vector<8x128xf32>
    %cst_56 = arith.constant dense<0.000000e+00> : vector<8xf32>
    %122 = vector.multi_reduction <add>, %121, %cst_56 [1] : vector<8x128xf32> to vector<8xf32>
    %123 = vector.shape_cast %122 : vector<8xf32> to vector<8x1xf32>
    %cst_57 = arith.constant 1.280000e+02 : f32
    %124 = vector.broadcast %cst_57 : f32 to vector<8x1xf32>
    %125 = arith.divf %123, %124 : vector<8x1xf32>
    %126 = vector.broadcast %118 : vector<8x1xf32> to vector<8x128xf32>
    %127 = arith.subf %110, %126 : vector<8x128xf32>
    %cst_58 = arith.constant 9.99999974E-6 : f32
    %128 = vector.broadcast %cst_58 : f32 to vector<8x1xf32>
    %129 = arith.addf %125, %128 : vector<8x1xf32>
    %130 = math.rsqrt %129 : vector<8x1xf32>
    %131 = vector.broadcast %130 : vector<8x1xf32> to vector<8x128xf32>
    %132 = arith.mulf %127, %131 : vector<8x128xf32>
    %133 = vector.shape_cast %112 : vector<128xf32> to vector<1x128xf32>
    %134 = vector.broadcast %133 : vector<1x128xf32> to vector<8x128xf32>
    %135 = arith.mulf %132, %134 : vector<8x128xf32>
    %136 = vector.shape_cast %114 : vector<128xf32> to vector<1x128xf32>
    %137 = vector.broadcast %136 : vector<1x128xf32> to vector<8x128xf32>
    %138 = arith.addf %135, %137 : vector<8x128xf32>
    %139 = arith.truncf %138 : vector<8x128xf32> to vector<8x128xbf16>
    %c0_59 = arith.constant 0 : index
    %c0_60 = arith.constant 0 : index
    %c0_61 = arith.constant 0 : index
    %140 = vector.load %arg11[%c0_59, %c0_60, %c0_61] : memref<2x128x1024xbf16, #tpu.memory_space<vmem>>, vector<1x128x1024xbf16>
    %141 = vector.shape_cast %140 : vector<1x128x1024xbf16> to vector<128x1024xbf16>
    %cst_62 = arith.constant dense<0.000000e+00> : vector<8x1024xf32>
    %142 = tpu.matmul %139, %141, %cst_62 {dimension_numbers = #tpu.dot_dimension_numbers<[1], [0], [0], [1], [0, 0, 1, 1], [], []>} : vector<8x128xbf16>, vector<128x1024xbf16>, vector<8x1024xf32> -> vector<8x1024xf32>
    %c0_63 = arith.constant 0 : index
    %c0_64 = arith.constant 0 : index
    %c0_65 = arith.constant 0 : index
    %143 = vector.load %arg12[%c0_63, %c0_64, %c0_65] : memref<2x1x1024xf32, #tpu.memory_space<vmem>>, vector<1x1x1024xf32>
    %144 = vector.shape_cast %143 : vector<1x1x1024xf32> to vector<1x1024xf32>
    %145 = vector.broadcast %144 : vector<1x1024xf32> to vector<8x1024xf32>
    %146 = arith.addf %142, %145 : vector<8x1024xf32>
    %147 = vector.extract_strided_slice %146 {offsets = [0, 0], sizes = [8, 512], strides = [1, 1]} : vector<8x1024xf32> to vector<8x512xf32>
    %148 = vector.extract_strided_slice %146 {offsets = [0, 512], sizes = [8, 512], strides = [1, 1]} : vector<8x1024xf32> to vector<8x512xf32>
    %149 = arith.negf %147 : vector<8x512xf32>
    %150 = math.exp %149 : vector<8x512xf32>
    %cst_66 = arith.constant 1.000000e+00 : f32
    %151 = vector.broadcast %cst_66 : f32 to vector<8x512xf32>
    %152 = arith.addf %151, %150 : vector<8x512xf32>
    %153 = arith.divf %151, %152 : vector<8x512xf32>
    %154 = arith.mulf %147, %153 : vector<8x512xf32>
    %155 = arith.mulf %154, %148 : vector<8x512xf32>
    %c0_67 = arith.constant 0 : index
    %c0_68 = arith.constant 0 : index
    %c0_69 = arith.constant 0 : index
    %156 = vector.load %arg13[%c0_67, %c0_68, %c0_69] : memref<2x2x512xf32, #tpu.memory_space<vmem>>, vector<1x1x512xf32>
    %157 = vector.shape_cast %156 : vector<1x1x512xf32> to vector<512xf32>
    %c0_70 = arith.constant 0 : index
    %c1_71 = arith.constant 1 : index
    %c0_72 = arith.constant 0 : index
    %158 = vector.load %arg13[%c0_70, %c1_71, %c0_72] : memref<2x2x512xf32, #tpu.memory_space<vmem>>, vector<1x1x512xf32>
    %159 = vector.shape_cast %158 : vector<1x1x512xf32> to vector<512xf32>
    %cst_73 = arith.constant dense<0.000000e+00> : vector<8xf32>
    %160 = vector.multi_reduction <add>, %155, %cst_73 [1] : vector<8x512xf32> to vector<8xf32>
    %161 = vector.shape_cast %160 : vector<8xf32> to vector<8x1xf32>
    %cst_74 = arith.constant 5.120000e+02 : f32
    %162 = vector.broadcast %cst_74 : f32 to vector<8x1xf32>
    %163 = arith.divf %161, %162 : vector<8x1xf32>
    %164 = vector.broadcast %163 : vector<8x1xf32> to vector<8x512xf32>
    %165 = arith.subf %155, %164 : vector<8x512xf32>
    %166 = arith.mulf %165, %165 : vector<8x512xf32>
    %cst_75 = arith.constant dense<0.000000e+00> : vector<8xf32>
    %167 = vector.multi_reduction <add>, %166, %cst_75 [1] : vector<8x512xf32> to vector<8xf32>
    %168 = vector.shape_cast %167 : vector<8xf32> to vector<8x1xf32>
    %cst_76 = arith.constant 5.120000e+02 : f32
    %169 = vector.broadcast %cst_76 : f32 to vector<8x1xf32>
    %170 = arith.divf %168, %169 : vector<8x1xf32>
    %171 = vector.broadcast %163 : vector<8x1xf32> to vector<8x512xf32>
    %172 = arith.subf %155, %171 : vector<8x512xf32>
    %cst_77 = arith.constant 9.99999997E-7 : f32
    %173 = vector.broadcast %cst_77 : f32 to vector<8x1xf32>
    %174 = arith.addf %170, %173 : vector<8x1xf32>
    %175 = math.rsqrt %174 : vector<8x1xf32>
    %176 = vector.broadcast %175 : vector<8x1xf32> to vector<8x512xf32>
    %177 = arith.mulf %172, %176 : vector<8x512xf32>
    %178 = vector.shape_cast %157 : vector<512xf32> to vector<1x512xf32>
    %179 = vector.broadcast %178 : vector<1x512xf32> to vector<8x512xf32>
    %180 = arith.mulf %177, %179 : vector<8x512xf32>
    %181 = vector.shape_cast %159 : vector<512xf32> to vector<1x512xf32>
    %182 = vector.broadcast %181 : vector<1x512xf32> to vector<8x512xf32>
    %183 = arith.addf %180, %182 : vector<8x512xf32>
    %184 = arith.truncf %183 : vector<8x512xf32> to vector<8x512xbf16>
    %c0_78 = arith.constant 0 : index
    %c0_79 = arith.constant 0 : index
    %c0_80 = arith.constant 0 : index
    %185 = vector.load %arg14[%c0_78, %c0_79, %c0_80] : memref<2x512x128xbf16, #tpu.memory_space<vmem>>, vector<1x512x128xbf16>
    %186 = vector.shape_cast %185 : vector<1x512x128xbf16> to vector<512x128xbf16>
    %cst_81 = arith.constant dense<0.000000e+00> : vector<8x128xf32>
    %187 = tpu.matmul %184, %186, %cst_81 {dimension_numbers = #tpu.dot_dimension_numbers<[1], [0], [0], [1], [0, 0, 1, 1], [], []>} : vector<8x512xbf16>, vector<512x128xbf16>, vector<8x128xf32> -> vector<8x128xf32>
    %c0_82 = arith.constant 0 : index
    %c0_83 = arith.constant 0 : index
    %c0_84 = arith.constant 0 : index
    %188 = vector.load %arg15[%c0_82, %c0_83, %c0_84] : memref<2x1x128xf32, #tpu.memory_space<vmem>>, vector<1x1x128xf32>
    %189 = vector.shape_cast %188 : vector<1x1x128xf32> to vector<1x128xf32>
    %190 = vector.broadcast %189 : vector<1x128xf32> to vector<8x128xf32>
    %191 = arith.addf %187, %190 : vector<8x128xf32>
    %192 = arith.addf %110, %191 : vector<8x128xf32>
    %c1_85 = arith.constant 1 : index
    %c0_86 = arith.constant 0 : index
    %c0_87 = arith.constant 0 : index
    %193 = vector.load %arg3[%c1_85, %c0_86, %c0_87] : memref<2x4x128xf32, #tpu.memory_space<vmem>>, vector<1x1x128xf32>
    %194 = vector.shape_cast %193 : vector<1x1x128xf32> to vector<128xf32>
    %c1_88 = arith.constant 1 : index
    %c1_89 = arith.constant 1 : index
    %c0_90 = arith.constant 0 : index
    %195 = vector.load %arg3[%c1_88, %c1_89, %c0_90] : memref<2x4x128xf32, #tpu.memory_space<vmem>>, vector<1x1x128xf32>
    %196 = vector.shape_cast %195 : vector<1x1x128xf32> to vector<128xf32>
    %cst_91 = arith.constant dense<0.000000e+00> : vector<8xf32>
    %197 = vector.multi_reduction <add>, %192, %cst_91 [1] : vector<8x128xf32> to vector<8xf32>
    %198 = vector.shape_cast %197 : vector<8xf32> to vector<8x1xf32>
    %cst_92 = arith.constant 1.280000e+02 : f32
    %199 = vector.broadcast %cst_92 : f32 to vector<8x1xf32>
    %200 = arith.divf %198, %199 : vector<8x1xf32>
    %201 = vector.broadcast %200 : vector<8x1xf32> to vector<8x128xf32>
    %202 = arith.subf %192, %201 : vector<8x128xf32>
    %203 = arith.mulf %202, %202 : vector<8x128xf32>
    %cst_93 = arith.constant dense<0.000000e+00> : vector<8xf32>
    %204 = vector.multi_reduction <add>, %203, %cst_93 [1] : vector<8x128xf32> to vector<8xf32>
    %205 = vector.shape_cast %204 : vector<8xf32> to vector<8x1xf32>
    %cst_94 = arith.constant 1.280000e+02 : f32
    %206 = vector.broadcast %cst_94 : f32 to vector<8x1xf32>
    %207 = arith.divf %205, %206 : vector<8x1xf32>
    %208 = vector.broadcast %200 : vector<8x1xf32> to vector<8x128xf32>
    %209 = arith.subf %192, %208 : vector<8x128xf32>
    %cst_95 = arith.constant 9.99999974E-6 : f32
    %210 = vector.broadcast %cst_95 : f32 to vector<8x1xf32>
    %211 = arith.addf %207, %210 : vector<8x1xf32>
    %212 = math.rsqrt %211 : vector<8x1xf32>
    %213 = vector.broadcast %212 : vector<8x1xf32> to vector<8x128xf32>
    %214 = arith.mulf %209, %213 : vector<8x128xf32>
    %215 = vector.shape_cast %194 : vector<128xf32> to vector<1x128xf32>
    %216 = vector.broadcast %215 : vector<1x128xf32> to vector<8x128xf32>
    %217 = arith.mulf %214, %216 : vector<8x128xf32>
    %218 = vector.shape_cast %196 : vector<128xf32> to vector<1x128xf32>
    %219 = vector.broadcast %218 : vector<1x128xf32> to vector<8x128xf32>
    %220 = arith.addf %217, %219 : vector<8x128xf32>
    %c1_96 = arith.constant 1 : index
    %c2_97 = arith.constant 2 : index
    %c0_98 = arith.constant 0 : index
    %221 = vector.load %arg3[%c1_96, %c2_97, %c0_98] : memref<2x4x128xf32, #tpu.memory_space<vmem>>, vector<1x1x128xf32>
    %222 = vector.shape_cast %221 : vector<1x1x128xf32> to vector<128xf32>
    %c1_99 = arith.constant 1 : index
    %c3_100 = arith.constant 3 : index
    %c0_101 = arith.constant 0 : index
    %223 = vector.load %arg3[%c1_99, %c3_100, %c0_101] : memref<2x4x128xf32, #tpu.memory_space<vmem>>, vector<1x1x128xf32>
    %224 = vector.shape_cast %223 : vector<1x1x128xf32> to vector<128xf32>
    %cst_102 = arith.constant dense<0.000000e+00> : vector<16xf32>
    %225 = vector.multi_reduction <add>, %3, %cst_102 [1] : vector<16x128xf32> to vector<16xf32>
    %226 = vector.shape_cast %225 : vector<16xf32> to vector<16x1xf32>
    %cst_103 = arith.constant 1.280000e+02 : f32
    %227 = vector.broadcast %cst_103 : f32 to vector<16x1xf32>
    %228 = arith.divf %226, %227 : vector<16x1xf32>
    %229 = vector.broadcast %228 : vector<16x1xf32> to vector<16x128xf32>
    %230 = arith.subf %3, %229 : vector<16x128xf32>
    %231 = arith.mulf %230, %230 : vector<16x128xf32>
    %cst_104 = arith.constant dense<0.000000e+00> : vector<16xf32>
    %232 = vector.multi_reduction <add>, %231, %cst_104 [1] : vector<16x128xf32> to vector<16xf32>
    %233 = vector.shape_cast %232 : vector<16xf32> to vector<16x1xf32>
    %cst_105 = arith.constant 1.280000e+02 : f32
    %234 = vector.broadcast %cst_105 : f32 to vector<16x1xf32>
    %235 = arith.divf %233, %234 : vector<16x1xf32>
    %236 = vector.broadcast %228 : vector<16x1xf32> to vector<16x128xf32>
    %237 = arith.subf %3, %236 : vector<16x128xf32>
    %cst_106 = arith.constant 9.99999974E-6 : f32
    %238 = vector.broadcast %cst_106 : f32 to vector<16x1xf32>
    %239 = arith.addf %235, %238 : vector<16x1xf32>
    %240 = math.rsqrt %239 : vector<16x1xf32>
    %241 = vector.broadcast %240 : vector<16x1xf32> to vector<16x128xf32>
    %242 = arith.mulf %237, %241 : vector<16x128xf32>
    %243 = vector.shape_cast %222 : vector<128xf32> to vector<1x128xf32>
    %244 = vector.broadcast %243 : vector<1x128xf32> to vector<16x128xf32>
    %245 = arith.mulf %242, %244 : vector<16x128xf32>
    %246 = vector.shape_cast %224 : vector<128xf32> to vector<1x128xf32>
    %247 = vector.broadcast %246 : vector<1x128xf32> to vector<16x128xf32>
    %248 = arith.addf %245, %247 : vector<16x128xf32>
    %249 = arith.truncf %220 : vector<8x128xf32> to vector<8x128xbf16>
    %c1_107 = arith.constant 1 : index
    %c0_108 = arith.constant 0 : index
    %c0_109 = arith.constant 0 : index
    %250 = vector.load %arg4[%c1_107, %c0_108, %c0_109] : memref<2x128x128xbf16, #tpu.memory_space<vmem>>, vector<1x128x128xbf16>
    %251 = vector.shape_cast %250 : vector<1x128x128xbf16> to vector<128x128xbf16>
    %cst_110 = arith.constant dense<0.000000e+00> : vector<8x128xf32>
    %252 = tpu.matmul %249, %251, %cst_110 {dimension_numbers = #tpu.dot_dimension_numbers<[1], [0], [0], [1], [0, 0, 1, 1], [], []>} : vector<8x128xbf16>, vector<128x128xbf16>, vector<8x128xf32> -> vector<8x128xf32>
    %c1_111 = arith.constant 1 : index
    %c0_112 = arith.constant 0 : index
    %c0_113 = arith.constant 0 : index
    %253 = vector.load %arg5[%c1_111, %c0_112, %c0_113] : memref<2x1x128xf32, #tpu.memory_space<vmem>>, vector<1x1x128xf32>
    %254 = vector.shape_cast %253 : vector<1x1x128xf32> to vector<1x128xf32>
    %255 = vector.broadcast %254 : vector<1x128xf32> to vector<8x128xf32>
    %256 = arith.addf %252, %255 : vector<8x128xf32>
    %257 = arith.truncf %248 : vector<16x128xf32> to vector<16x128xbf16>
    %c1_114 = arith.constant 1 : index
    %c0_115 = arith.constant 0 : index
    %c0_116 = arith.constant 0 : index
    %258 = vector.load %arg6[%c1_114, %c0_115, %c0_116] : memref<2x128x256xbf16, #tpu.memory_space<vmem>>, vector<1x128x256xbf16>
    %259 = vector.shape_cast %258 : vector<1x128x256xbf16> to vector<128x256xbf16>
    %cst_117 = arith.constant dense<0.000000e+00> : vector<16x256xf32>
    %260 = tpu.matmul %257, %259, %cst_117 {dimension_numbers = #tpu.dot_dimension_numbers<[1], [0], [0], [1], [0, 0, 1, 1], [], []>} : vector<16x128xbf16>, vector<128x256xbf16>, vector<16x256xf32> -> vector<16x256xf32>
    %c1_118 = arith.constant 1 : index
    %c0_119 = arith.constant 0 : index
    %c0_120 = arith.constant 0 : index
    %261 = vector.load %arg7[%c1_118, %c0_119, %c0_120] : memref<2x1x256xf32, #tpu.memory_space<vmem>>, vector<1x1x256xf32>
    %262 = vector.shape_cast %261 : vector<1x1x256xf32> to vector<1x256xf32>
    %263 = vector.broadcast %262 : vector<1x256xf32> to vector<16x256xf32>
    %264 = arith.addf %260, %263 : vector<16x256xf32>
    %265 = vector.extract_strided_slice %264 {offsets = [0, 0], sizes = [16, 128], strides = [1, 1]} : vector<16x256xf32> to vector<16x128xf32>
    %266 = vector.extract_strided_slice %264 {offsets = [0, 128], sizes = [16, 128], strides = [1, 1]} : vector<16x256xf32> to vector<16x128xf32>
    %267 = arith.truncf %256 : vector<8x128xf32> to vector<8x128xbf16>
    %268 = vector.shape_cast %267 : vector<8x128xbf16> to vector<8x4x32xbf16>
    %269 = tpu.transpose %268, [1, 0, 2] : vector<8x4x32xbf16> -> vector<4x8x32xbf16>
    %270 = arith.truncf %265 : vector<16x128xf32> to vector<16x128xbf16>
    %271 = vector.shape_cast %270 : vector<16x128xbf16> to vector<16x4x32xbf16>
    %272 = tpu.transpose %271, [1, 0, 2] : vector<16x4x32xbf16> -> vector<4x16x32xbf16>
    %273 = arith.truncf %266 : vector<16x128xf32> to vector<16x128xbf16>
    %274 = vector.shape_cast %273 : vector<16x128xbf16> to vector<16x4x32xbf16>
    %275 = tpu.transpose %274, [1, 0, 2] : vector<16x4x32xbf16> -> vector<4x16x32xbf16>
    "tpu.trace_start"() <{level = 10 : i32, message = "hqd,hkd->hqk"}> : () -> ()
    %cst_121 = arith.constant dense<0.000000e+00> : vector<4x8x16xf32>
    %276 = tpu.matmul %269, %272, %cst_121 {dimension_numbers = #tpu.dot_dimension_numbers<[2], [2], [1], [1], [0, 0, 0, 1, 1, 1], [0], [0]>} : vector<4x8x32xbf16>, vector<4x16x32xbf16>, vector<4x8x16xf32> -> vector<4x8x16xf32>
    "tpu.trace_stop"() : () -> ()
    %cst_122 = arith.constant dense<0xFF800000> : vector<4x8xf32>
    %277 = vector.multi_reduction <maximumf>, %276, %cst_122 [2] : vector<4x8x16xf32> to vector<4x8xf32>
    %278 = vector.shape_cast %277 : vector<4x8xf32> to vector<4x8x1xf32>
    %279 = vector.broadcast %278 : vector<4x8x1xf32> to vector<4x8x16xf32>
    %280 = arith.subf %276, %279 : vector<4x8x16xf32>
    %281 = math.exp %280 : vector<4x8x16xf32>
    %cst_123 = arith.constant dense<0.000000e+00> : vector<4x8xf32>
    %282 = vector.multi_reduction <add>, %281, %cst_123 [2] : vector<4x8x16xf32> to vector<4x8xf32>
    %283 = vector.shape_cast %282 : vector<4x8xf32> to vector<4x8x1xf32>
    %284 = tpu.reciprocal %283 : vector<4x8x1xf32> -> vector<4x8x1xf32>
    %285 = vector.broadcast %284 : vector<4x8x1xf32> to vector<4x8x16xf32>
    %286 = arith.mulf %281, %285 : vector<4x8x16xf32>
    %287 = arith.truncf %286 : vector<4x8x16xf32> to vector<4x8x16xbf16>
    "tpu.trace_start"() <{level = 10 : i32, message = "hqk,hkd->hqd"}> : () -> ()
    %cst_124 = arith.constant dense<0.000000e+00> : vector<4x8x32xf32>
    %288 = tpu.matmul %287, %275, %cst_124 {dimension_numbers = #tpu.dot_dimension_numbers<[2], [1], [1], [2], [0, 0, 0, 1, 1, 2], [0], [0]>} : vector<4x8x16xbf16>, vector<4x16x32xbf16>, vector<4x8x32xf32> -> vector<4x8x32xf32>
    "tpu.trace_stop"() : () -> ()
    %289 = tpu.transpose %288, [1, 0, 2] : vector<4x8x32xf32> -> vector<8x4x32xf32>
    %290 = vector.shape_cast %289 : vector<8x4x32xf32> to vector<8x128xf32>
    %291 = arith.truncf %290 : vector<8x128xf32> to vector<8x128xbf16>
    %c1_125 = arith.constant 1 : index
    %c0_126 = arith.constant 0 : index
    %c0_127 = arith.constant 0 : index
    %292 = vector.load %arg8[%c1_125, %c0_126, %c0_127] : memref<2x128x128xbf16, #tpu.memory_space<vmem>>, vector<1x128x128xbf16>
    %293 = vector.shape_cast %292 : vector<1x128x128xbf16> to vector<128x128xbf16>
    %cst_128 = arith.constant dense<0.000000e+00> : vector<8x128xf32>
    %294 = tpu.matmul %291, %293, %cst_128 {dimension_numbers = #tpu.dot_dimension_numbers<[1], [0], [0], [1], [0, 0, 1, 1], [], []>} : vector<8x128xbf16>, vector<128x128xbf16>, vector<8x128xf32> -> vector<8x128xf32>
    %c1_129 = arith.constant 1 : index
    %c0_130 = arith.constant 0 : index
    %c0_131 = arith.constant 0 : index
    %295 = vector.load %arg9[%c1_129, %c0_130, %c0_131] : memref<2x1x128xf32, #tpu.memory_space<vmem>>, vector<1x1x128xf32>
    %296 = vector.shape_cast %295 : vector<1x1x128xf32> to vector<1x128xf32>
    %297 = vector.broadcast %296 : vector<1x128xf32> to vector<8x128xf32>
    %298 = arith.addf %294, %297 : vector<8x128xf32>
    %299 = arith.addf %220, %298 : vector<8x128xf32>
    %c1_132 = arith.constant 1 : index
    %c0_133 = arith.constant 0 : index
    %c0_134 = arith.constant 0 : index
    %300 = vector.load %arg10[%c1_132, %c0_133, %c0_134] : memref<2x2x128xf32, #tpu.memory_space<vmem>>, vector<1x1x128xf32>
    %301 = vector.shape_cast %300 : vector<1x1x128xf32> to vector<128xf32>
    %c1_135 = arith.constant 1 : index
    %c1_136 = arith.constant 1 : index
    %c0_137 = arith.constant 0 : index
    %302 = vector.load %arg10[%c1_135, %c1_136, %c0_137] : memref<2x2x128xf32, #tpu.memory_space<vmem>>, vector<1x1x128xf32>
    %303 = vector.shape_cast %302 : vector<1x1x128xf32> to vector<128xf32>
    %cst_138 = arith.constant dense<0.000000e+00> : vector<8xf32>
    %304 = vector.multi_reduction <add>, %299, %cst_138 [1] : vector<8x128xf32> to vector<8xf32>
    %305 = vector.shape_cast %304 : vector<8xf32> to vector<8x1xf32>
    %cst_139 = arith.constant 1.280000e+02 : f32
    %306 = vector.broadcast %cst_139 : f32 to vector<8x1xf32>
    %307 = arith.divf %305, %306 : vector<8x1xf32>
    %308 = vector.broadcast %307 : vector<8x1xf32> to vector<8x128xf32>
    %309 = arith.subf %299, %308 : vector<8x128xf32>
    %310 = arith.mulf %309, %309 : vector<8x128xf32>
    %cst_140 = arith.constant dense<0.000000e+00> : vector<8xf32>
    %311 = vector.multi_reduction <add>, %310, %cst_140 [1] : vector<8x128xf32> to vector<8xf32>
    %312 = vector.shape_cast %311 : vector<8xf32> to vector<8x1xf32>
    %cst_141 = arith.constant 1.280000e+02 : f32
    %313 = vector.broadcast %cst_141 : f32 to vector<8x1xf32>
    %314 = arith.divf %312, %313 : vector<8x1xf32>
    %315 = vector.broadcast %307 : vector<8x1xf32> to vector<8x128xf32>
    %316 = arith.subf %299, %315 : vector<8x128xf32>
    %cst_142 = arith.constant 9.99999974E-6 : f32
    %317 = vector.broadcast %cst_142 : f32 to vector<8x1xf32>
    %318 = arith.addf %314, %317 : vector<8x1xf32>
    %319 = math.rsqrt %318 : vector<8x1xf32>
    %320 = vector.broadcast %319 : vector<8x1xf32> to vector<8x128xf32>
    %321 = arith.mulf %316, %320 : vector<8x128xf32>
    %322 = vector.shape_cast %301 : vector<128xf32> to vector<1x128xf32>
    %323 = vector.broadcast %322 : vector<1x128xf32> to vector<8x128xf32>
    %324 = arith.mulf %321, %323 : vector<8x128xf32>
    %325 = vector.shape_cast %303 : vector<128xf32> to vector<1x128xf32>
    %326 = vector.broadcast %325 : vector<1x128xf32> to vector<8x128xf32>
    %327 = arith.addf %324, %326 : vector<8x128xf32>
    %328 = arith.truncf %327 : vector<8x128xf32> to vector<8x128xbf16>
    %c1_143 = arith.constant 1 : index
    %c0_144 = arith.constant 0 : index
    %c0_145 = arith.constant 0 : index
    %329 = vector.load %arg11[%c1_143, %c0_144, %c0_145] : memref<2x128x1024xbf16, #tpu.memory_space<vmem>>, vector<1x128x1024xbf16>
    %330 = vector.shape_cast %329 : vector<1x128x1024xbf16> to vector<128x1024xbf16>
    %cst_146 = arith.constant dense<0.000000e+00> : vector<8x1024xf32>
    %331 = tpu.matmul %328, %330, %cst_146 {dimension_numbers = #tpu.dot_dimension_numbers<[1], [0], [0], [1], [0, 0, 1, 1], [], []>} : vector<8x128xbf16>, vector<128x1024xbf16>, vector<8x1024xf32> -> vector<8x1024xf32>
    %c1_147 = arith.constant 1 : index
    %c0_148 = arith.constant 0 : index
    %c0_149 = arith.constant 0 : index
    %332 = vector.load %arg12[%c1_147, %c0_148, %c0_149] : memref<2x1x1024xf32, #tpu.memory_space<vmem>>, vector<1x1x1024xf32>
    %333 = vector.shape_cast %332 : vector<1x1x1024xf32> to vector<1x1024xf32>
    %334 = vector.broadcast %333 : vector<1x1024xf32> to vector<8x1024xf32>
    %335 = arith.addf %331, %334 : vector<8x1024xf32>
    %336 = vector.extract_strided_slice %335 {offsets = [0, 0], sizes = [8, 512], strides = [1, 1]} : vector<8x1024xf32> to vector<8x512xf32>
    %337 = vector.extract_strided_slice %335 {offsets = [0, 512], sizes = [8, 512], strides = [1, 1]} : vector<8x1024xf32> to vector<8x512xf32>
    %338 = arith.negf %336 : vector<8x512xf32>
    %339 = math.exp %338 : vector<8x512xf32>
    %cst_150 = arith.constant 1.000000e+00 : f32
    %340 = vector.broadcast %cst_150 : f32 to vector<8x512xf32>
    %341 = arith.addf %340, %339 : vector<8x512xf32>
    %342 = arith.divf %340, %341 : vector<8x512xf32>
    %343 = arith.mulf %336, %342 : vector<8x512xf32>
    %344 = arith.mulf %343, %337 : vector<8x512xf32>
    %c1_151 = arith.constant 1 : index
    %c0_152 = arith.constant 0 : index
    %c0_153 = arith.constant 0 : index
    %345 = vector.load %arg13[%c1_151, %c0_152, %c0_153] : memref<2x2x512xf32, #tpu.memory_space<vmem>>, vector<1x1x512xf32>
    %346 = vector.shape_cast %345 : vector<1x1x512xf32> to vector<512xf32>
    %c1_154 = arith.constant 1 : index
    %c1_155 = arith.constant 1 : index
    %c0_156 = arith.constant 0 : index
    %347 = vector.load %arg13[%c1_154, %c1_155, %c0_156] : memref<2x2x512xf32, #tpu.memory_space<vmem>>, vector<1x1x512xf32>
    %348 = vector.shape_cast %347 : vector<1x1x512xf32> to vector<512xf32>
    %cst_157 = arith.constant dense<0.000000e+00> : vector<8xf32>
    %349 = vector.multi_reduction <add>, %344, %cst_157 [1] : vector<8x512xf32> to vector<8xf32>
    %350 = vector.shape_cast %349 : vector<8xf32> to vector<8x1xf32>
    %cst_158 = arith.constant 5.120000e+02 : f32
    %351 = vector.broadcast %cst_158 : f32 to vector<8x1xf32>
    %352 = arith.divf %350, %351 : vector<8x1xf32>
    %353 = vector.broadcast %352 : vector<8x1xf32> to vector<8x512xf32>
    %354 = arith.subf %344, %353 : vector<8x512xf32>
    %355 = arith.mulf %354, %354 : vector<8x512xf32>
    %cst_159 = arith.constant dense<0.000000e+00> : vector<8xf32>
    %356 = vector.multi_reduction <add>, %355, %cst_159 [1] : vector<8x512xf32> to vector<8xf32>
    %357 = vector.shape_cast %356 : vector<8xf32> to vector<8x1xf32>
    %cst_160 = arith.constant 5.120000e+02 : f32
    %358 = vector.broadcast %cst_160 : f32 to vector<8x1xf32>
    %359 = arith.divf %357, %358 : vector<8x1xf32>
    %360 = vector.broadcast %352 : vector<8x1xf32> to vector<8x512xf32>
    %361 = arith.subf %344, %360 : vector<8x512xf32>
    %cst_161 = arith.constant 9.99999997E-7 : f32
    %362 = vector.broadcast %cst_161 : f32 to vector<8x1xf32>
    %363 = arith.addf %359, %362 : vector<8x1xf32>
    %364 = math.rsqrt %363 : vector<8x1xf32>
    %365 = vector.broadcast %364 : vector<8x1xf32> to vector<8x512xf32>
    %366 = arith.mulf %361, %365 : vector<8x512xf32>
    %367 = vector.shape_cast %346 : vector<512xf32> to vector<1x512xf32>
    %368 = vector.broadcast %367 : vector<1x512xf32> to vector<8x512xf32>
    %369 = arith.mulf %366, %368 : vector<8x512xf32>
    %370 = vector.shape_cast %348 : vector<512xf32> to vector<1x512xf32>
    %371 = vector.broadcast %370 : vector<1x512xf32> to vector<8x512xf32>
    %372 = arith.addf %369, %371 : vector<8x512xf32>
    %373 = arith.truncf %372 : vector<8x512xf32> to vector<8x512xbf16>
    %c1_162 = arith.constant 1 : index
    %c0_163 = arith.constant 0 : index
    %c0_164 = arith.constant 0 : index
    %374 = vector.load %arg14[%c1_162, %c0_163, %c0_164] : memref<2x512x128xbf16, #tpu.memory_space<vmem>>, vector<1x512x128xbf16>
    %375 = vector.shape_cast %374 : vector<1x512x128xbf16> to vector<512x128xbf16>
    %cst_165 = arith.constant dense<0.000000e+00> : vector<8x128xf32>
    %376 = tpu.matmul %373, %375, %cst_165 {dimension_numbers = #tpu.dot_dimension_numbers<[1], [0], [0], [1], [0, 0, 1, 1], [], []>} : vector<8x512xbf16>, vector<512x128xbf16>, vector<8x128xf32> -> vector<8x128xf32>
    %c1_166 = arith.constant 1 : index
    %c0_167 = arith.constant 0 : index
    %c0_168 = arith.constant 0 : index
    %377 = vector.load %arg15[%c1_166, %c0_167, %c0_168] : memref<2x1x128xf32, #tpu.memory_space<vmem>>, vector<1x1x128xf32>
    %378 = vector.shape_cast %377 : vector<1x1x128xf32> to vector<1x128xf32>
    %379 = vector.broadcast %378 : vector<1x128xf32> to vector<8x128xf32>
    %380 = arith.addf %376, %379 : vector<8x128xf32>
    %381 = arith.addf %299, %380 : vector<8x128xf32>
    %c0_169 = arith.constant 0 : index
    %c0_170 = arith.constant 0 : index
    %c0_171 = arith.constant 0 : index
    %382 = vector.load %arg16[%c0_169, %c0_170, %c0_171] : memref<1x8x128xf32, #tpu.memory_space<vmem>>, vector<1x8x128xf32>
    %383 = vector.shape_cast %382 : vector<1x8x128xf32> to vector<8x128xf32>
    %384 = vector.shape_cast %381 : vector<8x128xf32> to vector<1x8x128xf32>
    tpu.vector_store %arg16[%c0_169, %c0_170, %c0_171], %384 {strides = array<i32>} : memref<1x8x128xf32, #tpu.memory_space<vmem>>, vector<1x8x128xf32>,
    return
  }
  func.func @transform_0(%arg0: i32) -> (i32, i32, i32) {
    %c0_i32 = arith.constant 0 : i32
    %c0_i32_0 = arith.constant 0 : i32
    %c0_i32_1 = arith.constant 0 : i32
    return %arg0, %c0_i32, %c0_i32_0 : i32, i32, i32
  }
  func.func @transform_1(%arg0: i32) -> (i32, i32, i32) {
    %c0_i32 = arith.constant 0 : i32
    %c0_i32_0 = arith.constant 0 : i32
    %c0_i32_1 = arith.constant 0 : i32
    return %arg0, %c0_i32, %c0_i32_0 : i32, i32, i32
  }
  func.func @transform_2(%arg0: i32) -> (i32, i32, i32) {
    %c0_i32 = arith.constant 0 : i32
    %c0_i32_0 = arith.constant 0 : i32
    %c0_i32_1 = arith.constant 0 : i32
    %c0_i32_2 = arith.constant 0 : i32
    return %c0_i32, %c0_i32_0, %c0_i32_1 : i32, i32, i32
  }
  func.func @transform_3(%arg0: i32) -> (i32, i32, i32) {
    %c0_i32 = arith.constant 0 : i32
    %c0_i32_0 = arith.constant 0 : i32
    %c0_i32_1 = arith.constant 0 : i32
    %c0_i32_2 = arith.constant 0 : i32
    return %c0_i32, %c0_i32_0, %c0_i32_1 : i32, i32, i32
  }
  func.func @transform_4(%arg0: i32) -> (i32, i32, i32) {
    %c0_i32 = arith.constant 0 : i32
    %c0_i32_0 = arith.constant 0 : i32
    %c0_i32_1 = arith.constant 0 : i32
    %c0_i32_2 = arith.constant 0 : i32
    return %c0_i32, %c0_i32_0, %c0_i32_1 : i32, i32, i32
  }
  func.func @transform_5(%arg0: i32) -> (i32, i32, i32) {
    %c0_i32 = arith.constant 0 : i32
    %c0_i32_0 = arith.constant 0 : i32
    %c0_i32_1 = arith.constant 0 : i32
    %c0_i32_2 = arith.constant 0 : i32
    return %c0_i32, %c0_i32_0, %c0_i32_1 : i32, i32, i32
  }
  func.func @transform_6(%arg0: i32) -> (i32, i32, i32) {
    %c0_i32 = arith.constant 0 : i32
    %c0_i32_0 = arith.constant 0 : i32
    %c0_i32_1 = arith.constant 0 : i32
    %c0_i32_2 = arith.constant 0 : i32
    return %c0_i32, %c0_i32_0, %c0_i32_1 : i32, i32, i32
  }
  func.func @transform_7(%arg0: i32) -> (i32, i32, i32) {
    %c0_i32 = arith.constant 0 : i32
    %c0_i32_0 = arith.constant 0 : i32
    %c0_i32_1 = arith.constant 0 : i32
    %c0_i32_2 = arith.constant 0 : i32
    return %c0_i32, %c0_i32_0, %c0_i32_1 : i32, i32, i32
  }
  func.func @transform_8(%arg0: i32) -> (i32, i32, i32) {
    %c0_i32 = arith.constant 0 : i32
    %c0_i32_0 = arith.constant 0 : i32
    %c0_i32_1 = arith.constant 0 : i32
    %c0_i32_2 = arith.constant 0 : i32
    return %c0_i32, %c0_i32_0, %c0_i32_1 : i32, i32, i32
  }
  func.func @transform_9(%arg0: i32) -> (i32, i32, i32) {
    %c0_i32 = arith.constant 0 : i32
    %c0_i32_0 = arith.constant 0 : i32
    %c0_i32_1 = arith.constant 0 : i32
    %c0_i32_2 = arith.constant 0 : i32
    return %c0_i32, %c0_i32_0, %c0_i32_1 : i32, i32, i32
  }
  func.func @transform_10(%arg0: i32) -> (i32, i32, i32) {
    %c0_i32 = arith.constant 0 : i32
    %c0_i32_0 = arith.constant 0 : i32
    %c0_i32_1 = arith.constant 0 : i32
    %c0_i32_2 = arith.constant 0 : i32
    return %c0_i32, %c0_i32_0, %c0_i32_1 : i32, i32, i32
  }
  func.func @transform_11(%arg0: i32) -> (i32, i32, i32) {
    %c0_i32 = arith.constant 0 : i32
    %c0_i32_0 = arith.constant 0 : i32
    %c0_i32_1 = arith.constant 0 : i32
    %c0_i32_2 = arith.constant 0 : i32
    return %c0_i32, %c0_i32_0, %c0_i32_1 : i32, i32, i32
  }
  func.func @transform_12(%arg0: i32) -> (i32, i32, i32) {
    %c0_i32 = arith.constant 0 : i32
    %c0_i32_0 = arith.constant 0 : i32
    %c0_i32_1 = arith.constant 0 : i32
    %c0_i32_2 = arith.constant 0 : i32
    return %c0_i32, %c0_i32_0, %c0_i32_1 : i32, i32, i32
  }
  func.func @transform_13(%arg0: i32) -> (i32, i32, i32) {
    %c0_i32 = arith.constant 0 : i32
    %c0_i32_0 = arith.constant 0 : i32
    %c0_i32_1 = arith.constant 0 : i32
    %c0_i32_2 = arith.constant 0 : i32
    return %c0_i32, %c0_i32_0, %c0_i32_1 : i32, i32, i32
  }
  func.func @transform_14(%arg0: i32) -> (i32, i32, i32) {
    %c0_i32 = arith.constant 0 : i32
    %c0_i32_0 = arith.constant 0 : i32
    %c0_i32_1 = arith.constant 0 : i32
    %c0_i32_2 = arith.constant 0 : i32
    return %c0_i32, %c0_i32_0, %c0_i32_1 : i32, i32, i32
  }
  func.func @transform_15(%arg0: i32) -> (i32, i32, i32) {
    %c0_i32 = arith.constant 0 : i32
    %c0_i32_0 = arith.constant 0 : i32
    %c0_i32_1 = arith.constant 0 : i32
    return %arg0, %c0_i32, %c0_i32_0 : i32, i32, i32
  }
}

</mosaic_0001>

<bundles_post_ra>
// kernel: tpu_custom_call.1
= control target key start
LH: loop header
LB: loop body
LE: loop exit
PB: predicated region body
PF: predicated region fallthrough
CT: control target
= control target key end

     0   :  { %s9132_s0 = inlined_call_operand.hbm [shape: f32[2,8,128], index: 0, kind: input, shape index: {}]   ;;  %s9133_s1 = inlined_call_operand.hbm [shape: f32[2,16,128], index: 1, kind: input, shape index: {}]   ;;  %s9134_s2 = inlined_call_operand.hbm [shape: f32[2,4,128], index: 2, kind: input, shape index: {}]   ;;  %s9135_s3 = inlined_call_operand.hbm [shape: bf16[2,128,128], index: 3, kind: input, shape index: {}]   ;;  %s9136_s4 = inlined_call_operand.vmem [shape: f32[2,1,128], index: 4, kind: input, shape index: {}]   ;;  %s9137_s5 = inlined_call_operand.hbm [shape: bf16[2,128,256], index: 5, kind: input, shape index: {}]   ;;  %s9138_s6 = inlined_call_operand.hbm [shape: f32[2,1,256], index: 6, kind: input, shape index: {}]   ;;  %s9139_s7 = inlined_call_operand.hbm [shape: bf16[2,128,128], index: 7, kind: input, shape index: {}]   ;;  %s9140_s8 = inlined_call_operand.hbm [shape: f32[2,1,128], index: 8, kind: input, shape index: {}]   ;;  %s9141_s9 = inlined_call_operand.hbm [shape: f32[2,2,128], index: 9, kind: input, shape index: {}]   ;;  %s9142_s10 = inlined_call_operand.hbm [shape: bf16[2,128,1024], index: 10, kind: input, shape index: {}]   ;;  %s9143_s11 = inlined_call_operand.vmem [shape: f32[2,1,1024], index: 11, kind: input, shape index: {}]   ;;  %s9144_s12 = inlined_call_operand.vmem [shape: f32[2,2,512], index: 12, kind: input, shape index: {}]   ;;  %s9145_s13 = inlined_call_operand.hbm [shape: bf16[2,512,128], index: 13, kind: input, shape index: {}]   ;;  %s9146_s14 = inlined_call_operand.vmem [shape: f32[2,1,128], index: 14, kind: input, shape index: {}]   ;;  %s9147_s15 = inlined_call_operand.hbm [shape: f32[2,8,128], index: 15, kind: output, shape index: {}]  }
   0x1   :  { %9167 = sst [smem:[#allocation30_spill]] %s9132_s0 }
   0x2   :  { %9168 = sst [smem:[#allocation31_spill]] %s9133_s1 }
   0x3   :  { %9169 = sst [smem:[#allocation32_spill]] %s9134_s2 }
   0x4   :  { %9170 = sst [smem:[#allocation33_spill]] %s9135_s3 }
   0x5   :  { %9171 = sst [smem:[#allocation34_spill]] %s9136_s4 }
   0x6   :  { %9172 = sst [smem:[#allocation35_spill]] %s9137_s5 }
   0x7   :  { %9173 = sst [smem:[#allocation36_spill]] %s9138_s6 }
   0x8   :  { %9174 = sst [smem:[#allocation37_spill]] %s9143_s11 }
   0x9   :  { %9175 = sst [smem:[#allocation38_spill]] %s9144_s12 }
   0xa   :  { %9176 = sst [smem:[#allocation39_spill]] %s9146_s14 }
   0xb   :  { %9177 = sst [smem:[#allocation40_spill]] %s9147_s15 }
   0xc   :  { %20 = vsyncpa [#allocation3], 0 }
   0xd   :  { %22 = vsyncpa [#allocation3 + $0x1], 0 }
   0xe   :  { %23 = vsyncpa [#allocation6], 0 }
   0xf   :  { %25 = vsyncpa [#allocation6 + $0x1], 0 }
  0x10   :  { %26 = vsyncpa [#allocation9], 0 }
  0x11   :  { %27 = vsyncpa [#allocation12], 0 }
  0x12   :  { %28 = vsyncpa [#allocation15], 0 }
  0x13   :  { %29 = vsyncpa [#allocation18], 0 }
  0x14   :  { %30 = vsyncpa [#allocation4], 0 }
  0x15   :  { %32 = vsyncpa [#allocation4 + $0x1], 0  ;;  %s8014_s18 = smov 0   ;;  %s8016_s19 = smov 0  }
  0x16   :  { %s8018_s20 = smov 0   ;;  %s8020_s21 = smov 0  }
  0x17 LB: > { %s7905_s22 = smov [#allocation7]   ;;  %s8035_s24 = sadd.s32 4294967295, %s7903_s21   ;;  %s7903_s21 = sphi %s8020_s21, %s9223_s21   ;;  %s7899_s20 = sphi %s8018_s20, %s9222_s20   ;;  %s7895_s19 = sphi %s8016_s19, %s9221_s19   ;;  %s7891_s18 = sphi %s8014_s18, %s9220_s18  }
  0x18   : > { %s406_s23 = sshll.u32 %s7905_s22, 4  ;;  %p6428_p0 = scmp.ge.s32.totalorder %s7903_s21, 1  ;;  %s8040_s23 = int_to_ptr.vmem [resolvable:$true] %s406_s23 }
  0x19   : > { %p9159_p1 = scmp.eq.s32.totalorder %s8035_s24, 0  ;;  %p394_p2 = scmp.lt.s32.totalorder %s7903_s21, 3 }
  0x1a   : > { %s7906_s26 = smov [#allocation8]   ;;  %s7907_s29 = smov [#allocation11]  }
  0x1b   : > { %p8042_p3 = pnand %p6428_p0, %p394_p2  ;;  %s419_s27 = sshll.u32 %s7906_s26, 4  ;;  %s8055_s27 = int_to_ptr.vmem [resolvable:$true] %s419_s27 }
  0x1c   : > { %s448_s30 = sshll.u32 %s7907_s29, 4  ;;  %s9181_s2 = sld [smem:[#allocation32_spill]]  ;;  %s8057_s30 = int_to_ptr.vmem [resolvable:$true] %s448_s30 }
  0x1d   : > { %s9178_s25 = scalar_select %p8042_p3, 1, 0 }
  0x1e   : > { %p7160_p5 = pneg %p8042_p3 }
  0x1f   : > { %9179 = sst [smem:[#allocation29_spill]] %s9178_s25 }
  0x20   : > { %p8051_p6 = pnand %p7160_p5, %p9159_p1 }
  0x22   : > { %s7501_s22 = scalar_lea.hbm %s9181_s2, 128  ;;  %p8067_p8 = pneg %p8051_p6 }
  0x23   : > { %p7502_p7 = scmp.ne.s32.totalorder %s9181_s2, %s7501_s22  ;;  %p7508_p11 = scmp.lt.u32.totalorder %s7501_s22, %s9181_s2 }
  0x25   : > { %p7504_p9 = pnand %p8067_p8, %p7502_p7 }
  0x27   : > { %p7505_p10 = pneg %p7504_p9 }
  0x29   : > { %p7510_p12 = pnand %p7508_p11, %p7505_p10 }
  0x2b   : > { %7513 = shalt.err (!%p7510_p12)
}
  0x2c   : > { %s7514_s14 = scalar_lea.vmem %s8040_s23, 128  ;;  %p7522_p5 = scmp.lt.s32.totalorder %s8040_s23, %s8040_s23 }
  0x2d   : > { %p7515_p13 = scmp.ne.s32.totalorder %s8040_s23, %s7514_s14  ;;  %p7523_p4 = scmp.lt.s32.totalorder %s7514_s14, %s7514_s14 }
  0x2f   : > { %p7517_p0 = pnand %p7515_p13, %p8067_p8  ;;  %p7524_p7 = por %p7523_p4, %p7522_p5 }
  0x31   : > { %p7518_p2 = pneg %p7517_p0 }
  0x33   : > { %p7525_p9 = pnand %p7524_p7, %p7518_p2 }
  0x35   : > { %7528 = shalt.err (!%p7525_p9)
}
  0x36   : > { %s9155_s15 = smov 64   ;;  %s9157_s12 = smov 4  }
  0x37   : > { %7163 = dma.hbm_to_vmem [thread:$0]  (!%p8051_p6), %s9181_s2, 128, %s8040_s23, [#allocation6], %s9155_s15, %s9155_s15, %s9157_s12  }
  0x38   : > { %s9183_s3 = sld [smem:[#allocation33_spill]] }
  0x3e   : > { %s7529_s14 = scalar_lea.hbm %s9183_s3, 2048 }
  0x3f   : > { %p7530_p4 = scmp.ne.s32.totalorder %s9183_s3, %s7529_s14  ;;  %p7536_p12 = scmp.lt.u32.totalorder %s7529_s14, %s9183_s3 }
  0x41   : > { %p7532_p10 = pnand %p7530_p4, %p8067_p8 }
  0x43   : > { %p7533_p11 = pneg %p7532_p10 }
  0x45   : > { %p7538_p13 = pnand %p7536_p12, %p7533_p11 }
  0x47   : > { %7541 = shalt.err (!%p7538_p13)
}
  0x48   : > { %s7542_s23 = scalar_lea.vmem %s8055_s27, 2048  ;;  %p7550_p7 = scmp.lt.s32.totalorder %s8055_s27, %s8055_s27 }
  0x49   : > { %p7543_p0 = scmp.ne.s32.totalorder %s8055_s27, %s7542_s23  ;;  %p7551_p9 = scmp.lt.s32.totalorder %s7542_s23, %s7542_s23 }
  0x4b   : > { %p7545_p2 = pnand %p7543_p0, %p8067_p8  ;;  %p7552_p4 = por %p7551_p9, %p7550_p7 }
  0x4d   : > { %p7546_p5 = pneg %p7545_p2 }
  0x4f   : > { %p7553_p10 = pnand %p7552_p4, %p7546_p5 }
  0x51   : > { %7556 = shalt.err (!%p7553_p10)
}
  0x52   : > { %7166 = dma.hbm_to_vmem [thread:$0]  (!%p8051_p6), %s9183_s3, 2048, %s8055_s27, [#allocation9], %s9155_s15, %s9155_s15, %s9157_s12  }
  0x53   : > { %s9184_s6 = sld [smem:[#allocation36_spill]] }
  0x59   : > { %s7557_s16 = scalar_lea.hbm %s9184_s6, 64 }
  0x5a   : > { %p7558_p11 = scmp.ne.s32.totalorder %s9184_s6, %s7557_s16  ;;  %p7564_p0 = scmp.lt.u32.totalorder %s7557_s16, %s9184_s6 }
  0x5c   : > { %p7560_p12 = pnand %p7558_p11, %p8067_p8 }
  0x5e   : > { %p7561_p13 = pneg %p7560_p12 }
  0x60   : > { %p7566_p2 = pnand %p7564_p0, %p7561_p13 }
  0x62   : > { %7569 = shalt.err (!%p7566_p2)
}
  0x63   : > { %s7570_s27 = scalar_lea.vmem %s8057_s30, 64  ;;  %p7578_p4 = scmp.lt.s32.totalorder %s8057_s30, %s8057_s30 }
  0x64   : > { %p7571_p5 = scmp.ne.s32.totalorder %s8057_s30, %s7570_s27  ;;  %p7579_p10 = scmp.lt.s32.totalorder %s7570_s27, %s7570_s27 }
  0x66   : > { %p7573_p7 = pnand %p7571_p5, %p8067_p8  ;;  %p7580_p11 = por %p7579_p10, %p7578_p4 }
  0x68   : > { %p7574_p9 = pneg %p7573_p7 }
  0x6a   : > { %p7581_p12 = pnand %p7580_p11, %p7574_p9 }
  0x6c   : > { %7584 = shalt.err (!%p7581_p12)
}
  0x6d   : > { %s9162_s23 = smov 32   ;;  %s9161_s1 = smov 2  }
  0x6e   : > { %7172 = dma.hbm_to_vmem [thread:$0]  (!%p8051_p6), %s9184_s6, 64, %s8057_s30, [#allocation12], %s9162_s23, %s9162_s23, %s9161_s1  }
  0x6f   : > { %s7912_s25 = smov [#allocation14]   ;;  %s7585_s29 = scalar_lea.hbm %s9140_s8, 32 }
  0x70   : > { %s474_s16 = sshll.u32 %s7912_s25, 4  ;;  %p7586_p13 = scmp.ne.s32.totalorder %s9140_s8, %s7585_s29  ;;  %s475_s16 = int_to_ptr.vmem [resolvable:$true] %s474_s16 }
  0x71   : > { %p7592_p5 = scmp.lt.u32.totalorder %s7585_s29, %s9140_s8 }
  0x72   : > { %p7588_p0 = pnand %p7586_p13, %p8067_p8 }
  0x74   : > { %p7589_p2 = pneg %p7588_p0 }
  0x76   : > { %p7594_p7 = pnand %p7592_p5, %p7589_p2 }
  0x78   : > { %7597 = shalt.err (!%p7594_p7)
}
  0x79   : > { %s7598_s30 = scalar_lea.vmem %s475_s16, 32  ;;  %p7606_p11 = scmp.lt.s32.totalorder %s475_s16, %s475_s16 }
  0x7a   : > { %p7599_p9 = scmp.ne.s32.totalorder %s475_s16, %s7598_s30  ;;  %p7607_p12 = scmp.lt.s32.totalorder %s7598_s30, %s7598_s30 }
  0x7c   : > { %p7601_p4 = pnand %p7599_p9, %p8067_p8  ;;  %p7608_p1 = por %p7607_p12, %p7606_p11 }
  0x7e   : > { %p7602_p10 = pneg %p7601_p4 }
  0x80   : > { %p7609_p3 = pnand %p7608_p1, %p7602_p10 }
  0x82   : > { %7612 = shalt.err (!%p7609_p3)
}
  0x83   : > { %s7913_s4 = smov 16   ;;  %s7914_s11 = smov 1  }
  0x84   : > { %7178 = dma.hbm_to_vmem [thread:$0]  (!%p8051_p6), %s9140_s8, 32, %s475_s16, [#allocation15], %s7913_s4, %s7913_s4, %s7914_s11  }
  0x85   : > { %s7915_s25 = smov [#allocation17]   ;;  %s7916_s22 = smov [#allocation10]  }
  0x86   : > { %s500_s17 = sshll.u32 %s7915_s25, 4  ;;  %s435_s29 = sshll.u32 %s7916_s22, 4  ;;  %s501_s17 = int_to_ptr.vmem [resolvable:$true] %s500_s17  ;;  %s436_s29 = int_to_ptr.vmem [resolvable:$true] %s435_s29 }
  0x87   : > { %s7613_s30 = scalar_lea.hbm %s9142_s10, 16384 }
  0x88   : > { %p7614_p1 = scmp.ne.s32.totalorder %s9142_s10, %s7613_s30  ;;  %p7620_p0 = scmp.lt.u32.totalorder %s7613_s30, %s9142_s10 }
  0x8a   : > { %p7616_p3 = pnand %p7614_p1, %p8067_p8 }
  0x8c   : > { %p7617_p13 = pneg %p7616_p3 }
  0x8e   : > { %p7622_p2 = pnand %p7620_p0, %p7617_p13 }
  0x90   : > { %7625 = shalt.err (!%p7622_p2)
}
  0x91   : > { %s7626_s16 = scalar_lea.vmem %s501_s17, 16384  ;;  %p7634_p4 = scmp.lt.s32.totalorder %s501_s17, %s501_s17 }
  0x92   : > { %p7627_p5 = scmp.ne.s32.totalorder %s501_s17, %s7626_s16  ;;  %p7635_p10 = scmp.lt.s32.totalorder %s7626_s16, %s7626_s16 }
  0x94   : > { %p7629_p7 = pnand %p7627_p5, %p8067_p8  ;;  %p7636_p11 = por %p7635_p10, %p7634_p4 }
  0x96   : > { %p7630_p9 = pneg %p7629_p7 }
  0x98   : > { %p7637_p12 = pnand %p7636_p11, %p7630_p9 }
  0x9a   : > { %7640 = shalt.err (!%p7637_p12)
}
  0x9b   : > { %s7917_s23 = smov 512   ;;  %s9185_s1 = smov 32  }
  0x9c   : > { %7184 = dma.hbm_to_vmem [thread:$0]  (!%p8051_p6), %s9142_s10, 16384, %s501_s17, [#allocation18], %s7917_s23, %s7917_s23, %s9185_s1  }
  0x9d   : > { %s9186_s5 = sld [smem:[#allocation35_spill]] }
  0xa3   : > { %s7641_s15 = scalar_lea.hbm %s9186_s5, 4096 }
  0xa4   : > { %p7642_p1 = scmp.ne.s32.totalorder %s9186_s5, %s7641_s15  ;;  %p7648_p0 = scmp.lt.u32.totalorder %s7641_s15, %s9186_s5 }
  0xa6   : > { %p7644_p3 = pnand %p7642_p1, %p8067_p8 }
  0xa8   : > { %p7645_p13 = pneg %p7644_p3 }
  0xaa   : > { %p7650_p2 = pnand %p7648_p0, %p7645_p13 }
  0xac   : > { %7653 = shalt.err (!%p7650_p2)
}
  0xad   : > { %s7654_s27 = scalar_lea.vmem %s436_s29, 4096  ;;  %p7662_p4 = scmp.lt.s32.totalorder %s436_s29, %s436_s29 }
  0xae   : > { %p7655_p5 = scmp.ne.s32.totalorder %s436_s29, %s7654_s27  ;;  %p7663_p10 = scmp.lt.s32.totalorder %s7654_s27, %s7654_s27 }
  0xb0   : > { %p7657_p7 = pnand %p7655_p5, %p8067_p8  ;;  %p7664_p11 = por %p7663_p10, %p7662_p4 }
  0xb2   : > { %p7658_p9 = pneg %p7657_p7 }
  0xb4   : > { %p7665_p12 = pnand %p7664_p11, %p7658_p9 }
  0xb6   : > { %7668 = shalt.err (!%p7665_p12)
}
  0xb7   : > { %s9164_s17 = smov 128   ;;  %s9165_s30 = smov 8  }
  0xb8   : > { %7169 = dma.hbm_to_vmem [thread:$0]  (!%p8051_p6), %s9186_s5, 4096, %s436_s29, [#allocation9], %s9164_s17, %s9164_s17, %s9165_s30  }
  0xb9   : > { %s7920_s4 = smov [#allocation13]   ;;  %s7921_s3 = smov [#allocation16]  }
  0xba   : > { %s461_s2 = sshll.u32 %s7920_s4, 4  ;;  %s487_s11 = sshll.u32 %s7921_s3, 4  ;;  %s462_s2 = int_to_ptr.vmem [resolvable:$true] %s461_s2  ;;  %s488_s11 = int_to_ptr.vmem [resolvable:$true] %s487_s11 }
  0xbb   : > { %s7669_s25 = scalar_lea.hbm %s9139_s7, 2048 }
  0xbc   : > { %p7670_p1 = scmp.ne.s32.totalorder %s9139_s7, %s7669_s25  ;;  %p7676_p0 = scmp.lt.u32.totalorder %s7669_s25, %s9139_s7 }
  0xbe   : > { %p7672_p3 = pnand %p7670_p1, %p8067_p8 }
  0xc0   : > { %p7673_p13 = pneg %p7672_p3 }
  0xc2   : > { %p7678_p2 = pnand %p7676_p0, %p7673_p13 }
  0xc4   : > { %7681 = shalt.err (!%p7678_p2)
}
  0xc5   : > { %s7682_s29 = scalar_lea.vmem %s462_s2, 2048  ;;  %p7690_p4 = scmp.lt.s32.totalorder %s462_s2, %s462_s2 }
  0xc6   : > { %p7683_p5 = scmp.ne.s32.totalorder %s462_s2, %s7682_s29  ;;  %p7691_p10 = scmp.lt.s32.totalorder %s7682_s29, %s7682_s29 }
  0xc8   : > { %p7685_p7 = pnand %p7683_p5, %p8067_p8  ;;  %p7692_p11 = por %p7691_p10, %p7690_p4 }
  0xca   : > { %p7686_p9 = pneg %p7685_p7 }
  0xcc   : > { %p7693_p12 = pnand %p7692_p11, %p7686_p9 }
  0xce   : > { %7696 = shalt.err (!%p7693_p12)
}
  0xcf   : > { %s9187_s16 = smov 4   ;;  %s9188_s23 = smov 64  }
  0xd0   : > { %7175 = dma.hbm_to_vmem [thread:$0]  (!%p8051_p6), %s9139_s7, 2048, %s462_s2, [#allocation12], %s9188_s23, %s9188_s23, %s9187_s16  }
  0xd1   : > { %s7697_s12 = scalar_lea.hbm %s9141_s9, 64 }
  0xd2   : > { %p7698_p1 = scmp.ne.s32.totalorder %s9141_s9, %s7697_s12  ;;  %p7704_p0 = scmp.lt.u32.totalorder %s7697_s12, %s9141_s9 }
  0xd4   : > { %p7700_p3 = pnand %p7698_p1, %p8067_p8 }
  0xd6   : > { %p7701_p13 = pneg %p7700_p3 }
  0xd8   : > { %p7706_p2 = pnand %p7704_p0, %p7701_p13 }
  0xda   : > { %7709 = shalt.err (!%p7706_p2)
}
  0xdb   : > { %s7710_s29 = scalar_lea.vmem %s488_s11, 64  ;;  %p7718_p4 = scmp.lt.s32.totalorder %s488_s11, %s488_s11 }
  0xdc   : > { %p7711_p5 = scmp.ne.s32.totalorder %s488_s11, %s7710_s29  ;;  %p7719_p10 = scmp.lt.s32.totalorder %s7710_s29, %s7710_s29 }
  0xde   : > { %p7713_p7 = pnand %p7711_p5, %p8067_p8  ;;  %p7720_p11 = por %p7719_p10, %p7718_p4 }
  0xe0   : > { %p7714_p9 = pneg %p7713_p7 }
  0xe2   : > { %p7721_p12 = pnand %p7720_p11, %p7714_p9 }
  0xe4   : > { %7724 = shalt.err (!%p7721_p12)
}
  0xe5   : > { %s9189_s2 = smov 2   ;;  %s7922_s3 = smov [#allocation19]  }
  0xe6   : > { %7181 = dma.hbm_to_vmem [thread:$0]  (!%p8051_p6), %s9141_s9, 64, %s488_s11, [#allocation15], %s9185_s1, %s9185_s1, %s9189_s2  }
  0xe7   : > { %s519_s15 = sshll.u32 %s7922_s3, 4  ;;  %s7725_s22 = scalar_lea.hbm %s9145_s13, 8192  ;;  %s520_s15 = int_to_ptr.vmem [resolvable:$true] %s519_s15 }
  0xe8   : > { %p7726_p1 = scmp.ne.s32.totalorder %s9145_s13, %s7725_s22  ;;  %p7732_p0 = scmp.lt.u32.totalorder %s7725_s22, %s9145_s13 }
  0xea   : > { %p7728_p3 = pnand %p7726_p1, %p8067_p8 }
  0xec   : > { %p7729_p13 = pneg %p7728_p3 }
  0xee   : > { %p7734_p2 = pnand %p7732_p0, %p7729_p13 }
  0xf0   : > { %7737 = shalt.err (!%p7734_p2)
}
  0xf1   : > { %s7738_s1 = scalar_lea.vmem %s520_s15, 8192  ;;  %p7746_p4 = scmp.lt.s32.totalorder %s520_s15, %s520_s15 }
  0xf2   : > { %p7739_p5 = scmp.ne.s32.totalorder %s520_s15, %s7738_s1  ;;  %p7747_p10 = scmp.lt.s32.totalorder %s7738_s1, %s7738_s1 }
  0xf4   : > { %p7741_p7 = pnand %p7739_p5, %p8067_p8  ;;  %p7748_p11 = por %p7747_p10, %p7746_p4 }
  0xf6   : > { %p7742_p9 = pneg %p7741_p7 }
  0xf8   : > { %p7749_p12 = pnand %p7748_p11, %p7742_p9 }
  0xfa   : > { %7752 = shalt.err (!%p7749_p12)
}
  0xfb   : > { %7187 = dma.hbm_to_vmem [thread:$0]  (!%p8051_p6), %s9145_s13, 8192, %s520_s15, [#allocation18], %s9188_s23, %s9188_s23, %s9187_s16  }
  0xfc   : > { %s6427_s28 = sadd.s32 4294967294, %s7903_s21   ;;  %s8266_s26 = sadd.s32 1, %s7903_s21  }
  0xfd   : > { %s42_s2 = ssub.s32 %s7903_s21, %s8266_s26  ;;  %s45_s6 = sadd.s32 1, %s7899_s20 }
  0xfe   : > { %p43_p8 = scmp.eq.s32.totalorder %s42_s2, 0  ;;  %p52_p1 = scmp.ne.s32.totalorder %s7899_s20, %s7895_s19 }
  0xff   : > { %p53_p3 = scmp.eq.s32.totalorder %s7903_s21, 0  ;;  %p58_p13 = scmp.ne.s32.totalorder %s7895_s19, %s7891_s18 }
 0x100   : > { %s8277_s4 = scalar_select %p43_p8, %s7899_s20, %s45_s6  }
 0x101   : > { %p8279_p0 = por %p53_p3, %p52_p1  ;;  %p9191_p2 = scmp.eq.s32.totalorder %s8035_s24, 0 }
 0x102   : > { %p381_p5 = scmp.eq.s32.totalorder %s8035_s24, 1  ;;  %p387_p7 = scmp.eq.s32.totalorder %s6427_s28, 1 }
 0x103   : > { %p8285_p6 = por %p9191_p2, %p58_p13  ;;  %p7208_p9 = scmp.lt.s32.totalorder %s7903_s21, 2 }
 0x104   : > { %s8292_s23 = sand.u32 1, %s7899_s20   ;;  %p8294_p4 = por %p381_p5, %p52_p1 }
 0x105   : > { %p8298_p10 = por %p387_p7, %p58_p13  ;;  %s6439_s25 = sshll.u32 %s8292_s23, 3 }
 0x106   : > { %s9193_s15 = scalar_select %p8294_p4, 1, 0 }
 0x107   : > { %s9194_s12 = scalar_select %p8298_p10, 1, 0 }
 0x108   : > { %s6440_s22 = sshll.u32 %s7903_s21, 7  ;;  %s9195_s0 = sld [smem:[#allocation30_spill]] }
 0x109   : > { %s540_s1 = scalar_lea.vmem [#allocation2], %s6439_s25  ;;  %p8313_p11 = pnand %p7208_p9, %p8279_p0 }
 0x10a   : > { %s547_s17 = sshll.u32 %s540_s1, 4  ;;  %s6441_s28 = sshll.u32 %s8292_s23, 4  ;;  %s8309_s17 = int_to_ptr.vmem [resolvable:$true] %s547_s17 }
 0x10b   : > { %s554_s2 = sand.u32 1, %s7903_s21   ;;  %s537_s6 = scalar_lea.sflag [#allocation3], %s8292_s23 }
 0x10c   : > { %p7755_p8 = pneg %p8313_p11 }
 0x10e   : > { %s8307_s29 = scalar_lea.hbm %s9195_s0, %s6440_s22  ;;  %s7758_s3 = scalar_lea.hbm %s9195_s0, 256 }
 0x10f   : > { %s7753_s22 = scalar_lea.hbm %s8307_s29, 128  ;;  %p7759_p13 = scmp.lt.u32.totalorder %s8307_s29, %s9195_s0 }
 0x110   : > { %p7754_p12 = scmp.ne.s32.totalorder %s8307_s29, %s7753_s22  ;;  %p7760_p0 = scmp.lt.u32.totalorder %s7758_s3, %s7753_s22 }
 0x111   : > { %p7762_p5 = scmp.lt.u32.totalorder %s7753_s22, %s8307_s29 }
 0x112   : > { %p7756_p1 = pnand %p7755_p8, %p7754_p12  ;;  %p7761_p2 = por %p7760_p0, %p7759_p13 }
 0x114   : > { %p7757_p3 = pneg %p7756_p1  ;;  %p7763_p7 = por %p7762_p5, %p7761_p2 }
 0x116   : > { %p7764_p9 = pnand %p7763_p7, %p7757_p3 }
 0x118   : > { %7767 = shalt.err (!%p7764_p9)
}
 0x119   : > { %s7768_s30 = scalar_lea.vmem %s8309_s17, 128  ;;  %s7923_s25 = smov [#allocation2]  }
 0x11a   : > { %p7769_p12 = scmp.ne.s32.totalorder %s8309_s17, %s7768_s30  ;;  %s7773_s14 = sshll.u32 %s7923_s25, 4  ;;  %s7774_s14 = int_to_ptr.vmem [resolvable:$false] %s7773_s14 }
 0x11b   : > { %s7775_s27 = scalar_lea.vmem %s7774_s14, 256  ;;  %p7776_p4 = scmp.lt.s32.totalorder %s8309_s17, %s7774_s14 }
 0x11c   : > { %p7771_p1 = pnand %p7769_p12, %p7755_p8  ;;  %p7777_p13 = scmp.lt.s32.totalorder %s7775_s27, %s7768_s30 }
 0x11e   : > { %p7772_p10 = pneg %p7771_p1  ;;  %p7778_p0 = por %p7777_p13, %p7776_p4 }
 0x120   : > { %p7779_p2 = pnand %p7778_p0, %p7772_p10 }
 0x122   : > { %7782 = shalt.err (!%p7779_p2)
}
 0x123   : > { %7191 = dma.hbm_to_vmem [thread:$0]  (!%p8313_p11), %s8307_s29, 128, %s8309_s17, %s537_s6  }
 0x124   : > { %s558_s22 = scalar_lea.vmem [#allocation5], %s6441_s28  ;;  %s6785_s1 = sshll.u32 %s7903_s21, 8 }
 0x125   : > { %s565_s3 = sshll.u32 %s558_s22, 4  ;;  %s9197_s14 = sld [smem:[#allocation31_spill]]  ;;  %s8347_s3 = int_to_ptr.vmem [resolvable:$true] %s565_s3 }
 0x126   : > { %s8357_s0 = scalar_lea.sflag [#allocation6], %s554_s2 }
 0x12b   : > { %s8353_s27 = scalar_lea.hbm %s9197_s14, %s6785_s1  ;;  %s7788_s17 = scalar_lea.hbm %s9197_s14, 512 }
 0x12c   : > { %s7783_s5 = scalar_lea.hbm %s8353_s27, 256  ;;  %p7789_p5 = scmp.lt.u32.totalorder %s8353_s27, %s9197_s14 }
 0x12d   : > { %p7784_p4 = scmp.ne.s32.totalorder %s8353_s27, %s7783_s5  ;;  %p7790_p7 = scmp.lt.u32.totalorder %s7788_s17, %s7783_s5 }
 0x12e   : > { %p7792_p12 = scmp.lt.u32.totalorder %s7783_s5, %s8353_s27 }
 0x12f   : > { %p7786_p10 = pnand %p7784_p4, %p7755_p8  ;;  %p7791_p9 = por %p7790_p7, %p7789_p5 }
 0x131   : > { %p7787_p3 = pneg %p7786_p10  ;;  %p7793_p1 = por %p7792_p12, %p7791_p9 }
 0x133   : > { %p7794_p13 = pnand %p7793_p1, %p7787_p3 }
 0x135   : > { %7797 = shalt.err (!%p7794_p13)
}
 0x136   : > { %s7798_s2 = scalar_lea.vmem %s8347_s3, 256  ;;  %s7924_s22 = smov [#allocation5]  }
 0x137   : > { %p7799_p0 = scmp.ne.s32.totalorder %s8347_s3, %s7798_s2  ;;  %s7803_s1 = sshll.u32 %s7924_s22, 4  ;;  %s7804_s1 = int_to_ptr.vmem [resolvable:$false] %s7803_s1 }
 0x138   : > { %s7805_s25 = scalar_lea.vmem %s7804_s1, 512  ;;  %p7806_p10 = scmp.lt.s32.totalorder %s8347_s3, %s7804_s1 }
 0x139   : > { %p7801_p2 = pnand %p7799_p0, %p7755_p8  ;;  %p7807_p5 = scmp.lt.s32.totalorder %s7805_s25, %s7798_s2 }
 0x13b   : > { %p7802_p4 = pneg %p7801_p2  ;;  %p7808_p7 = por %p7807_p5, %p7806_p10 }
 0x13d   : > { %p7809_p9 = pnand %p7808_p7, %p7802_p4 }
 0x13f   : > { %7812 = shalt.err (!%p7809_p9)
}
 0x140   : > { %s9198_s5 = smov 8   ;;  %s9199_s30 = smov 128  }
 0x141   : > { %7194 = dma.hbm_to_vmem [thread:$0]  (!%p8313_p11), %s8353_s27, 256, %s8347_s3, %s8357_s0, %s9199_s30, %s9199_s30, %s9198_s5  }
 0x142   : > { %s9200_s23 = sld [smem:[#allocation29_spill]] }
 0x148   : > { %p9201_p8 = scmp.ne.s32.totalorder %s9200_s23, 0 }
 0x149   : > { %s8389_s29 = sand.u32 (!%p9201_p8), 1, %s7895_s19  }
 0x14a   : > { %577 = sbr.rel (%p9201_p8) target bundleno = 6195 (0x1833), region = 80  ;;  %s6445_s17 = sshll.u32 (!%p9201_p8), %s8389_s29, 3 }
 0x14b   : > { %s580_s28 = scalar_lea.sflag (!%p9201_p8), [#allocation3], %s8389_s29  ;;  %s583_s11 = scalar_lea.vmem (!%p9201_p8), [#allocation2], %s6445_s17 }
 0x151   : > { %7858 = dma.done.wait (%p8285_p6), %s580_s28, 128  }
 0x152   : > { %7860 = vsyncadd (%p8285_p6), %s580_s28, 4294967168  ;;  %s588_s0 = sand.u32 1, %s8035_s24   ;;  %s6446_s3 = sshll.u32 %s8389_s29, 4 }
 0x153   : > { %s589_s27 = scalar_lea.sflag [#allocation6], %s588_s0  ;;  %s592_s6 = scalar_lea.vmem [#allocation5], %s6446_s3 }
 0x154   : > { %7862 = dma.done.wait (%p8285_p6), %s589_s27, 256  }
 0x155   : > { %7864 = vsyncadd (%p8285_p6), %s589_s27, 4294967040  ;;  %p9202_p11 = scmp.eq.s32.totalorder %s8035_s24, 0 }
 0x157   : > { %7866 = dma.done.wait (%p9202_p11), [#allocation6], 128   ;;  %p9203_p3 = pmov %p9202_p11 }
 0x159   : > { %7868 = vsyncadd (%p9203_p3), [#allocation6], 4294967168  ;;  %p9204_p12 = pmov %p9203_p3 }
 0x15a   : > { %p9205_p1 = pmov %p9203_p3 }
 0x15b   : > { %7870 = dma.done.wait (%p9204_p12), [#allocation9], 6144  }
 0x15c   : > { %7872 = vsyncadd (%p9205_p1), [#allocation9], 4294961152  ;;  %p9206_p13 = pmov %p9205_p1 }
 0x15d   : > { %p9207_p0 = pmov %p9205_p1 }
 0x15e   : > { %7874 = dma.done.wait (%p9206_p13), [#allocation12], 2112  }
 0x15f   : > { %7876 = vsyncadd (%p9207_p0), [#allocation12], 4294965184  ;;  %p9208_p6 = pmov %p9207_p0 }
 0x160   : > { %p9209_p2 = pmov %p9207_p0 }
 0x161   : > { %7878 = dma.done.wait (%p9208_p6), [#allocation15], 96  }
 0x162   : > { %7880 = vsyncadd (%p9209_p2), [#allocation15], 4294967200  ;;  %p9210_p4 = pmov %p9207_p0 }
 0x163   : > { %p9211_p10 = pmov %p9207_p0 }
 0x164   : > { %7882 = dma.done.wait (%p9210_p4), [#allocation18], 24576  }
 0x165   : > { %7884 = vsyncadd (%p9211_p10), [#allocation18], 4294942720  ;;  %v682_v0 = vld [vmem:[%s592_s6] sm:$0xff]  ;;  %v683_v1 = vld [vmem:[%s592_s6 + $0x8] sm:$0xff]  ;;  %v7925_v6 = vmov 0.0   ;;  %vm7926_vm0 = vmmov 0  }
 0x166   : > { %v681_v2 = vld [vmem:[%s583_s11] sm:$0xff]  ;;  %710 = vadd.xlane.f32.xlu0 %v682_v0  ;;  %v7279_v4 = vld [vmem:[#allocation8] sm:$0xff]   ;;  %6942 = vmatprep.subr.bf16.mxu0 %v7925_v6  ;;  %v7291_v26 = vld [vmem:[#allocation8 + $0x18] sm:$0xff]   ;;  %v7927_v32 = vmov 0   ;;  %s9212_s22 = sld [smem:[#allocation34_spill]]  ;;  %s7928_s1 = smov 64  }
 0x167   : > { %686 = vadd.xlane.f32.xlu1 %v681_v2  ;;  %v7277_v3 = vld [vmem:[#allocation10 + $0x4] ss:$8 sps:$4 sm:$0xff]   ;;  %v7280_v5 = vld [vmem:[#allocation10] ss:$8 sps:$4 sm:$0xff]   ;;  %v7281_v7 = vld [vmem:[#allocation10 + $0x14] ss:$8 sps:$4 sm:$0xff]   ;;  %6943 = vmatpush3.bf16.msra.mxu0 %v7279_v4 }
 0x168   : > { %965 = vmatprep.subr.bf16.mxu1 %v7277_v3  ;;  %6944 = vmatprep.subr.bf16.mxu0 %v7925_v6  ;;  %v7283_v20 = vld [vmem:[#allocation8 + $0x8] sm:$0xff]   ;;  %v7284_v21 = vld [vmem:[#allocation10 + $0x10] ss:$8 sps:$4 sm:$0xff]   ;;  %v7289_v25 = vld [vmem:[#allocation10 + $0x34] ss:$8 sps:$4 sm:$0xff]   ;;  %s7929_s25 = smov 96  }
 0x169   : > { %966 = vmatpush1.bf16.msra.mxu1 %v7280_v5  ;;  %v7285_v22 = vld [vmem:[#allocation10 + $0x24] ss:$8 sps:$4 sm:$0xff]   ;;  %v7287_v23 = vld [vmem:[#allocation8 + $0x10] sm:$0xff]   ;;  %v7288_v24 = vld [vmem:[#allocation10 + $0x20] ss:$8 sps:$4 sm:$0xff]   ;;  %6958 = vmatprep.mubr.msk.bf16.mxu0 %vm7926_vm0, %v7925_v6  ;;  %s7930_s5 = smov 32  }
 0x16a   : > { %712 = vadd.xlane.f32.xlu0 %v683_v1  ;;  %967 = vmatprep.subr.bf16.mxu1 %v7281_v7  ;;  %v7292_v27 = vld [vmem:[#allocation10 + $0x30] ss:$8 sps:$4 sm:$0xff]   ;;  %v7293_v28 = vld [vmem:[#allocation10 + $0x44] ss:$8 sps:$4 sm:$0xff]   ;;  %v7296_v30 = vld [vmem:[#allocation10 + $0x40] ss:$8 sps:$4 sm:$0xff]  }
 0x16b   : > { %6945 = vmatpush3.bf16.msra.mxu0 %v7283_v20  ;;  %v7295_v29 = vld [vmem:[#allocation8 + $0x20] sm:$0xff]   ;;  %v7297_v31 = vld [vmem:[#allocation10 + $0x54] ss:$8 sps:$4 sm:$0xff]   ;;  %997 = vmatprep.mubr.bf16.mxu1 %v7927_v32  ;;  %v7299_v33 = vld [vmem:[#allocation8 + $0x28] sm:$0xff]   ;;  %vm1723_vm1 = vcmask 261120   ;;  %vm1908_vm2 = vcmask 130048  }
 0x16c   : > { %6946 = vmatprep.subr.bf16.mxu0 %v7925_v6  ;;  %v7300_v34 = vld [vmem:[#allocation10 + $0x50] ss:$8 sps:$4 sm:$0xff]   ;;  %v7301_v35 = vld [vmem:[#allocation10 + $0x64] ss:$8 sps:$4 sm:$0xff]   ;;  %v7304_v37 = vld [vmem:[#allocation10 + $0x60] ss:$8 sps:$4 sm:$0xff]  }
 0x16d   : > { %968 = vmatpush1.bf16.msra.mxu1 %v7284_v21  ;;  %v7303_v36 = vld [vmem:[#allocation8 + $0x30] sm:$0xff]   ;;  %v7307_v39 = vld [vmem:[#allocation8 + $0x38] sm:$0xff]   ;;  %vm2278_vm3 = vcmask 523264   ;;  %vm2280_vm4 = vcmask 785408   ;;  %s9213_s28 = sld [smem:[#allocation37_spill]]  ;;  %s9214_s3 = sld [smem:[#allocation38_spill]] }
 0x16e   : > { %969 = vmatprep.subr.bf16.mxu1 %v7285_v22  ;;  %v7305_v38 = vld [vmem:[#allocation10 + $0x74] ss:$8 sps:$4 sm:$0xff]   ;;  %v7308_v40 = vld [vmem:[#allocation10 + $0x70] ss:$8 sps:$4 sm:$0xff]   ;;  %v6461_v22 = vld [vmem:[%s9212_s22] ss:$0 sm:$0xff] }
 0x16f   : > { %6947 = vmatpush3.bf16.msra.mxu0 %v7287_v23  ;;  %v6459_v52 = vld [vmem:[#allocation7 + $0x2] ss:$0 sm:$0xff]  ;;  %v6619_v53 = vld [vmem:[#allocation7 + $0x6] ss:$0 sm:$0xff]  ;;  %v6457_v56 = vld [vmem:[#allocation7] ss:$0 sm:$0xff] }
 0x170   : > { %6948 = vmatprep.subr.bf16.mxu0 %v7925_v6  ;;  %v6460_v61 = vld [vmem:[#allocation7 + $0x3] ss:$0 sm:$0xff]  ;;  %v6620_v62 = vld [vmem:[#allocation7 + $0x7] ss:$0 sm:$0xff]  ;;  %v6458_v63 = vld [vmem:[#allocation7 + $0x1] ss:$0 sm:$0xff] }
 0x171   : > { %970 = vmatpush1.bf16.msra.mxu1 %v7288_v24  ;;  %s9215_s30 = sld [smem:[#allocation39_spill]]  ;;  %s6782_s23 = sshll.u32 %s8035_s24, 7 }
 0x172   : > { %971 = vmatprep.subr.bf16.mxu1 %v7289_v25  ;;  %s679_s11 = scalar_lea.vmem [#allocation20], %s6445_s17  ;;  %s9216_s0 = sld [smem:[#allocation40_spill]] }
 0x173   : > { %6949 = vmatpush3.bf16.msra.mxu0 %v7291_v26  ;;  %s6235_s6 = scalar_lea.sflag [#allocation4], %s8389_s29  ;;  %p9217_p7 = scmp.ne.s32.totalorder %s9193_s15, 0 }
 0x174   : > { %6950 = vmatprep.subr.bf16.mxu0 %v7925_v6  ;;  %s7933_s24 = smov [#allocation20]  }
 0x175   : > { %972 = vmatpush1.bf16.msra.mxu1 %v7292_v27  ;;  %s7817_s17 = sshll.u32 %s7933_s24, 4  ;;  %s7818_s17 = int_to_ptr.vmem [resolvable:$false] %s7817_s17 }
 0x176   : > { %973 = vmatprep.subr.bf16.mxu1 %v7293_v28  ;;  %s7819_s2 = scalar_lea.vmem %s7818_s17, 256 }
 0x177   : > { %6951 = vmatpush3.bf16.msra.mxu0 %v7295_v29 }
 0x178   : > { %6952 = vmatprep.subr.bf16.mxu0 %v7925_v6  ;;  %s9088_s27 = scalar_lea.hbm %s9216_s0, %s6782_s23 }
 0x179   : > { %974 = vmatpush1.bf16.msra.mxu1 %v7296_v30 }
 0x17a   : > { %975 = vmatprep.subr.bf16.mxu1 %v7297_v31 }
 0x17b   : > { %6953 = vmatpush3.bf16.msra.mxu0 %v7299_v33 }
 0x17c   : > { %6954 = vmatprep.subr.bf16.mxu0 %v7925_v6 }
 0x17d   : > { %976 = vmatpush1.bf16.msra.mxu1 %v7300_v34 }
 0x17e   : > { %977 = vmatprep.subr.bf16.mxu1 %v7301_v35 }
 0x17f   : > { %6955 = vmatpush3.bf16.msra.mxu0 %v7303_v36 }
 0x180   : > { %6956 = vmatprep.subr.bf16.mxu0 %v7925_v6 }
 0x181   : > { %978 = vmatpush1.bf16.msra.mxu1 %v7304_v37  ;;  %v7931_v37 = vmov 1983009808  }
 0x182   : > { %979 = vmatprep.subr.bf16.mxu1 %v7305_v38  ;;  %v1017_v38 = vunpack.c.l.s4 %v7931_v37 }
 0x183   : > { %6957 = vmatpush3.bf16.msra.mxu0 %v7307_v39 }
 0x184   : > { %6986 = vmatprep.subr.bf16.mxu0 %v7925_v6  ;;  %v1018_v39 = vunpack.c.0.s8 %v1017_v38 }
 0x185   : > { %980 = vmatpush1.bf16.msra.mxu1 %v7308_v40  ;;  %v7932_v40 = vmov 1934713408  }
 0x186   : > { %6962 = vmatprep.subr.bf16.mxu1 %v7925_v6 }
 0x1f3   : > { %v711_v8 = vpop.xlane.xlu0 %710 }
 0x1f4   : > { %v687_v9 = vpop.xlane.xlu1 %686  ;;  %v714_v10 = vmul.f32 0.0078125, %v711_v8 }
 0x1f5   : > { %v689_v11 = vmul.f32 0.0078125, %v687_v9 }
 0x1f6   : > { %v8427_v12 = vsub.f32 %v682_v0, %v714_v10 }
 0x1f7   : > { %v8429_v13 = vsub.f32 %v681_v2, %v689_v11  ;;  %v713_v14 = vpop.xlane.xlu0 %712 }
 0x1f8   : > { %v715_v15 = vmul.f32 0.0078125, %v713_v14  ;;  %v718_v16 = vmul.f32 %v8427_v12, %v8427_v12 }
 0x1f9   : > { %v691_v18 = vmul.f32 %v8429_v13, %v8429_v13 }
 0x1fa   : > { %v8433_v17 = vsub.f32 %v683_v1, %v715_v15  ;;  %720 = vadd.xlane.f32.xlu1 %v718_v16  ;;  %v873_v15 = vld [vmem:[#allocation11] sm:$0x3] }
 0x1fc   : > { %v719_v19 = vmul.f32 %v8433_v17, %v8433_v17 }
 0x1fe   : > { %722 = vadd.xlane.f32.xlu0 %v719_v19  ;;  %692 = vadd.xlane.f32.xlu1 %v691_v18 }
 0x287   : > { %v721_v41 = vpop.xlane.xlu1 %720 }
 0x288   : > { %v724_v42 = vmul.f32 0.0078125, %v721_v41  ;;  %v1034_v41 = vunpack.c.l.s4 %v7932_v40 }
 0x28a   : > { %v726_v43 = vadd.f32 1e-05, %v724_v42 }
 0x28b   : > { %v723_v44 = vpop.xlane.xlu0 %722  ;;  %v693_v45 = vpop.xlane.xlu1 %692 }
 0x28c   : > { %7421 = vrsqrt.f32 %v726_v43  ;;  %v725_v46 = vmul.f32 0.0078125, %v723_v44  ;;  %v694_v47 = vmul.f32 0.0078125, %v693_v45  ;;  %v1035_v43 = vunpack.c.0.s8 %v1034_v41 }
 0x28e   : > { %v727_v48 = vadd.f32 1e-05, %v725_v46  ;;  %v695_v49 = vadd.f32 1e-05, %v694_v47  ;;  %v8493_v46 = vpack.i.b16 %v7927_v32, %v7927_v32 }
 0x290   : > { %7423 = vrsqrt.f32 %v727_v48 }
 0x291   : > { %7425 = vrsqrt.f32 %v695_v49 }
 0x296   : > { %v7422_v50 = vpop.eup %7421 }
 0x297   : > { %v730_v51 = vmul.f32 %v7422_v50, %v8427_v12  ;;  %v875_v12 = vlaneseq }
 0x299   : > { %v736_v58 = vmul.f32 %v6459_v52, %v730_v51  ;;  %v3499_v59 = vmul.f32 %v6619_v53, %v730_v51 }
 0x29a   : > { %v7424_v54 = vpop.eup %7423 }
 0x29b   : > { %v7426_v55 = vpop.eup %7425  ;;  %v731_v57 = vmul.f32 %v7424_v54, %v8433_v17  ;;  %v742_v3 = vadd.f32 %v6460_v61, %v736_v58  ;;  %v8453_v5 = vadd.f32 %v6620_v62, %v3499_v59 }
 0x29c   : > { %v697_v60 = vmul.f32 %v7426_v55, %v8429_v13  ;;  %v8467_v13 = vshrl.u32 %v875_v12, 7 }
 0x29d   : > { %v737_v0 = vmul.f32 %v6459_v52, %v731_v57  ;;  %v3500_v1 = vmul.f32 %v6619_v53, %v731_v57 }
 0x29e   : > { %v702_v2 = vmul.f32 %v6457_v56, %v697_v60  ;;  %v8470_v14 = vsub.s32 1, %v8467_v13  ;;  %v8473_v16 = vsub.s32 0, %v8467_v13  ;;  %v8489_v42 = vsub.s32 %v1018_v39, %v8467_v13 }
 0x29f   : > { %v743_v4 = vadd.f32 %v6460_v61, %v737_v0  ;;  %v8455_v7 = vadd.f32 %v6620_v62, %v3500_v1  ;;  %v8496_v53 = vsub.s32 %v1035_v43, %v8467_v13 }
 0x2a0   : > { %v8457_v8 = vadd.f32 %v6458_v63, %v702_v2  ;;  %v882_v17 = vrot.slane %v873_v15, %v8470_v14  ;;  %v878_v18 = vrot.slane %v873_v15, %v8473_v16 }
 0x2a1   : > { %v856_v9 = vpack.c.bf16 %v743_v4, %v742_v3  ;;  %v3621_v10 = vpack.c.bf16 %v8455_v7, %v8453_v5 }
 0x2a2   : > { %v744_v11 = vpack.c.bf16 %v8457_v8, %v8457_v8 }
 0x2a3   : > { %998 = vmatmul.mubr.bf16.vlgmr.msra.gmra.mrb[0].mxu1 %v856_v9 }
 0x2a4   : > { %6959 = vmatmul.mubr.bf16.vlgmr.msra.gmra.mrb[0].mxu0 %v744_v11  ;;  %6964 = vmatprep.mubr.msk.bf16.mxu1 %vm7926_vm0, %v7925_v6 }
 0x2a5   : > { %6988 = vmatprep.mubr.msk.bf16.mxu0 %vm7926_vm0, %v7925_v6 }
 0x376   : > { %v999_v19 = vpop.f32.mrb[0].mxu1 }
 0x377   : > { %v850_v20 = vpop.f32.mrb[0].mxu0  ;;  %v1001_v21 = vpop.f32.mrb[1].mxu1  ;;  %v1000_v26 = vadd.f32 %v999_v19, %v878_v18 }
 0x378   : > { %v6960_v23 = vpop.f32.mrb[1].mxu0  ;;  %v1002_v24 = vadd.f32 %v1001_v21, %v882_v17  ;;  %v1003_v25 = vpop.f32.mrb[2].mxu1  ;;  %v851_v33 = vadd.f32 %v6461_v22, %v850_v20 }
 0x379   : > { %v853_v27 = vpop.f32.mrb[2].mxu0  ;;  %v1004_v28 = vadd.f32 %v1003_v25, %v878_v18  ;;  %v1005_v29 = vpop.f32.mrb[3].mxu1 }
 0x37a   : > { %v6961_v30 = vpop.f32.mrb[3].mxu0  ;;  %v1006_v31 = vadd.f32 %v1005_v29, %v882_v17  ;;  %v1008_v36 = vpack.c.bf16 %v851_v33, %v851_v33 }
 0x37b   : > { %v1177_v34 = vpack.c.bf16 %v1004_v28, %v1000_v26 }
 0x37c   : > { %v8480_v35 = vpack.c.bf16 %v1006_v31, %v1002_v24  ;;  %v1022_v55 = vrot.slane %v1008_v36, %v8489_v42 }
 0x37d   : > { %1181 = vrot.lane.b32.xlu1 %v1177_v34, %s7928_s1  ;;  %1179 = vrot.lane.b32.xlu0 %v1177_v34, %s7929_s25  ;;  %v1189_v48 = vshrl.u32 %v1177_v34, 16 }
 0x381   : > { %1183 = vrot.lane.b32.xlu1 %v1177_v34, %s7930_s5  ;;  %1012 = vrot.lane.b32.xlu0 %v1008_v36, %s7928_s1 }
 0x385   : > { %1010 = vrot.lane.b32.xlu1 %v1008_v36, %s7929_s25 }
 0x389   : > { %1014 = vrot.lane.b32.xlu1 %v1008_v36, %s7930_s5 }
 0x3ef   : > { %v1180_v44 = vpop.permute.xlu0 %1179  ;;  %v1182_v45 = vpop.permute.xlu1 %1181 }
 0x3f0   : > { %v1187_v47 = vpack.i.b16 %v1180_v44, %v1177_v34  ;;  %v1190_v49 = vshrl.u32 %v1180_v44, 16  ;;  %v1197_v57 = vshrl.u32 %v1182_v45, 16 }
 0x3f2   : > { %v1191_v50 = vpack.i.b16 %v1190_v49, %v1189_v48  ;;  %v1207_v54 = vcombine.high %v1187_v47, %v8493_v46  ;;  %v1214_v63 = vrot.slane %v1187_v47, %v8489_v42 }
 0x3f3   : > { %v1013_v51 = vpop.permute.xlu0 %1012  ;;  %v1184_v52 = vpop.permute.xlu1 %1183 }
 0x3f4   : > { %v1030_v56 = vrot.slane %v1013_v51, %v8489_v42  ;;  %v1195_v58 = vpack.i.b16 %v1184_v52, %v1182_v45  ;;  %v1198_v59 = vshrl.u32 %v1184_v52, 16  ;;  %v1273_v60 = vcombine.high %v1191_v50, %v8493_v46 }
 0x3f5   : > { %v1221_v4 = vrot.slane %v1207_v54, %v8489_v42  ;;  %v1280_v19 = vrot.slane %v1191_v50, %v8489_v42 }
 0x3f6   : > { %v1031_v61 = vcombine.low %v1022_v55, %v1030_v56  ;;  %v1032_v62 = vcombine.high %v1022_v55, %v1030_v56  ;;  %v1199_v0 = vpack.i.b16 %v1198_v59, %v1197_v57  ;;  %v1222_v1 = vcombine.high %v1195_v58, %v8493_v46 }
 0x3f7   : > { %v1229_v2 = vrot.slane %v1195_v58, %v8489_v42  ;;  %v1011_v3 = vpop.permute.xlu1 %1010  ;;  %v1287_v20 = vrot.slane %v1273_v60, %v8489_v42 }
 0x3f8   : > { %v8507_v9 = vrot.slane %v1031_v61, %v8496_v53  ;;  %v8510_v11 = vrot.slane %v1032_v62, %v8496_v53  ;;  %v1236_v12 = vrot.slane %v1222_v1, %v8489_v42  ;;  %v1288_v18 = vcombine.high %v1199_v0, %v8493_v46 }
 0x3f9   : > { %v1237_v15 = vcombine.low %v1214_v63, %v1229_v2  ;;  %v1238_v17 = vcombine.high %v1214_v63, %v1229_v2  ;;  %v1056_v21 = vrot.slane %v1011_v3, %v8489_v42  ;;  %v1295_v28 = vrot.slane %v1199_v0, %v8489_v42 }
 0x3fa   : > { %v1253_v24 = vcombine.low %v1221_v4, %v1236_v12  ;;  %v1254_v25 = vcombine.high %v1221_v4, %v1236_v12  ;;  %v8521_v26 = vcombine.high %v8507_v9, %v7927_v32  ;;  %v8525_v27 = vcombine.high %v8510_v11, %v7927_v32 }
 0x3fb   : > { %v1245_v22 = vrot.slane %v1237_v15, %v8496_v53  ;;  %v1252_v23 = vrot.slane %v1238_v17, %v8496_v53  ;;  %v1302_v29 = vrot.slane %v1288_v18, %v8489_v42  ;;  %v1303_v36 = vcombine.low %v1280_v19, %v1295_v28  ;;  %v1015_v40 = vpop.permute.xlu1 %1014 }
 0x3fc   : > { %v1261_v30 = vrot.slane %v1253_v24, %v8496_v53  ;;  %v1268_v31 = vrot.slane %v1254_v25, %v8496_v53  ;;  %v1304_v37 = vcombine.high %v1280_v19, %v1295_v28  ;;  %v1064_v51 = vrot.slane %v1015_v40, %v8489_v42 }
 0x3fd   : > { %v1339_v33 = vcombine.low %v1245_v22, %v1252_v23  ;;  %v6486_v34 = vcombine.high %v1245_v22, %v1252_v23  ;;  %v1319_v38 = vcombine.low %v1287_v20, %v1302_v29  ;;  %v1320_v39 = vcombine.high %v1287_v20, %v1302_v29 }
 0x3fe   : > { %v1355_v44 = vcombine.low %v1261_v30, %v1268_v31  ;;  %v6487_v45 = vcombine.high %v1261_v30, %v1268_v31  ;;  %v1311_v47 = vrot.slane %v1303_v36, %v8496_v53  ;;  %v1318_v48 = vrot.slane %v1304_v37, %v8496_v53 }
 0x3ff   : > { %v1346_v41 = vrot.slane %v1339_v33, %v8489_v42  ;;  %v1354_v43 = vrot.slane %v6486_v34, %v8489_v42  ;;  %v1327_v49 = vrot.slane %v1319_v38, %v8496_v53  ;;  %v1334_v50 = vrot.slane %v1320_v39, %v8496_v53 }
 0x400   : > { %v1362_v52 = vrot.slane %v1355_v44, %v8489_v42  ;;  %v1370_v54 = vrot.slane %v6487_v45, %v8489_v42  ;;  %v1389_v56 = vcombine.low %v1311_v47, %v1318_v48  ;;  %v6488_v57 = vcombine.high %v1311_v47, %v1318_v48 }
 0x401   : > { %v1371_v55 = vcombine.low %v1346_v41, %v1354_v43  ;;  %v1405_v58 = vcombine.low %v1327_v49, %v1334_v50  ;;  %v6489_v59 = vcombine.high %v1327_v49, %v1334_v50  ;;  %v1087_v60 = vshrl.u32 %v8507_v9, 16 }
 0x402   : > { %v1065_v61 = vcombine.low %v1056_v21, %v1064_v51  ;;  %v1066_v62 = vcombine.high %v1056_v21, %v1064_v51  ;;  %v1379_v63 = vcombine.low %v1362_v52, %v1370_v54  ;;  %v1396_v0 = vrot.slane %v1389_v56, %v8489_v42 }
 0x403   : > { %v1404_v1 = vrot.slane %v6488_v57, %v8489_v42  ;;  %v1412_v2 = vrot.slane %v1405_v58, %v8489_v42  ;;  %v1420_v3 = vrot.slane %v6489_v59, %v8489_v42  ;;  %v1095_v4 = vshrl.u32 %v8521_v26, 16 }
 0x404   : > { %v1103_v12 = vshrl.u32 %v8510_v11, 16  ;;  %v1073_v15 = vrot.slane %v1065_v61, %v8496_v53  ;;  %v1080_v17 = vrot.slane %v1066_v62, %v8496_v53  ;;  %v1111_v18 = vshrl.u32 %v8525_v27, 16 }
 0x405   : > { %v1378_v19 = vrot.slane %v1371_v55, %v8496_v53  ;;  %v1421_v20 = vcombine.low %v1396_v0, %v1404_v1  ;;  %v1429_v21 = vcombine.low %v1412_v2, %v1420_v3  ;;  %v1386_v30 = vrot.slane %v1379_v63, %v8496_v53 }
 0x406   : > { %v1081_v22 = vcombine.high %v1073_v15, %v7927_v32  ;;  %v1082_v23 = vcombine.high %v1080_v17, %v7927_v32  ;;  %v1085_v24 = vpack.i.b16 %v1073_v15, %v8507_v9  ;;  %v1088_v25 = vshrl.u32 %v1073_v15, 16 }
 0x407   : > { %v1101_v28 = vpack.i.b16 %v1080_v17, %v8510_v11  ;;  %v1104_v29 = vshrl.u32 %v1080_v17, 16  ;;  %v1428_v31 = vrot.slane %v1421_v20, %v8496_v53  ;;  %v1436_v41 = vrot.slane %v1429_v21, %v8496_v53 }
 0x408   : > { %v1089_v33 = vpack.i.b16 %v1088_v25, %v1087_v60  ;;  %v1093_v34 = vpack.i.b16 %v1081_v22, %v8521_v26  ;;  %v1096_v36 = vshrl.u32 %v1081_v22, 16  ;;  %v1109_v37 = vpack.i.b16 %v1082_v23, %v8525_v27 }
 0x409   : > { %v1105_v38 = vpack.i.b16 %v1104_v29, %v1103_v12  ;;  %v1112_v39 = vshrl.u32 %v1082_v23, 16  ;;  %v1115_v40 = vcombine.low %v1085_v24, %v1101_v28  ;;  %v1387_v45 = vcombine.low %v1378_v19, %v1386_v30 }
 0x40a   : > { %v1097_v9 = vpack.i.b16 %v1096_v36, %v1095_v4  ;;  %v1123_v43 = vcombine.low %v1093_v34, %v1109_v37  ;;  %v1437_v47 = vcombine.low %v1428_v31, %v1436_v41  ;;  %v1438_v63 = vcombine.high %v1428_v31, %v1436_v41 }
 0x40b   : > { %v1113_v44 = vpack.i.b16 %v1112_v39, %v1111_v18  ;;  %v1140_v11 = vcombine.low %v1089_v33, %v1105_v38  ;;  %v1122_v49 = vrot.slane %v1115_v40, %v8489_v42  ;;  %v1442_v57 = vshrl.u32 %v1387_v45, 16 }
 0x40c   : > { %v1130_v48 = vrot.slane %v1123_v43, %v8489_v42  ;;  %v1441_v50 = vpack.i.b16 %v1437_v47, %v1387_v45  ;;  %v1443_v55 = vshrl.u32 %v1437_v47, 16  ;;  %v1388_v1 = vcombine.high %v1378_v19, %v1386_v30 }
 0x40d   : > { %v1148_v26 = vcombine.low %v1097_v9, %v1113_v44  ;;  %v1147_v27 = vrot.slane %v1140_v11, %v8489_v42  ;;  %v1449_v15 = vshrl.u32 %v1438_v63, 16 }
 0x40e   : > { %v1131_v51 = vcombine.low %v1122_v49, %v1130_v48  ;;  %v1728_v54 = vsel %vm1723_vm1, %v1441_v50, 0  ;;  %v1444_v60 = vpack.i.b16 %v1443_v55, %v1442_v57  ;;  %v1447_v3 = vpack.i.b16 %v1438_v63, %v1388_v1 }
 0x40f   : > { %v1155_v52 = vrot.slane %v1148_v26, %v8489_v42  ;;  %6963 = vmatpush3.bf16.xpose.msra.mxu1 %v1728_v54  ;;  %v1448_v18 = vshrl.u32 %v1388_v1, 16 }
 0x410   : > { %6968 = vmatprep.subr.bf16.mxu1 %v7925_v6  ;;  %v1138_v58 = vrot.slane %v1131_v51, %v8496_v53  ;;  %v1774_v62 = vsel %vm1723_vm1, %v1444_v60, 0  ;;  %v1820_v12 = vsel %vm1723_vm1, %v1447_v3, 0 }
 0x411   : > { %v1156_v56 = vcombine.low %v1147_v27, %v1155_v52  ;;  %v1450_v19 = vpack.i.b16 %v1449_v15, %v1448_v18 }
 0x412   : > { %v1168_v2 = vshrl.u32 %v1138_v58, 16  ;;  %v1139_v20 = vcombine.high %v1138_v58, %v7927_v32 }
 0x413   : > { %v1163_v59 = vrot.slane %v1156_v56, %v8496_v53  ;;  %v1866_v22 = vsel %vm1723_vm1, %v1450_v19, 0 }
 0x414   : > { %v1174_v24 = vshrl.u32 %v1139_v20, 16 }
 0x415   : > { %v1167_v61 = vpack.i.b16 %v1163_v59, %v1138_v58  ;;  %v1169_v0 = vshrl.u32 %v1163_v59, 16  ;;  %v1164_v17 = vcombine.high %v1163_v59, %v7927_v32 }
 0x417   : > { %6965 = vmatmul.mubr.msk.bf16.vlgmr.msra.gmra.mrb[4].mxu1 %vm1723_vm1, %v1167_v61  ;;  %v1170_v4 = vpack.i.b16 %v1169_v0, %v1168_v2  ;;  %v1173_v21 = vpack.i.b16 %v1164_v17, %v1139_v20  ;;  %v1175_v23 = vshrl.u32 %v1164_v17, 16  ;;  %v1463_v20 = vshrl.u32 %v8480_v35, 16 }
 0x418   : > { %6969 = vmatpush3.bf16.xpose.msra.mxu1 %v1774_v62  ;;  %6970 = vmatprep.mubr.msk.bf16.mxu1 %vm7926_vm0, %v7925_v6 }
 0x419   : > { %6974 = vmatprep.subr.bf16.mxu1 %v7925_v6  ;;  %v1176_v25 = vpack.i.b16 %v1175_v23, %v1174_v24 }
 0x41f   : > { %6971 = vmatmul.mubr.msk.bf16.vlgmr.msra.gmra.mrb[8].mxu1 %vm1723_vm1, %v1170_v4 }
 0x420   : > { %6975 = vmatpush3.bf16.xpose.msra.mxu1 %v1820_v12  ;;  %6976 = vmatprep.mubr.msk.bf16.mxu1 %vm7926_vm0, %v7925_v6 }
 0x421   : > { %6980 = vmatprep.subr.bf16.mxu1 %v7925_v6 }
 0x427   : > { %6977 = vmatmul.mubr.msk.bf16.vlgmr.msra.gmra.mrb[12].mxu1 %vm1723_vm1, %v1173_v21 }
 0x428   : > { %6981 = vmatpush3.bf16.xpose.msra.mxu1 %v1866_v22  ;;  %6982 = vmatprep.mubr.msk.bf16.mxu1 %vm7926_vm0, %v7925_v6 }
 0x429   : > { %6992 = vmatprep.subr.bf16.mxu1 %v7925_v6 }
 0x42f   : > { %6983 = vmatmul.mubr.msk.bf16.vlgmr.msra.gmra.mrb[16].mxu1 %vm1723_vm1, %v1176_v25 }
 0x430   : > { %6994 = vmatprep.mubr.msk.bf16.mxu1 %vm7926_vm0, %v7925_v6 }
 0x4ea   : > { %v1764_v28 = vpop.f32.mrb[4].mxu1 }
 0x4eb   : > { %v6966_v29 = vpop.f32.mrb[5].mxu1  ;;  %v1909_v30 = vsel %vm1908_vm2, %v1764_v28, -inf }
 0x4ec   : > { %1910 = vmax.xlane.f32.xlu0 %v1909_v30  ;;  %v1767_v31 = vpop.f32.mrb[6].mxu1 }
 0x4ed   : > { %v6967_v33 = vpop.f32.mrb[7].mxu1 }
 0x4f2   : > { %v1810_v34 = vpop.f32.mrb[8].mxu1 }
 0x4f3   : > { %v6972_v36 = vpop.f32.mrb[9].mxu1  ;;  %v1912_v37 = vsel %vm1908_vm2, %v1810_v34, -inf }
 0x4f4   : > { %1913 = vmax.xlane.f32.xlu1 %v1912_v37  ;;  %v1813_v38 = vpop.f32.mrb[10].mxu1 }
 0x4f5   : > { %v6973_v39 = vpop.f32.mrb[11].mxu1 }
 0x4fa   : > { %v1856_v40 = vpop.f32.mrb[12].mxu1 }
 0x4fb   : > { %v6978_v41 = vpop.f32.mrb[13].mxu1  ;;  %v1915_v9 = vsel %vm1908_vm2, %v1856_v40, -inf }
 0x4fc   : > { %1916 = vmax.xlane.f32.xlu0 %v1915_v9  ;;  %v1859_v43 = vpop.f32.mrb[14].mxu1 }
 0x4fd   : > { %v6979_v44 = vpop.f32.mrb[15].mxu1 }
 0x502   : > { %v1902_v11 = vpop.f32.mrb[16].mxu1 }
 0x503   : > { %v6984_v45 = vpop.f32.mrb[17].mxu1  ;;  %v1918_v47 = vsel %vm1908_vm2, %v1902_v11, -inf }
 0x504   : > { %1919 = vmax.xlane.f32.xlu0 %v1918_v47  ;;  %v1905_v48 = vpop.f32.mrb[18].mxu1 }
 0x505   : > { %1455 = vrot.lane.b32.xlu1 %v8480_v35, %s7928_s1  ;;  %v6985_v49 = vpop.f32.mrb[19].mxu1 }
 0x509   : > { %1457 = vrot.lane.b32.xlu1 %v8480_v35, %s7930_s5 }
 0x51a   : > { %1453 = vrot.lane.b32.xlu0 %v8480_v35, %s7929_s25 }
 0x579   : > { %v1911_v26 = vpop.xlane.xlu0 %1910 }
 0x57a   : > { %v1921_v50 = vsub.f32 %v1764_v28, %v1911_v26 }
 0x57c   : > { %v1925_v27 = vmul.f32 1.442695, %v1921_v50 }
 0x57e   : > { %7427 = vpow2.f32 %v1925_v27 }
 0x581   : > { %v1914_v51 = vpop.xlane.xlu1 %1913 }
 0x582   : > { %v1922_v52 = vsub.f32 %v1810_v34, %v1914_v51 }
 0x584   : > { %v1927_v54 = vmul.f32 1.442695, %v1922_v52 }
 0x585   : > { %v1456_v56 = vpop.permute.xlu1 %1455 }
 0x586   : > { %7429 = vpow2.f32 %v1927_v54  ;;  %v1471_v4 = vshrl.u32 %v1456_v56, 16 }
 0x588   : > { %v8598_v55 = vpop.eup %7427 }
 0x589   : > { %v1917_v57 = vpop.xlane.xlu0 %1916  ;;  %v1933_v58 = vsel %vm1908_vm2, %v8598_v55, 0.0  ;;  %v1458_v61 = vpop.permute.xlu1 %1457 }
 0x58a   : > { %v1923_v59 = vsub.f32 %v1856_v40, %v1917_v57  ;;  %1934 = vadd.xlane.f32.xlu1 %v1933_v58  ;;  %v1469_v63 = vpack.i.b16 %v1458_v61, %v1456_v56  ;;  %v1472_v0 = vshrl.u32 %v1458_v61, 16 }
 0x58c   : > { %v1929_v60 = vmul.f32 1.442695, %v1923_v59  ;;  %v1473_v15 = vpack.i.b16 %v1472_v0, %v1471_v4  ;;  %v1490_v17 = vcombine.high %v1469_v63, %v8493_v46  ;;  %v1497_v23 = vrot.slane %v1469_v63, %v8489_v42 }
 0x58e   : > { %7431 = vpow2.f32 %v1929_v60  ;;  %v1504_v29 = vrot.slane %v1490_v17, %v8489_v42  ;;  %v1556_v30 = vcombine.high %v1473_v15, %v8493_v46  ;;  %v1563_v37 = vrot.slane %v1473_v15, %v8489_v42 }
 0x590   : > { %v8602_v62 = vpop.eup %7429  ;;  %v1570_v43 = vrot.slane %v1556_v30, %v8489_v42 }
 0x591   : > { %v1920_v1 = vpop.xlane.xlu0 %1919  ;;  %v1936_v2 = vsel %vm1908_vm2, %v8602_v62, 0.0 }
 0x592   : > { %v1924_v3 = vsub.f32 %v1902_v11, %v1920_v1  ;;  %1937 = vadd.xlane.f32.xlu0 %v1936_v2 }
 0x594   : > { %v1931_v12 = vmul.f32 1.442695, %v1924_v3 }
 0x595   : > { %v1454_v18 = vpop.permute.xlu0 %1453 }
 0x596   : > { %7433 = vpow2.f32 %v1931_v12  ;;  %v1461_v19 = vpack.i.b16 %v1454_v18, %v8480_v35  ;;  %v1464_v21 = vshrl.u32 %v1454_v18, 16 }
 0x598   : > { %v8609_v22 = vpop.eup %7431  ;;  %v1465_v24 = vpack.i.b16 %v1464_v21, %v1463_v20  ;;  %v1475_v25 = vcombine.high %v1461_v19, %v8493_v46  ;;  %v1482_v28 = vrot.slane %v1461_v19, %v8489_v42 }
 0x599   : > { %v1939_v31 = vsel %vm1908_vm2, %v8609_v22, 0.0 }
 0x59a   : > { %v1489_v33 = vrot.slane %v1475_v25, %v8489_v42  ;;  %v1505_v35 = vcombine.low %v1482_v28, %v1497_v23  ;;  %v1506_v34 = vcombine.high %v1482_v28, %v1497_v23  ;;  %v1541_v36 = vcombine.high %v1465_v24, %v8493_v46  ;;  %1940 = vadd.xlane.f32.xlu0 %v1939_v31 }
 0x59b   : > { %v1548_v38 = vrot.slane %v1465_v24, %v8489_v42 }
 0x59c   : > { %v1513_v39 = vrot.slane %v1505_v35, %v8496_v53  ;;  %v1520_v40 = vrot.slane %v1506_v34, %v8496_v53  ;;  %v1521_v41 = vcombine.low %v1489_v33, %v1504_v29  ;;  %v1522_v9 = vcombine.high %v1489_v33, %v1504_v29 }
 0x59d   : > { %v1555_v44 = vrot.slane %v1541_v36, %v8489_v42  ;;  %v1571_v11 = vcombine.low %v1548_v38, %v1563_v37  ;;  %v1572_v45 = vcombine.high %v1548_v38, %v1563_v37 }
 0x59e   : > { %v1529_v47 = vrot.slane %v1521_v41, %v8496_v53  ;;  %v1536_v48 = vrot.slane %v1522_v9, %v8496_v53  ;;  %v1607_v49 = vcombine.low %v1513_v39, %v1520_v40  ;;  %v6490_v26 = vcombine.high %v1513_v39, %v1520_v40 }
 0x59f   : > { %v1579_v50 = vrot.slane %v1571_v11, %v8496_v53  ;;  %v1586_v27 = vrot.slane %v1572_v45, %v8496_v53  ;;  %v1587_v51 = vcombine.low %v1555_v44, %v1570_v43  ;;  %v1588_v52 = vcombine.high %v1555_v44, %v1570_v43 }
 0x5a0   : > { %v8630_v54 = vpop.eup %7433  ;;  %v1614_v56 = vrot.slane %v1607_v49, %v8489_v42  ;;  %v1622_v57 = vrot.slane %v6490_v26, %v8489_v42  ;;  %v1623_v58 = vcombine.low %v1529_v47, %v1536_v48  ;;  %v6491_v59 = vcombine.high %v1529_v47, %v1536_v48 }
 0x5a1   : > { %v1595_v60 = vrot.slane %v1587_v51, %v8496_v53  ;;  %v1602_v61 = vrot.slane %v1588_v52, %v8496_v53  ;;  %v1657_v63 = vcombine.low %v1579_v50, %v1586_v27  ;;  %v6492_v0 = vcombine.high %v1579_v50, %v1586_v27 }
 0x5a2   : > { %v1630_v1 = vrot.slane %v1623_v58, %v8489_v42  ;;  %v1638_v2 = vrot.slane %v6491_v59, %v8489_v42  ;;  %v1942_v3 = vsel %vm1908_vm2, %v8630_v54, 0.0  ;;  %v1639_v4 = vcombine.low %v1614_v56, %v1622_v57  ;;  %v7309_v59 = vld [vmem:[#allocation13] sm:$0xff]  }
 0x5a3   : > { %v1664_v12 = vrot.slane %v1657_v63, %v8489_v42  ;;  %v1672_v15 = vrot.slane %v6492_v0, %v8489_v42  ;;  %v1673_v17 = vcombine.low %v1595_v60, %v1602_v61  ;;  %v6493_v18 = vcombine.high %v1595_v60, %v1602_v61  ;;  %1943 = vadd.xlane.f32.xlu0 %v1942_v3  ;;  %v7310_v60 = vld [vmem:[#allocation13 + $0x8] sm:$0xff]   ;;  %v7312_v61 = vld [vmem:[#allocation13 + $0x18] sm:$0xff]  }
 0x5a4   : > { %v1647_v20 = vcombine.low %v1630_v1, %v1638_v2  ;;  %v1646_v24 = vrot.slane %v1639_v4, %v8496_v53  ;;  %v7314_v63 = vld [vmem:[#allocation13 + $0x28] sm:$0xff]  }
 0x5a5   : > { %v1680_v19 = vrot.slane %v1673_v17, %v8489_v42  ;;  %v1688_v21 = vrot.slane %v6493_v18, %v8489_v42  ;;  %v1689_v23 = vcombine.low %v1664_v12, %v1672_v15 }
 0x5a6   : > { %v1654_v25 = vrot.slane %v1647_v20, %v8496_v53 }
 0x5a7   : > { %v1697_v28 = vcombine.low %v1680_v19, %v1688_v21  ;;  %v1696_v31 = vrot.slane %v1689_v23, %v8496_v53 }
 0x5a8   : > { %v1655_v29 = vcombine.low %v1646_v24, %v1654_v25  ;;  %v1656_v30 = vcombine.high %v1646_v24, %v1654_v25 }
 0x5a9   : > { %v1704_v33 = vrot.slane %v1697_v28, %v8496_v53 }
 0x5aa   : > { %v1711_v36 = vshrl.u32 %v1655_v29, 16  ;;  %v1719_v37 = vshrl.u32 %v1656_v30, 16 }
 0x5ab   : > { %v1705_v35 = vcombine.low %v1696_v31, %v1704_v33  ;;  %v1706_v34 = vcombine.high %v1696_v31, %v1704_v33 }
 0x5ad   : > { %v1709_v38 = vpack.i.b16 %v1705_v35, %v1655_v29  ;;  %v1712_v39 = vshrl.u32 %v1705_v35, 16  ;;  %v1717_v40 = vpack.i.b16 %v1706_v34, %v1656_v30  ;;  %v1720_v41 = vshrl.u32 %v1706_v34, 16 }
 0x5af   : > { %6987 = vmatpush3.bf16.msra.mxu0 %v1709_v38  ;;  %v1713_v9 = vpack.i.b16 %v1712_v39, %v1711_v36  ;;  %v1721_v43 = vpack.i.b16 %v1720_v41, %v1719_v37 }
 0x5b0   : > { %6998 = vmatprep.subr.bf16.mxu0 %v7925_v6 }
 0x5b1   : > { %6993 = vmatpush3.bf16.msra.mxu1 %v1713_v9  ;;  %v7315_v9 = vld [vmem:[#allocation13 + $0x30] sm:$0xff]  }
 0x5b2   : > { %7004 = vmatprep.subr.bf16.mxu1 %v7925_v6 }
 0x617   : > { %v1935_v44 = vpop.xlane.xlu1 %1934 }
 0x618   : > { %7435 = vrcp.f32 %v1935_v44 }
 0x61f   : > { %v1938_v11 = vpop.xlane.xlu0 %1937 }
 0x620   : > { %7437 = vrcp.f32 %v1938_v11 }
 0x622   : > { %v7436_v45 = vpop.eup %7435 }
 0x623   : > { %v1949_v47 = vmul.f32 %v7436_v45, %v8598_v55 }
 0x625   : > { %v1953_v48 = vpack.c.bf16 %v1949_v47, %v1949_v47 }
 0x627   : > { %6989 = vmatmul.mubr.msk.bf16.vlgmr.msra.gmra.mrb[4].mxu0 %vm1908_vm2, %v1953_v48  ;;  %v1941_v49 = vpop.xlane.xlu0 %1940 }
 0x628   : > { %6999 = vmatpush3.bf16.msra.mxu0 %v1717_v40  ;;  %7439 = vrcp.f32 %v1941_v49  ;;  %7000 = vmatprep.mubr.msk.bf16.mxu0 %vm7926_vm0, %v7925_v6 }
 0x629   : > { %7010 = vmatprep.subr.bf16.mxu0 %v7925_v6 }
 0x62a   : > { %v7438_v26 = vpop.eup %7437 }
 0x62b   : > { %v1950_v50 = vmul.f32 %v7438_v26, %v8602_v62 }
 0x62d   : > { %v1954_v27 = vpack.c.bf16 %v1950_v50, %v1950_v50  ;;  %v7316_v50 = vld [vmem:[#allocation13 + $0x38] sm:$0xff]  }
 0x62f   : > { %6995 = vmatmul.mubr.msk.bf16.vlgmr.msra.gmra.mrb[20].mxu1 %vm1908_vm2, %v1954_v27 }
 0x630   : > { %7005 = vmatpush3.bf16.msra.mxu1 %v1721_v43  ;;  %v1944_v51 = vpop.xlane.xlu0 %1943  ;;  %7006 = vmatprep.mubr.msk.bf16.mxu1 %vm7926_vm0, %v7925_v6 }
 0x631   : > { %7441 = vrcp.f32 %v1944_v51 }
 0x632   : > { %v7440_v55 = vpop.eup %7439 }
 0x633   : > { %v1951_v52 = vmul.f32 %v7440_v55, %v8609_v22  ;;  %v7311_v22 = vld [vmem:[#allocation13 + $0x10] sm:$0xff]  }
 0x635   : > { %v1955_v56 = vpack.c.bf16 %v1951_v52, %v1951_v52 }
 0x637   : > { %7001 = vmatmul.mubr.msk.bf16.vlgmr.msra.gmra.mrb[8].mxu0 %vm1908_vm2, %v1955_v56 }
 0x638   : > { %7026 = vmatprep.mubr.msk.bf16.mxu0 %vm7926_vm0, %v7925_v6  ;;  %7011 = vmatpush3.bf16.msra.mxu0 %v7309_v59 }
 0x639   : > { %7012 = vmatprep.subr.bf16.mxu0 %v7925_v6 }
 0x63b   : > { %v7442_v57 = vpop.eup %7441 }
 0x63c   : > { %v1952_v62 = vmul.f32 %v7442_v57, %v8630_v54  ;;  %7013 = vmatpush3.bf16.msra.mxu0 %v7310_v60  ;;  %v7313_v54 = vld [vmem:[#allocation13 + $0x20] sm:$0xff]  }
 0x63d   : > { %7014 = vmatprep.subr.bf16.mxu0 %v7925_v6 }
 0x63e   : > { %v1956_v58 = vpack.c.bf16 %v1952_v62, %v1952_v62 }
 0x640   : > { %7007 = vmatmul.mubr.msk.bf16.vlgmr.msra.gmra.mrb[24].mxu1 %vm1908_vm2, %v1956_v58  ;;  %7015 = vmatpush3.bf16.msra.mxu0 %v7311_v22 }
 0x641   : > { %2877 = vmatprep.mubr.bf16.mxu1 %v7927_v32  ;;  %7016 = vmatprep.subr.bf16.mxu0 %v7925_v6 }
 0x644   : > { %7017 = vmatpush3.bf16.msra.mxu0 %v7312_v61 }
 0x645   : > { %7018 = vmatprep.subr.bf16.mxu0 %v7925_v6 }
 0x648   : > { %7019 = vmatpush3.bf16.msra.mxu0 %v7313_v54 }
 0x649   : > { %7020 = vmatprep.subr.bf16.mxu0 %v7925_v6 }
 0x64c   : > { %7021 = vmatpush3.bf16.msra.mxu0 %v7314_v63 }
 0x64d   : > { %7022 = vmatprep.subr.bf16.mxu0 %v7925_v6 }
 0x650   : > { %7023 = vmatpush3.bf16.msra.mxu0 %v7315_v9  ;;  %v2432_v9 = vld [vmem:[#allocation17 + $0x68] sm:$0xff] }
 0x651   : > { %7024 = vmatprep.subr.bf16.mxu0 %v7925_v6 }
 0x654   : > { %7025 = vmatpush3.bf16.msra.mxu0 %v7316_v50 }
 0x6fa   : > { %v1994_v0 = vpop.f32.mrb[4].mxu0 }
 0x6fb   : > { %v6990_v1 = vpop.f32.mrb[5].mxu0 }
 0x6fc   : > { %v1997_v2 = vpop.f32.mrb[6].mxu0 }
 0x6fd   : > { %v6991_v3 = vpop.f32.mrb[7].mxu0 }
 0x702   : > { %v2037_v4 = vpop.f32.mrb[20].mxu1 }
 0x703   : > { %v6996_v12 = vpop.f32.mrb[21].mxu1 }
 0x704   : > { %v2040_v15 = vpop.f32.mrb[22].mxu1 }
 0x705   : > { %v6997_v17 = vpop.f32.mrb[23].mxu1 }
 0x70a   : > { %v2080_v18 = vpop.f32.mrb[8].mxu0 }
 0x70b   : > { %v2129_v20 = vcombine.low %v1994_v0, %v2080_v18  ;;  %v2130_v19 = vcombine.high %v1994_v0, %v2080_v18  ;;  %v7002_v21 = vpop.f32.mrb[9].mxu0 }
 0x70c   : > { %v2083_v23 = vpop.f32.mrb[10].mxu0 }
 0x70d   : > { %v7003_v24 = vpop.f32.mrb[11].mxu0  ;;  %v2137_v33 = vrot.slane %v2129_v20, %v8489_v42  ;;  %v2144_v35 = vrot.slane %v2130_v19, %v8489_v42  ;;  %v6504_v20 = vld [vmem:[#allocation14] ss:$0 sm:$0xff] }
 0x713   : > { %v2123_v25 = vpop.f32.mrb[24].mxu1 }
 0x714   : > { %v2145_v28 = vcombine.low %v2037_v4, %v2123_v25  ;;  %v2146_v29 = vcombine.high %v2037_v4, %v2123_v25  ;;  %v7008_v30 = vpop.f32.mrb[25].mxu1 }
 0x715   : > { %v2126_v31 = vpop.f32.mrb[26].mxu1  ;;  %v2423_v30 = vld [vmem:[#allocation17 + $0x20] sm:$0xff] }
 0x716   : > { %v2153_v34 = vrot.slane %v2145_v28, %v8489_v42  ;;  %v2160_v36 = vrot.slane %v2146_v29, %v8489_v42  ;;  %v7009_v37 = vpop.f32.mrb[27].mxu1  ;;  %v2419_v29 = vld [vmem:[#allocation17] sm:$0xff]  ;;  %v2420_v31 = vld [vmem:[#allocation17 + $0x8] sm:$0xff] }
 0x717   : > { %v2431_v37 = vld [vmem:[#allocation17 + $0x60] sm:$0xff] }
 0x718   : > { %v2161_v38 = vcombine.low %v2137_v33, %v2153_v34  ;;  %v2162_v39 = vcombine.high %v2137_v33, %v2153_v34  ;;  %v2177_v40 = vcombine.low %v2144_v35, %v2160_v36  ;;  %v2178_v41 = vcombine.high %v2144_v35, %v2160_v36  ;;  %v2424_v34 = vld [vmem:[#allocation17 + $0x28] sm:$0xff]  ;;  %v2427_v36 = vld [vmem:[#allocation17 + $0x40] sm:$0xff] }
 0x719   : > { %v6515_v33 = vcombine.low %v2419_v29, %v2423_v30  ;;  %v6516_v35 = vcombine.high %v2419_v29, %v2423_v30  ;;  %v2468_v29 = vld [vmem:[#allocation17 + $0x188] sm:$0xff] }
 0x71a   : > { %v2169_v43 = vrot.slane %v2161_v38, %v8496_v53  ;;  %v2176_v44 = vrot.slane %v2162_v39, %v8496_v53  ;;  %v2185_v11 = vrot.slane %v2177_v40, %v8496_v53  ;;  %v2192_v45 = vrot.slane %v2178_v41, %v8496_v53  ;;  %v2428_v41 = vld [vmem:[#allocation17 + $0x48] sm:$0xff] }
 0x71b   : > { %v6517_v38 = vcombine.low %v2420_v31, %v2424_v34  ;;  %v6518_v39 = vcombine.high %v2420_v31, %v2424_v34  ;;  %v6524_v40 = vcombine.high %v2427_v36, %v2431_v37  ;;  %2845 = vmatprep.subr.bf16.mxu1 %v6516_v35  ;;  %v2472_v30 = vld [vmem:[#allocation17 + $0x1a8] sm:$0xff]  ;;  %v2475_v34 = vld [vmem:[#allocation17 + $0x1c0] sm:$0xff] }
 0x71c   : > { %v2197_v47 = vcombine.low %v2169_v43, %v2176_v44  ;;  %v6502_v48 = vcombine.high %v2169_v43, %v2176_v44  ;;  %v2213_v49 = vcombine.low %v2185_v11, %v2192_v45  ;;  %v6503_v26 = vcombine.high %v2185_v11, %v2192_v45  ;;  %v2435_v43 = vld [vmem:[#allocation17 + $0x80] sm:$0xff]  ;;  %v2436_v11 = vld [vmem:[#allocation17 + $0x88] sm:$0xff]  ;;  %2846 = vmatpush1.bf16.msra.mxu1 %v6515_v33 }
 0x71d   : > { %v2439_v44 = vld [vmem:[#allocation17 + $0xa0] sm:$0xff]  ;;  %v2440_v45 = vld [vmem:[#allocation17 + $0xa8] sm:$0xff]  ;;  %2886 = vmatprep.subr.bf16.mxu0 %v6518_v39  ;;  %2847 = vmatprep.subr.bf16.mxu1 %v6524_v40 }
 0x71e   : > { %v2204_v27 = vrot.slane %v2197_v47, %v8489_v42  ;;  %v2212_v51 = vrot.slane %v6502_v48, %v8489_v42  ;;  %v2220_v55 = vrot.slane %v2213_v49, %v8489_v42  ;;  %v2228_v52 = vrot.slane %v6503_v26, %v8489_v42  ;;  %v2479_v39 = vld [vmem:[#allocation17 + $0x1e0] sm:$0xff] }
 0x71f   : > { %v6523_v47 = vcombine.low %v2427_v36, %v2431_v37  ;;  %v6525_v48 = vcombine.low %v2428_v41, %v2432_v9  ;;  %v6532_v49 = vcombine.high %v2435_v43, %v2439_v44  ;;  %v6534_v26 = vcombine.high %v2436_v11, %v2440_v45  ;;  %v2421_v36 = vld [vmem:[#allocation17 + $0x10] sm:$0xff] }
 0x720   : > { %v2230_v56 = vcombine.high %v2204_v27, %v2212_v51  ;;  %v2246_v57 = vcombine.high %v2220_v55, %v2228_v52  ;;  %v2229_v62 = vcombine.low %v2204_v27, %v2212_v51  ;;  %v2245_v58 = vcombine.low %v2220_v55, %v2228_v52  ;;  %v2425_v37 = vld [vmem:[#allocation17 + $0x30] sm:$0xff] }
 0x721   : > { %2848 = vmatpush1.bf16.msra.mxu1 %v6523_v47  ;;  %v6531_v50 = vcombine.low %v2435_v43, %v2439_v44  ;;  %v6533_v27 = vcombine.low %v2436_v11, %v2440_v45  ;;  %v6519_v40 = vcombine.low %v2421_v36, %v2425_v37  ;;  %v2476_v43 = vld [vmem:[#allocation17 + $0x1c8] sm:$0xff]  ;;  %v6565_v45 = vcombine.low %v2468_v29, %v2472_v30 }
 0x722   : > { %v2244_v59 = vrot.slane %v2230_v56, %v8496_v53  ;;  %v2260_v60 = vrot.slane %v2246_v57, %v8496_v53  ;;  %v2237_v22 = vrot.slane %v2229_v62, %v8496_v53  ;;  %v2253_v61 = vrot.slane %v2245_v58, %v8496_v53  ;;  %2849 = vmatprep.subr.bf16.mxu1 %v6532_v49  ;;  %v2443_v57 = vld [vmem:[#allocation17 + $0xc0] sm:$0xff]  ;;  %v2444_v58 = vld [vmem:[#allocation17 + $0xc8] sm:$0xff] }
 0x723   : > { %v2447_v62 = vld [vmem:[#allocation17 + $0xe0] sm:$0xff]  ;;  %v6572_v47 = vcombine.high %v2475_v34, %v2479_v39  ;;  %v6571_v49 = vcombine.low %v2475_v34, %v2479_v39  ;;  %v2457_v34 = vld [vmem:[#allocation17 + $0x130] sm:$0xff] }
 0x724   : > { %v2263_v54 = vcombine.low %v2244_v59, %v2260_v60  ;;  %v2262_v63 = vcombine.high %v2237_v22, %v2253_v61  ;;  %v2264_v0 = vcombine.high %v2244_v59, %v2260_v60  ;;  %v2261_v1 = vcombine.low %v2237_v22, %v2253_v61  ;;  %v2448_v60 = vld [vmem:[#allocation17 + $0xe8] sm:$0xff] }
 0x725   : > { %2850 = vmatpush1.bf16.msra.mxu1 %v6531_v50  ;;  %v6540_v59 = vcombine.high %v2443_v57, %v2447_v62  ;;  %v6539_v22 = vcombine.low %v2443_v57, %v2447_v62  ;;  %v6541_v61 = vcombine.low %v2444_v58, %v2448_v60  ;;  %v6520_v50 = vcombine.high %v2421_v36, %v2425_v37  ;;  %v6513_v62 = vld [vmem:[#allocation16] ss:$0 sm:$0xff] }
 0x726   : > { %2270 = vrot.lane.b32.xlu0 %v2263_v54, %s7928_s1  ;;  %2266 = vrot.lane.b32.xlu1 %v2262_v63, %s7930_s5  ;;  %v6542_v54 = vcombine.high %v2444_v58, %v2448_v60  ;;  %v2451_v63 = vld [vmem:[#allocation17 + $0x100] sm:$0xff]  ;;  %v2454_v36 = vld [vmem:[#allocation17 + $0x118] sm:$0xff] }
 0x727   : > { %2851 = vmatprep.subr.bf16.mxu1 %v6540_v59  ;;  %v6514_v59 = vld [vmem:[#allocation16 + $0x1] ss:$0 sm:$0xff] }
 0x728   : > { %v2458_v37 = vld [vmem:[#allocation17 + $0x138] sm:$0xff] }
 0x729   : > { %2852 = vmatpush1.bf16.msra.mxu1 %v6539_v22  ;;  %v2429_v22 = vld [vmem:[#allocation17 + $0x50] sm:$0xff] }
 0x72a   : > { %2274 = vrot.lane.b32.xlu1 %v2264_v0, %s7929_s25  ;;  %v2455_v0 = vld [vmem:[#allocation17 + $0x120] sm:$0xff] }
 0x798   : > { %v2267_v2 = vpop.permute.xlu1 %2266  ;;  %v2271_v3 = vpop.permute.xlu0 %2270 }
 0x799   : > { %v2277_v4 = vsel %vm1723_vm1, %v2261_v1, %v2267_v2  ;;  %v2452_v1 = vld [vmem:[#allocation17 + $0x108] sm:$0xff]  ;;  %v6547_v2 = vcombine.low %v2451_v63, %v2455_v0 }
 0x79a   : > { %v2279_v15 = vsel %vm2278_vm3, %v2277_v4, %v2271_v3  ;;  %v6548_v3 = vcombine.high %v2451_v63, %v2455_v0  ;;  %v2456_v4 = vld [vmem:[#allocation17 + $0x128] sm:$0xff]  ;;  %v2434_v63 = vld [vmem:[#allocation17 + $0x78] sm:$0xff] }
 0x79c   : > { %v2275_v12 = vpop.permute.xlu1 %2274  ;;  %2853 = vmatprep.subr.bf16.mxu1 %v6548_v3 }
 0x79d   : > { %v2281_v17 = vsel %vm2280_vm4, %v2279_v15, %v2275_v12  ;;  %v2459_v12 = vld [vmem:[#allocation17 + $0x140] sm:$0xff]  ;;  %2854 = vmatpush1.bf16.msra.mxu1 %v6547_v2 }
 0x79e   : > { %v2282_v18 = vpack.c.bf16 %v2281_v17, %v2281_v17  ;;  %v2463_v15 = vld [vmem:[#allocation17 + $0x160] sm:$0xff]  ;;  %v6549_v17 = vcombine.low %v2452_v1, %v2456_v4 }
 0x79f   : > { %v6555_v31 = vcombine.low %v2459_v12, %v2463_v15 }
 0x7a0   : > { %7027 = vmatmul.mubr.bf16.vlgmr.msra.gmra.mrb[12].mxu0 %v2282_v18  ;;  %v6550_v18 = vcombine.high %v2452_v1, %v2456_v4  ;;  %v2437_v4 = vld [vmem:[#allocation17 + $0x90] sm:$0xff] }
 0x7a1   : > { %2918 = vmatprep.mubr.bf16.mxu0 %v7927_v32  ;;  %2887 = vmatpush1.bf16.msra.mxu0 %v6517_v38  ;;  %v6566_v38 = vcombine.high %v2468_v29, %v2472_v30 }
 0x873   : > { %v2388_v19 = vpop.f32.mrb[12].mxu0 }
 0x874   : > { %v2389_v21 = vadd.f32 %v6504_v20, %v2388_v19  ;;  %v7028_v23 = vpop.f32.mrb[13].mxu0  ;;  %v6556_v20 = vcombine.high %v2459_v12, %v2463_v15  ;;  %v2460_v19 = vld [vmem:[#allocation17 + $0x148] sm:$0xff]  ;;  %v2441_v12 = vld [vmem:[#allocation17 + $0xb0] sm:$0xff]  ;;  %v2438_v15 = vld [vmem:[#allocation17 + $0x98] sm:$0xff] }
 0x875   : > { %v2391_v24 = vpop.f32.mrb[14].mxu0  ;;  %v2467_v23 = vld [vmem:[#allocation17 + $0x180] sm:$0xff]  ;;  %v6535_v29 = vcombine.low %v2437_v4, %v2441_v12 }
 0x876   : > { %v8697_v25 = vadd.f32 %v2389_v21, %v8457_v8  ;;  %v7029_v28 = vpop.f32.mrb[15].mxu0  ;;  %v6526_v8 = vcombine.high %v2428_v41, %v2432_v9  ;;  %v2464_v21 = vld [vmem:[#allocation17 + $0x168] sm:$0xff]  ;;  %2855 = vmatprep.subr.bf16.mxu1 %v6556_v20  ;;  %v2422_v41 = vld [vmem:[#allocation17 + $0x18] sm:$0xff]  ;;  %v6536_v20 = vcombine.high %v2437_v4, %v2441_v12  ;;  %v8721_v12 = vsub.s32 3, %v8467_v13 }
 0x877   : > { %v6558_v24 = vcombine.high %v2460_v19, %v2464_v21  ;;  %v2471_v28 = vld [vmem:[#allocation17 + $0x1a0] sm:$0xff]  ;;  %v6557_v33 = vcombine.low %v2460_v19, %v2464_v21  ;;  %v2426_v9 = vld [vmem:[#allocation17 + $0x38] sm:$0xff]  ;;  %2856 = vmatpush1.bf16.msra.mxu1 %v6555_v31  ;;  %v2445_v21 = vld [vmem:[#allocation17 + $0xd0] sm:$0xff] }
 0x878   : > { %2397 = vadd.xlane.f32.xlu1 %v8697_v25  ;;  %2888 = vmatprep.subr.bf16.mxu0 %v6526_v8  ;;  %v6564_v35 = vcombine.high %v2467_v23, %v2471_v28  ;;  %v2480_v8 = vld [vmem:[#allocation17 + $0x1e8] sm:$0xff]  ;;  %v6521_v44 = vcombine.low %v2422_v41, %v2426_v9  ;;  %v6563_v11 = vcombine.low %v2467_v23, %v2471_v28  ;;  %v2449_v23 = vld [vmem:[#allocation17 + $0xf0] sm:$0xff]  ;;  %v2450_v28 = vld [vmem:[#allocation17 + $0xf8] sm:$0xff] }
 0x879   : > { %2889 = vmatpush1.bf16.msra.mxu0 %v6525_v48  ;;  %v6574_v48 = vcombine.high %v2476_v43, %v2480_v8  ;;  %v6544_v31 = vcombine.high %v2445_v21, %v2449_v23  ;;  %v2483_v4 = vld [vmem:[%s9213_s28] sm:$0xff] }
 0x87a   : > { %2890 = vmatprep.subr.bf16.mxu0 %v6534_v26  ;;  %2857 = vmatprep.subr.bf16.mxu1 %v6564_v35  ;;  %v6573_v26 = vcombine.low %v2476_v43, %v2480_v8  ;;  %v2453_v35 = vld [vmem:[#allocation17 + $0x110] sm:$0xff]  ;;  %v2462_v8 = vld [vmem:[#allocation17 + $0x158] sm:$0xff] }
 0x87b   : > { %2858 = vmatpush1.bf16.msra.mxu1 %v6563_v11  ;;  %v2465_v43 = vld [vmem:[#allocation17 + $0x170] sm:$0xff]  ;;  %v6551_v11 = vcombine.low %v2453_v35, %v2457_v34 }
 0x87c   : > { %2859 = vmatprep.subr.bf16.mxu1 %v6572_v47 }
 0x87d   : > { %2891 = vmatpush1.bf16.msra.mxu0 %v6533_v27  ;;  %v6522_v27 = vcombine.high %v2422_v41, %v2426_v9  ;;  %v6554_v41 = vcombine.high %v2454_v36, %v2458_v37  ;;  %v2461_v9 = vld [vmem:[#allocation17 + $0x150] sm:$0xff] }
 0x87e   : > { %2892 = vmatprep.subr.bf16.mxu0 %v6542_v54  ;;  %v2430_v54 = vld [vmem:[#allocation17 + $0x58] sm:$0xff]  ;;  %v6560_v47 = vcombine.high %v2461_v9, %v2465_v43 }
 0x87f   : > { %2860 = vmatpush1.bf16.msra.mxu1 %v6571_v49  ;;  %v6530_v3 = vcombine.high %v2430_v54, %v2434_v63  ;;  %v2469_v49 = vld [vmem:[#allocation17 + $0x190] sm:$0xff] }
 0x880   : > { %2927 = vmatprep.subr.bf16.mxu1 %v6520_v50  ;;  %v2470_v50 = vld [vmem:[#allocation17 + $0x198] sm:$0xff] }
 0x881   : > { %2893 = vmatpush1.bf16.msra.mxu0 %v6541_v61  ;;  %v2433_v61 = vld [vmem:[#allocation17 + $0x70] sm:$0xff] }
 0x882   : > { %2894 = vmatprep.subr.bf16.mxu0 %v6550_v18  ;;  %v6528_v2 = vcombine.high %v2429_v22, %v2433_v61  ;;  %v6529_v18 = vcombine.low %v2430_v54, %v2434_v63 }
 0x885   : > { %2895 = vmatpush1.bf16.msra.mxu0 %v6549_v17  ;;  %v2442_v17 = vld [vmem:[#allocation17 + $0xb8] sm:$0xff] }
 0x886   : > { %2896 = vmatprep.subr.bf16.mxu0 %v6558_v24  ;;  %v6538_v19 = vcombine.high %v2438_v15, %v2442_v17  ;;  %v2446_v24 = vld [vmem:[#allocation17 + $0xd8] sm:$0xff]  ;;  %v6537_v30 = vcombine.low %v2438_v15, %v2442_v17  ;;  %v2488_v15 = vrot.slane %v2483_v4, %v8473_v16 }
 0x887   : > { %v6545_v39 = vcombine.low %v2446_v24, %v2450_v28 }
 0x889   : > { %2897 = vmatpush1.bf16.msra.mxu0 %v6557_v33  ;;  %v6546_v33 = vcombine.high %v2446_v24, %v2450_v28 }
 0x88a   : > { %2898 = vmatprep.subr.bf16.mxu0 %v6566_v38  ;;  %v6543_v38 = vcombine.low %v2445_v21, %v2449_v23 }
 0x88d   : > { %2899 = vmatpush1.bf16.msra.mxu0 %v6565_v45  ;;  %v6553_v45 = vcombine.low %v2454_v36, %v2458_v37 }
 0x88e   : > { %2900 = vmatprep.subr.bf16.mxu0 %v6574_v48 }
 0x891   : > { %2901 = vmatpush1.bf16.msra.mxu0 %v6573_v26  ;;  %v2473_v26 = vld [vmem:[#allocation17 + $0x1b0] sm:$0xff] }
 0x892   : > { %2968 = vmatprep.subr.bf16.mxu0 %v6522_v27  ;;  %v2474_v27 = vld [vmem:[#allocation17 + $0x1b8] sm:$0xff] }
 0x905   : > { %v2398_v51 = vpop.xlane.xlu1 %2397 }
 0x906   : > { %v2399_v55 = vmul.f32 0.0078125, %v2398_v51 }
 0x908   : > { %v8701_v52 = vsub.f32 %v8697_v25, %v2399_v55 }
 0x90a   : > { %v2401_v56 = vmul.f32 %v8701_v52, %v8701_v52 }
 0x90c   : > { %2402 = vadd.xlane.f32.xlu0 %v2401_v56 }
 0x999   : > { %v2403_v51 = vpop.xlane.xlu0 %2402 }
 0x99a   : > { %v2404_v55 = vmul.f32 0.0078125, %v2403_v51  ;;  %v6559_v51 = vcombine.low %v2461_v9, %v2465_v43 }
 0x99c   : > { %v2405_v56 = vadd.f32 1e-05, %v2404_v55 }
 0x99e   : > { %7443 = vrsqrt.f32 %v2405_v56  ;;  %v6568_v56 = vcombine.high %v2469_v49, %v2473_v26 }
 0x9a8   : > { %v7444_v57 = vpop.eup %7443 }
 0x9a9   : > { %v2407_v58 = vmul.f32 %v7444_v57, %v8701_v52  ;;  %v6527_v52 = vcombine.low %v2429_v22, %v2433_v61  ;;  %v6570_v57 = vcombine.high %v2470_v50, %v2474_v27  ;;  %v6567_v22 = vcombine.low %v2469_v49, %v2473_v26 }
 0x9aa   : > { %v6569_v61 = vcombine.low %v2470_v50, %v2474_v27  ;;  %v2515_v49 = vsub.s32 7, %v8467_v13 }
 0x9ab   : > { %v2412_v60 = vmul.f32 %v6513_v62, %v2407_v58  ;;  %v2477_v62 = vld [vmem:[#allocation17 + $0x1d0] sm:$0xff] }
 0x9ac   : > { %v2481_v58 = vld [vmem:[#allocation17 + $0x1f0] sm:$0xff] }
 0x9ad   : > { %v2417_v0 = vadd.f32 %v6514_v59, %v2412_v60  ;;  %v2478_v59 = vld [vmem:[#allocation17 + $0x1d8] sm:$0xff]  ;;  %v6576_v54 = vcombine.high %v2477_v62, %v2481_v58 }
 0x9ae   : > { %v2482_v60 = vld [vmem:[#allocation17 + $0x1f8] sm:$0xff] }
 0x9af   : > { %v8706_v1 = vpack.c.bf16 %v2417_v0, %v2417_v0  ;;  %v6578_v63 = vcombine.high %v2478_v59, %v2482_v60  ;;  %v6575_v0 = vcombine.low %v2477_v62, %v2481_v58 }
 0x9b1   : > { %2878 = vmatmul.mubr.bf16.vlgmr.msra.gmra.mrb[28].mxu1 %v8706_v1  ;;  %2919 = vmatmul.mubr.bf16.vlgmr.msra.gmra.mrb[16].mxu0 %v8706_v1 }
 0x9b2   : > { %2928 = vmatpush1.bf16.msra.mxu1 %v6519_v40  ;;  %2969 = vmatpush1.bf16.msra.mxu0 %v6521_v44  ;;  %v6552_v40 = vcombine.high %v2453_v35, %v2457_v34  ;;  %v2466_v44 = vld [vmem:[#allocation17 + $0x178] sm:$0xff] }
 0x9b3   : > { %2929 = vmatprep.subr.bf16.mxu1 %v6528_v2  ;;  %2970 = vmatprep.subr.bf16.mxu0 %v6530_v3  ;;  %v6562_v48 = vcombine.high %v2462_v8, %v2466_v44  ;;  %v6561_v55 = vcombine.low %v2462_v8, %v2466_v44  ;;  %v6577_v2 = vcombine.low %v2478_v59, %v2482_v60  ;;  %v8715_v3 = vsub.s32 2, %v8467_v13 }
 0x9b4   : > { %2959 = vmatprep.mubr.bf16.mxu1 %v7927_v32  ;;  %3000 = vmatprep.mubr.bf16.mxu0 %v7927_v32 }
 0x9b5   : > { %v2496_v17 = vrot.slane %v2483_v4, %v8715_v3 }
 0x9b6   : > { %2930 = vmatpush1.bf16.msra.mxu1 %v6527_v52  ;;  %2971 = vmatpush1.bf16.msra.mxu0 %v6529_v18  ;;  %v2492_v52 = vrot.slane %v2483_v4, %v8470_v14  ;;  %v2500_v18 = vrot.slane %v2483_v4, %v8721_v12 }
 0x9b7   : > { %2931 = vmatprep.subr.bf16.mxu1 %v6536_v20  ;;  %2972 = vmatprep.subr.bf16.mxu0 %v6538_v19 }
 0x9ba   : > { %2932 = vmatpush1.bf16.msra.mxu1 %v6535_v29  ;;  %2973 = vmatpush1.bf16.msra.mxu0 %v6537_v30 }
 0x9bb   : > { %2933 = vmatprep.subr.bf16.mxu1 %v6544_v31  ;;  %2974 = vmatprep.subr.bf16.mxu0 %v6546_v33 }
 0x9be   : > { %2934 = vmatpush1.bf16.msra.mxu1 %v6543_v38  ;;  %2975 = vmatpush1.bf16.msra.mxu0 %v6545_v39 }
 0x9bf   : > { %2935 = vmatprep.subr.bf16.mxu1 %v6552_v40  ;;  %2976 = vmatprep.subr.bf16.mxu0 %v6554_v41 }
 0x9c2   : > { %2936 = vmatpush1.bf16.msra.mxu1 %v6551_v11  ;;  %2977 = vmatpush1.bf16.msra.mxu0 %v6553_v45  ;;  %v2503_v45 = vsub.s32 4, %v8467_v13 }
 0x9c3   : > { %2937 = vmatprep.subr.bf16.mxu1 %v6560_v47  ;;  %2978 = vmatprep.subr.bf16.mxu0 %v6562_v48  ;;  %v2511_v47 = vsub.s32 6, %v8467_v13  ;;  %v2507_v48 = vsub.s32 5, %v8467_v13 }
 0x9c4   : > { %v2504_v27 = vrot.slane %v2483_v4, %v2503_v45 }
 0x9c6   : > { %2938 = vmatpush1.bf16.msra.mxu1 %v6559_v51  ;;  %2979 = vmatpush1.bf16.msra.mxu0 %v6561_v55  ;;  %v2512_v51 = vrot.slane %v2483_v4, %v2511_v47 }
 0x9c7   : > { %2939 = vmatprep.subr.bf16.mxu1 %v6568_v56  ;;  %2980 = vmatprep.subr.bf16.mxu0 %v6570_v57  ;;  %v2508_v56 = vrot.slane %v2483_v4, %v2507_v48  ;;  %v2516_v57 = vrot.slane %v2483_v4, %v2515_v49 }
 0x9ca   : > { %2940 = vmatpush1.bf16.msra.mxu1 %v6567_v22  ;;  %2981 = vmatpush1.bf16.msra.mxu0 %v6569_v61 }
 0x9cb   : > { %2941 = vmatprep.subr.bf16.mxu1 %v6576_v54  ;;  %2982 = vmatprep.subr.bf16.mxu0 %v6578_v63 }
 0x9ce   : > { %2942 = vmatpush1.bf16.msra.mxu1 %v6575_v0  ;;  %2983 = vmatpush1.bf16.msra.mxu0 %v6577_v2 }
 0x9d1   : > { %2960 = vmatmul.mubr.bf16.vlgmr.msra.gmra.mrb[32].mxu1 %v8706_v1  ;;  %3001 = vmatmul.mubr.bf16.vlgmr.msra.gmra.mrb[20].mxu0 %v8706_v1 }
 0xa84   : > { %v2879_v20 = vpop.f32.mrb[28].mxu1  ;;  %v2920_v1 = vpop.f32.mrb[16].mxu0 }
 0xa85   : > { %v2880_v19 = vadd.f32 %v2879_v20, %v2488_v15  ;;  %v2921_v21 = vadd.f32 %v2920_v1, %v2496_v17  ;;  %v2881_v23 = vpop.f32.mrb[29].mxu1  ;;  %v2922_v24 = vpop.f32.mrb[17].mxu0 }
 0xa86   : > { %v2882_v28 = vadd.f32 %v2881_v23, %v2492_v52  ;;  %v2923_v29 = vadd.f32 %v2922_v24, %v2500_v18  ;;  %v2883_v30 = vpop.f32.mrb[30].mxu1  ;;  %v2924_v31 = vpop.f32.mrb[18].mxu0 }
 0xa87   : > { %v6579_v33 = vmul.f32 -1.442695, %v2880_v19  ;;  %v6581_v35 = vmul.f32 -1.442695, %v2921_v21  ;;  %v2884_v34 = vpop.f32.mrb[31].mxu1  ;;  %v2925_v36 = vpop.f32.mrb[19].mxu0 }
 0xa88   : > { %v6580_v37 = vmul.f32 -1.442695, %v2882_v28  ;;  %v6582_v38 = vmul.f32 -1.442695, %v2923_v29  ;;  %v7318_v34 = vld [vmem:[#allocation19 + $0x40] sm:$0xff]  }
 0xa89   : > { %7445 = vpow2.f32 %v6579_v33  ;;  %v7319_v36 = vld [vmem:[#allocation19 + $0x80] sm:$0xff]   ;;  %6820 = vmatprep.subr.bf16.mxu1 %v7318_v34 }
 0xa8a   : > { %7447 = vpow2.f32 %v6581_v35 }
 0xa8b   : > { %7449 = vpow2.f32 %v6580_v37  ;;  %v7320_v37 = vld [vmem:[#allocation19] sm:$0xff]  }
 0xa8c   : > { %7451 = vpow2.f32 %v6582_v38  ;;  %6821 = vmatpush3.bf16.msra.mxu1 %v7320_v37  ;;  %v7323_v38 = vld [vmem:[#allocation19 + $0x88] sm:$0xff]   ;;  %v3041_v37 = vld [vmem:[%s9214_s3] ss:$2 sm:$0xf] }
 0xa93   : > { %v7446_v39 = vpop.eup %7445 }
 0xa94   : > { %v7448_v40 = vpop.eup %7447  ;;  %v3021_v41 = vadd.f32 1.0, %v7446_v39  ;;  %v7324_v39 = vld [vmem:[#allocation19 + $0x8] sm:$0xff]  }
 0xa95   : > { %v7450_v9 = vpop.eup %7449  ;;  %v3023_v43 = vadd.f32 1.0, %v7448_v40  ;;  %v7325_v40 = vld [vmem:[#allocation19 + $0xd0] sm:$0xff]  }
 0xa96   : > { %v7452_v8 = vpop.eup %7451  ;;  %7453 = vrcp.f32 %v3021_v41  ;;  %v3022_v44 = vadd.f32 1.0, %v7450_v9 }
 0xa97   : > { %7455 = vrcp.f32 %v3023_v43  ;;  %v3024_v11 = vadd.f32 1.0, %v7452_v8 }
 0xa98   : > { %7457 = vrcp.f32 %v3022_v44 }
 0xa99   : > { %7459 = vrcp.f32 %v3024_v11 }
 0xaa0   : > { %v7454_v26 = vpop.eup %7453 }
 0xaa1   : > { %v7456_v50 = vpop.eup %7455  ;;  %v3033_v60 = vmul.f32 %v7454_v26, %v2880_v19 }
 0xaa2   : > { %v7458_v55 = vpop.eup %7457  ;;  %v3035_v22 = vmul.f32 %v7456_v50, %v2921_v21  ;;  %v7317_v21 = vld [vmem:[#allocation19 + $0xc0] sm:$0xff]  }
 0xaa3   : > { %v7460_v62 = vpop.eup %7459  ;;  %v3034_v2 = vmul.f32 %v7458_v55, %v2882_v28  ;;  %v7321_v28 = vld [vmem:[#allocation19 + $0xc8] sm:$0xff]   ;;  %6842 = vmatprep.subr.bf16.mxu0 %v7317_v21 }
 0xaa4   : > { %v2961_v58 = vpop.f32.mrb[32].mxu1  ;;  %v3002_v59 = vpop.f32.mrb[20].mxu0  ;;  %v3036_v15 = vmul.f32 %v7460_v62, %v2923_v29  ;;  %v7322_v29 = vld [vmem:[#allocation19 + $0x48] sm:$0xff]   ;;  %6843 = vmatpush3.bf16.msra.mxu0 %v7319_v36  ;;  %v7326_v62 = vld [vmem:[#allocation19 + $0x50] sm:$0xff]  }
 0xaa5   : > { %v2962_v61 = vadd.f32 %v2961_v58, %v2504_v27  ;;  %v3003_v54 = vadd.f32 %v3002_v59, %v2512_v51  ;;  %v2963_v63 = vpop.f32.mrb[33].mxu1  ;;  %v3004_v0 = vpop.f32.mrb[21].mxu0  ;;  %6844 = vmatprep.subr.bf16.mxu0 %v7321_v28  ;;  %6822 = vmatprep.subr.bf16.mxu1 %v7322_v29  ;;  %v7327_v58 = vld [vmem:[#allocation19 + $0x90] sm:$0xff]   ;;  %v6583_v28 = vld [vmem:[%s9214_s3 + $0x1] ss:$2 sm:$0xf]  ;;  %v3079_v29 = vrot.slane %v3041_v37, %v8470_v14 }
 0xaa6   : > { %v2964_v17 = vadd.f32 %v2963_v63, %v2508_v56  ;;  %v3005_v52 = vadd.f32 %v3004_v0, %v2516_v57  ;;  %v2965_v18 = vpop.f32.mrb[34].mxu1  ;;  %v3006_v20 = vpop.f32.mrb[22].mxu0  ;;  %6823 = vmatpush3.bf16.msra.mxu1 %v7324_v39  ;;  %v7328_v59 = vld [vmem:[#allocation19 + $0x10] sm:$0xff]   ;;  %v7333_v63 = vld [vmem:[#allocation19 + $0xe0] sm:$0xff]   ;;  %v3075_v39 = vrot.slane %v3041_v37, %v8473_v16 }
 0xaa7   : > { %v3037_v1 = vmul.f32 %v3033_v60, %v2962_v61  ;;  %v3039_v23 = vmul.f32 %v3035_v22, %v3003_v54  ;;  %v2966_v24 = vpop.f32.mrb[35].mxu1  ;;  %v3007_v30 = vpop.f32.mrb[23].mxu0  ;;  %6824 = vmatprep.subr.bf16.mxu1 %v7326_v62  ;;  %v7329_v60 = vld [vmem:[#allocation19 + $0xd8] sm:$0xff]   ;;  %v7334_v0 = vld [vmem:[#allocation19 + $0x60] sm:$0xff]   ;;  %v7339_v18 = vld [vmem:[#allocation19 + $0xa8] sm:$0xff]  }
 0xaa8   : > { %v3038_v4 = vmul.f32 %v3034_v2, %v2964_v17  ;;  %v3040_v31 = vmul.f32 %v3036_v15, %v3005_v52  ;;  %6845 = vmatpush3.bf16.msra.mxu0 %v7323_v38  ;;  %v7330_v22 = vld [vmem:[#allocation19 + $0x58] sm:$0xff]   ;;  %v7335_v2 = vld [vmem:[#allocation19 + $0xa0] sm:$0xff]   ;;  %v7337_v17 = vld [vmem:[#allocation19 + $0xe8] sm:$0xff]   ;;  %v3087_v38 = vrot.slane %v3041_v37, %v8721_v12 }
 0xaa9   : > { %6846 = vmatprep.subr.bf16.mxu0 %v7325_v40  ;;  %v7331_v61 = vld [vmem:[#allocation19 + $0x98] sm:$0xff]   ;;  %v7336_v15 = vld [vmem:[#allocation19 + $0x20] sm:$0xff]   ;;  %v7338_v52 = vld [vmem:[#allocation19 + $0x68] sm:$0xff]   ;;  %v3083_v40 = vrot.slane %v3041_v37, %v8715_v3 }
 0xaaa   : > { %v3044_v33 = vadd.f32 %v3038_v4, %v3037_v1  ;;  %6825 = vmatpush3.bf16.msra.mxu1 %v7328_v59  ;;  %v7332_v54 = vld [vmem:[#allocation19 + $0x18] sm:$0xff]   ;;  %v7340_v20 = vld [vmem:[#allocation19 + $0x28] sm:$0xff]   ;;  %v7343_v24 = vld [vmem:[#allocation19 + $0xb0] sm:$0xff]  }
 0xaab   : > { %6826 = vmatprep.subr.bf16.mxu1 %v7330_v22  ;;  %v7344_v30 = vld [vmem:[#allocation19 + $0x30] sm:$0xff]  }
 0xaac   : > { %v3045_v35 = vadd.f32 %v3044_v33, %v3039_v23  ;;  %6847 = vmatpush3.bf16.msra.mxu0 %v7327_v58  ;;  %v7347_v33 = vld [vmem:[#allocation19 + $0xb8] sm:$0xff]  }
 0xaad   : > { %6848 = vmatprep.subr.bf16.mxu0 %v7329_v60 }
 0xaae   : > { %v3046_v19 = vadd.f32 %v3045_v35, %v3040_v31  ;;  %6827 = vmatpush3.bf16.msra.mxu1 %v7332_v54  ;;  %v7348_v35 = vld [vmem:[#allocation19 + $0x38] sm:$0xff]  }
 0xaaf   : > { %6828 = vmatprep.subr.bf16.mxu1 %v7334_v0 }
 0xab0   : > { %3047 = vadd.xlane.f32.xlu0 %v3046_v19  ;;  %6849 = vmatpush3.bf16.msra.mxu0 %v7331_v61  ;;  %v7351_v19 = vld [vmem:[#allocation10 + $0x84] ss:$8 sps:$4 sm:$0xff]  }
 0xab1   : > { %6850 = vmatprep.subr.bf16.mxu0 %v7333_v63 }
 0xab2   : > { %6829 = vmatpush3.bf16.msra.mxu1 %v7336_v15  ;;  %v7349_v15 = vld [vmem:[#allocation10 + $0x80] ss:$8 sps:$4 sm:$0xff]  }
 0xab3   : > { %6830 = vmatprep.subr.bf16.mxu1 %v7338_v52 }
 0xab4   : > { %6851 = vmatpush3.bf16.msra.mxu0 %v7335_v2 }
 0xab5   : > { %6852 = vmatprep.subr.bf16.mxu0 %v7337_v17 }
 0xab6   : > { %6831 = vmatpush3.bf16.msra.mxu1 %v7340_v20  ;;  %v7358_v20 = vld [vmem:[#allocation10 + $0xb0] ss:$8 sps:$4 sm:$0xff]  }
 0xab8   : > { %6853 = vmatpush3.bf16.msra.mxu0 %v7339_v18  ;;  %v7360_v18 = vld [vmem:[#allocation10 + $0xb4] ss:$8 sps:$4 sm:$0xff]  }
 0xb3d   : > { %v3048_v41 = vpop.xlane.xlu0 %3047 }
 0xb3e   : > { %v3050_v9 = vmul.f32 0.001953125, %v3048_v41 }
 0xb40   : > { %v8739_v43 = vsub.f32 %v3037_v1, %v3050_v9  ;;  %v8741_v8 = vsub.f32 %v3038_v4, %v3050_v9  ;;  %v8743_v44 = vsub.f32 %v3039_v23, %v3050_v9  ;;  %v8745_v11 = vsub.f32 %v3040_v31, %v3050_v9  ;;  %v7341_v1 = vld [vmem:[#allocation19 + $0xf0] sm:$0xff]   ;;  %v7345_v4 = vld [vmem:[#allocation19 + $0xf8] sm:$0xff]  }
 0xb41   : > { %v7342_v23 = vld [vmem:[#allocation19 + $0x70] sm:$0xff]   ;;  %6854 = vmatprep.subr.bf16.mxu0 %v7341_v1  ;;  %v7346_v31 = vld [vmem:[#allocation19 + $0x78] sm:$0xff]   ;;  %v3104_v9 = vrot.slane %v6583_v28, %v8470_v14 }
 0xb42   : > { %v3055_v26 = vmul.f32 %v8739_v43, %v8739_v43  ;;  %v3056_v50 = vmul.f32 %v8741_v8, %v8741_v8  ;;  %v3057_v27 = vmul.f32 %v8743_v44, %v8743_v44  ;;  %v3058_v55 = vmul.f32 %v8745_v11, %v8745_v11  ;;  %6832 = vmatprep.subr.bf16.mxu1 %v7342_v23  ;;  %v7363_v1 = vld [vmem:[#allocation10 + $0xc4] ss:$8 sps:$4 sm:$0xff]   ;;  %v7361_v23 = vld [vmem:[#allocation10 + $0xc0] ss:$8 sps:$4 sm:$0xff]  }
 0xb43   : > { %6855 = vmatpush3.bf16.msra.mxu0 %v7343_v24  ;;  %6833 = vmatpush3.bf16.msra.mxu1 %v7344_v30  ;;  %v7366_v24 = vld [vmem:[#allocation10 + $0xd4] ss:$8 sps:$4 sm:$0xff]   ;;  %v7364_v30 = vld [vmem:[#allocation10 + $0xd0] ss:$8 sps:$4 sm:$0xff]  }
 0xb44   : > { %v3059_v51 = vadd.f32 %v3056_v50, %v3055_v26  ;;  %6856 = vmatprep.subr.bf16.mxu0 %v7345_v4  ;;  %6834 = vmatprep.subr.bf16.mxu1 %v7346_v31  ;;  %v3112_v26 = vrot.slane %v6583_v28, %v8721_v12  ;;  %v3100_v50 = vrot.slane %v6583_v28, %v8473_v16  ;;  %v7369_v4 = vld [vmem:[#allocation10 + $0xe4] ss:$8 sps:$4 sm:$0xff]   ;;  %v7367_v31 = vld [vmem:[#allocation10 + $0xe0] ss:$8 sps:$4 sm:$0xff]  }
 0xb46   : > { %v3060_v56 = vadd.f32 %v3059_v51, %v3057_v27  ;;  %v3108_v27 = vrot.slane %v6583_v28, %v8715_v3 }
 0xb47   : > { %6857 = vmatpush3.bf16.msra.mxu0 %v7347_v33  ;;  %6835 = vmatpush3.bf16.msra.mxu1 %v7348_v35  ;;  %v7372_v33 = vld [vmem:[#allocation10 + $0xf4] ss:$8 sps:$4 sm:$0xff]   ;;  %v7370_v35 = vld [vmem:[#allocation10 + $0xf0] ss:$8 sps:$4 sm:$0xff]  }
 0xb48   : > { %v3061_v57 = vadd.f32 %v3060_v56, %v3058_v55  ;;  %7030 = vmatprep.subr.bf16.mxu1 %v7925_v6  ;;  %3732 = vmatprep.subr.bf16.mxu0 %v7351_v19 }
 0xb4a   : > { %3062 = vadd.xlane.f32.xlu1 %v3061_v57 }
 0xbd7   : > { %v3063_v21 = vpop.xlane.xlu1 %3062 }
 0xbd8   : > { %v3064_v34 = vmul.f32 0.001953125, %v3063_v21 }
 0xbda   : > { %v3065_v36 = vadd.f32 1e-06, %v3064_v34  ;;  %v6584_v34 = vld [vmem:[%s9215_s30] ss:$0 sm:$0xff] }
 0xbdc   : > { %7461 = vrsqrt.f32 %v3065_v36 }
 0xbe6   : > { %v7462_v41 = vpop.eup %7461 }
 0xbe7   : > { %v3068_v51 = vmul.f32 %v7462_v41, %v8741_v8  ;;  %v3070_v55 = vmul.f32 %v7462_v41, %v8745_v11  ;;  %v3067_v56 = vmul.f32 %v7462_v41, %v8739_v43  ;;  %v3069_v57 = vmul.f32 %v7462_v41, %v8743_v44  ;;  %v7354_v8 = vld [vmem:[#allocation10 + $0x94] ss:$8 sps:$4 sm:$0xff]   ;;  %v7352_v43 = vld [vmem:[#allocation10 + $0x90] ss:$8 sps:$4 sm:$0xff]   ;;  %v7357_v44 = vld [vmem:[#allocation10 + $0xa4] ss:$8 sps:$4 sm:$0xff]  }
 0xbe8   : > { %v7355_v11 = vld [vmem:[#allocation10 + $0xa0] ss:$8 sps:$4 sm:$0xff]  }
 0xbe9   : > { %v3093_v62 = vmul.f32 %v3079_v29, %v3068_v51  ;;  %v3095_v58 = vmul.f32 %v3087_v38, %v3070_v55  ;;  %v3092_v59 = vmul.f32 %v3075_v39, %v3067_v56  ;;  %v3094_v60 = vmul.f32 %v3083_v40, %v3069_v57 }
 0xbeb   : > { %v3118_v22 = vadd.f32 %v3104_v9, %v3093_v62  ;;  %v3120_v61 = vadd.f32 %v3112_v26, %v3095_v58  ;;  %v3117_v54 = vadd.f32 %v3100_v50, %v3092_v59  ;;  %v3119_v63 = vadd.f32 %v3108_v27, %v3094_v60 }
 0xbed   : > { %v3122_v0 = vpack.c.bf16 %v3118_v22, %v3118_v22  ;;  %v3124_v2 = vpack.c.bf16 %v3120_v61, %v3120_v61  ;;  %v3121_v17 = vpack.c.bf16 %v3117_v54, %v3117_v54  ;;  %v3123_v52 = vpack.c.bf16 %v3119_v63, %v3119_v63  ;;  %v7374_v61 = vld [vmem:[#allocation8 + $0x48] sm:$0xff]  }
 0xbef   : > { %3420 = vmatprep.mubr.bf16.mxu1 %v3122_v0  ;;  %3460 = vmatprep.mubr.bf16.mxu0 %v3124_v2 }
 0xbf0   : > { %3421 = vmatmul.mubr.bf16.vlgmr.msra.gmra.mrb[36].mxu1 %v3121_v17  ;;  %3461 = vmatmul.mubr.bf16.vlgmr.msra.gmra.mrb[24].mxu0 %v3123_v52  ;;  %v7376_v17 = vld [vmem:[#allocation8 + $0x58] sm:$0xff]   ;;  %v7377_v52 = vld [vmem:[#allocation8 + $0x60] sm:$0xff]  }
 0xbf1   : > { %3733 = vmatpush1.bf16.msra.mxu0 %v7349_v15  ;;  %3764 = vmatprep.mubr.bf16.mxu0 %v7927_v32  ;;  %v7375_v15 = vld [vmem:[#allocation8 + $0x50] sm:$0xff]  }
 0xbf2   : > { %3734 = vmatprep.subr.bf16.mxu0 %v7354_v8  ;;  %7046 = vmatprep.mubr.msk.bf16.mxu1 %vm7926_vm0, %v7925_v6  ;;  %v7378_v8 = vld [vmem:[#allocation8 + $0x68] sm:$0xff]  }
 0xbf5   : > { %3735 = vmatpush1.bf16.msra.mxu0 %v7352_v43  ;;  %v7379_v43 = vld [vmem:[#allocation8 + $0x70] sm:$0xff]  }
 0xbf6   : > { %3736 = vmatprep.subr.bf16.mxu0 %v7357_v44  ;;  %v7380_v44 = vld [vmem:[#allocation8 + $0x78] sm:$0xff]  }
 0xbf9   : > { %3737 = vmatpush1.bf16.msra.mxu0 %v7355_v11 }
 0xbfa   : > { %3738 = vmatprep.subr.bf16.mxu0 %v7360_v18 }
 0xbfd   : > { %3739 = vmatpush1.bf16.msra.mxu0 %v7358_v20 }
 0xbfe   : > { %3740 = vmatprep.subr.bf16.mxu0 %v7363_v1 }
 0xc01   : > { %3741 = vmatpush1.bf16.msra.mxu0 %v7361_v23 }
 0xc02   : > { %3742 = vmatprep.subr.bf16.mxu0 %v7366_v24 }
 0xc05   : > { %3743 = vmatpush1.bf16.msra.mxu0 %v7364_v30 }
 0xc06   : > { %3744 = vmatprep.subr.bf16.mxu0 %v7369_v4 }
 0xc09   : > { %3745 = vmatpush1.bf16.msra.mxu0 %v7367_v31 }
 0xc0a   : > { %3746 = vmatprep.subr.bf16.mxu0 %v7372_v33 }
 0xc0d   : > { %3747 = vmatpush1.bf16.msra.mxu0 %v7370_v35 }
 0xc0e   : > { %7074 = vmatprep.subr.bf16.mxu0 %v7925_v6 }
 0xc10   : > { %3765 = vmatmul.mubr.bf16.vlgmr.msra.gmra.mrb[28].mxu0 %v3621_v10  ;;  %v3640_v10 = vld [vmem:[#allocation11 + $0x2] sm:$0x3] }
 0xc11   : > { %7076 = vmatprep.mubr.msk.bf16.mxu0 %vm7926_vm0, %v7925_v6  ;;  %v3649_v26 = vrot.slane %v3640_v10, %v8470_v14  ;;  %v3645_v50 = vrot.slane %v3640_v10, %v8473_v16 }
 0xcc3   : > { %v6836_v19 = vpop.f32.mrb[36].mxu1  ;;  %v6858_v21 = vpop.f32.mrb[24].mxu0 }
 0xcc4   : > { %v6837_v36 = vpop.f32.mrb[37].mxu1  ;;  %v6859_v37 = vpop.f32.mrb[25].mxu0 }
 0xcc5   : > { %v6838_v28 = vadd.f32 %v6837_v36, %v6836_v19  ;;  %v6860_v29 = vadd.f32 %v6859_v37, %v6858_v21  ;;  %v6839_v38 = vpop.f32.mrb[38].mxu1  ;;  %v6861_v39 = vpop.f32.mrb[26].mxu0 }
 0xcc6   : > { %v6840_v40 = vpop.f32.mrb[39].mxu1  ;;  %v6862_v41 = vpop.f32.mrb[27].mxu0 }
 0xcc7   : > { %v3423_v9 = vadd.f32 %v6838_v28, %v6584_v34 }
 0xcc9   : > { %v3463_v5 = vadd.f32 %v6860_v29, %v3423_v9 }
 0xccb   : > { %v3468_v7 = vadd.f32 %v3463_v5, %v8697_v25  ;;  %v7373_v25 = vld [vmem:[#allocation8 + $0x40] sm:$0xff]  }
 0xccc   : > { %7031 = vmatpush3.bf16.msra.mxu1 %v7373_v25 }
 0xccd   : > { %3472 = vadd.xlane.f32.xlu0 %v3468_v7  ;;  %7032 = vmatprep.subr.bf16.mxu1 %v7925_v6 }
 0xcd0   : > { %7033 = vmatpush3.bf16.msra.mxu1 %v7374_v61 }
 0xcd1   : > { %7034 = vmatprep.subr.bf16.mxu1 %v7925_v6 }
 0xcd4   : > { %7035 = vmatpush3.bf16.msra.mxu1 %v7375_v15 }
 0xcd5   : > { %7036 = vmatprep.subr.bf16.mxu1 %v7925_v6 }
 0xcd8   : > { %7037 = vmatpush3.bf16.msra.mxu1 %v7376_v17 }
 0xcd9   : > { %7038 = vmatprep.subr.bf16.mxu1 %v7925_v6 }
 0xcdc   : > { %7039 = vmatpush3.bf16.msra.mxu1 %v7377_v52  ;;  %v6617_v52 = vld [vmem:[#allocation7 + $0x4] ss:$0 sm:$0xff] }
 0xcdd   : > { %7040 = vmatprep.subr.bf16.mxu1 %v7925_v6 }
 0xce0   : > { %7041 = vmatpush3.bf16.msra.mxu1 %v7378_v8 }
 0xce1   : > { %7042 = vmatprep.subr.bf16.mxu1 %v7925_v6 }
 0xce3   : > { %v3766_v27 = vpop.f32.mrb[28].mxu0 }
 0xce4   : > { %v3768_v51 = vpop.f32.mrb[29].mxu0  ;;  %v3767_v57 = vadd.f32 %v3766_v27, %v3645_v50  ;;  %7043 = vmatpush3.bf16.msra.mxu1 %v7379_v43 }
 0xce5   : > { %v3769_v55 = vadd.f32 %v3768_v51, %v3649_v26  ;;  %v3770_v56 = vpop.f32.mrb[30].mxu0  ;;  %7044 = vmatprep.subr.bf16.mxu1 %v7925_v6 }
 0xce6   : > { %v3771_v62 = vadd.f32 %v3770_v56, %v3645_v50  ;;  %v3772_v58 = vpop.f32.mrb[31].mxu0 }
 0xce7   : > { %v3773_v59 = vadd.f32 %v3772_v58, %v3649_v26 }
 0xce8   : > { %v3944_v60 = vpack.c.bf16 %v3771_v62, %v3767_v57  ;;  %7045 = vmatpush3.bf16.msra.mxu1 %v7380_v44 }
 0xce9   : > { %v8789_v22 = vpack.c.bf16 %v3773_v59, %v3769_v55  ;;  %7050 = vmatprep.subr.bf16.mxu1 %v7925_v6 }
 0xcea   : > { %3946 = vrot.lane.b32.xlu0 %v3944_v60, %s7929_s25  ;;  %v3956_v24 = vshrl.u32 %v3944_v60, 16 }
 0xd5a   : > { %v3473_v54 = vpop.xlane.xlu0 %3472 }
 0xd5b   : > { %v3474_v63 = vmul.f32 0.0078125, %v3473_v54 }
 0xd5d   : > { %v3475_v0 = vsub.f32 %v3468_v7, %v3474_v63 }
 0xd5e   : > { %v3947_v11 = vpop.permute.xlu0 %3946 }
 0xd5f   : > { %v3476_v2 = vmul.f32 %v3475_v0, %v3475_v0  ;;  %v3957_v1 = vshrl.u32 %v3947_v11, 16  ;;  %v3954_v30 = vpack.i.b16 %v3947_v11, %v3944_v60 }
 0xd61   : > { %3477 = vadd.xlane.f32.xlu1 %v3476_v2  ;;  %v3958_v31 = vpack.i.b16 %v3957_v1, %v3956_v24  ;;  %v3968_v33 = vcombine.high %v3954_v30, %v8493_v46  ;;  %v3975_v37 = vrot.slane %v3954_v30, %v8489_v42 }
 0xd63   : > { %v4034_v36 = vcombine.high %v3958_v31, %v8493_v46  ;;  %v3982_v39 = vrot.slane %v3968_v33, %v8489_v42  ;;  %v4041_v7 = vrot.slane %v3958_v31, %v8489_v42 }
 0xd65   : > { %v4048_v10 = vrot.slane %v4034_v36, %v8489_v42 }
 0xd72   : > { %3948 = vrot.lane.b32.xlu1 %v3944_v60, %s7928_s1 }
 0xd76   : > { %3950 = vrot.lane.b32.xlu1 %v3944_v60, %s7930_s5 }
 0xdee   : > { %v3478_v18 = vpop.xlane.xlu1 %3477 }
 0xdef   : > { %v3479_v20 = vmul.f32 0.0078125, %v3478_v18 }
 0xdf1   : > { %v3480_v23 = vadd.f32 1e-05, %v3479_v20 }
 0xdf2   : > { %v3949_v4 = vpop.permute.xlu1 %3948 }
 0xdf3   : > { %7463 = vrsqrt.f32 %v3480_v23  ;;  %v3964_v19 = vshrl.u32 %v3949_v4, 16  ;;  %v6618_v23 = vld [vmem:[#allocation7 + $0x5] ss:$0 sm:$0xff] }
 0xdf6   : > { %v3951_v35 = vpop.permute.xlu1 %3950 }
 0xdf7   : > { %v3962_v21 = vpack.i.b16 %v3951_v35, %v3949_v4  ;;  %v3965_v34 = vshrl.u32 %v3951_v35, 16 }
 0xdf9   : > { %v3966_v28 = vpack.i.b16 %v3965_v34, %v3964_v19  ;;  %v3983_v29 = vcombine.high %v3962_v21, %v8493_v46  ;;  %v3990_v38 = vrot.slane %v3962_v21, %v8489_v42 }
 0xdfb   : > { %v3997_v40 = vrot.slane %v3983_v29, %v8489_v42  ;;  %v3998_v41 = vcombine.low %v3975_v37, %v3990_v38  ;;  %v3999_v9 = vcombine.high %v3975_v37, %v3990_v38  ;;  %v4049_v5 = vcombine.high %v3966_v28, %v8493_v46 }
 0xdfc   : > { %v4056_v26 = vrot.slane %v3966_v28, %v8489_v42 }
 0xdfd   : > { %v7464_v50 = vpop.eup %7463  ;;  %v4006_v27 = vrot.slane %v3998_v41, %v8496_v53  ;;  %v4013_v51 = vrot.slane %v3999_v9, %v8496_v53  ;;  %v4014_v55 = vcombine.low %v3982_v39, %v3997_v40  ;;  %v4015_v56 = vcombine.high %v3982_v39, %v3997_v40 }
 0xdfe   : > { %v3482_v57 = vmul.f32 %v7464_v50, %v3475_v0  ;;  %v4063_v62 = vrot.slane %v4049_v5, %v8489_v42  ;;  %v4064_v58 = vcombine.low %v4041_v7, %v4056_v26  ;;  %v4065_v59 = vcombine.high %v4041_v7, %v4056_v26 }
 0xdff   : > { %v4022_v60 = vrot.slane %v4014_v55, %v8496_v53  ;;  %v4029_v25 = vrot.slane %v4015_v56, %v8496_v53  ;;  %v4100_v61 = vcombine.low %v4006_v27, %v4013_v51  ;;  %v6647_v54 = vcombine.high %v4006_v27, %v4013_v51 }
 0xe00   : > { %v4072_v63 = vrot.slane %v4064_v58, %v8496_v53  ;;  %v4079_v2 = vrot.slane %v4065_v59, %v8496_v53  ;;  %v4080_v15 = vcombine.low %v4048_v10, %v4063_v62  ;;  %v4081_v17 = vcombine.high %v4048_v10, %v4063_v62 }
 0xe01   : > { %v4107_v8 = vrot.slane %v4100_v61, %v8489_v42  ;;  %v4115_v0 = vrot.slane %v6647_v54, %v8489_v42  ;;  %v4116_v43 = vcombine.low %v4022_v60, %v4029_v25  ;;  %v6648_v44 = vcombine.high %v4022_v60, %v4029_v25  ;;  %v6622_v25 = vld [vmem:[%s9212_s22 + $0x1] ss:$0 sm:$0xff] }
 0xe02   : > { %v4088_v11 = vrot.slane %v4080_v15, %v8496_v53  ;;  %v4095_v18 = vrot.slane %v4081_v17, %v8496_v53  ;;  %v4150_v20 = vcombine.low %v4072_v63, %v4079_v2  ;;  %v6649_v1 = vcombine.high %v4072_v63, %v4079_v2 }
 0xe03   : > { %v3487_v24 = vmul.f32 %v6617_v52, %v3482_v57  ;;  %v4123_v30 = vrot.slane %v4116_v43, %v8489_v42  ;;  %v4131_v4 = vrot.slane %v6648_v44, %v8489_v42  ;;  %v4132_v31 = vcombine.low %v4107_v8, %v4115_v0 }
 0xe04   : > { %v4166_v33 = vcombine.low %v4088_v11, %v4095_v18  ;;  %v6650_v35 = vcombine.high %v4088_v11, %v4095_v18  ;;  %v4157_v19 = vrot.slane %v4150_v20, %v8489_v42  ;;  %v4165_v21 = vrot.slane %v6649_v1, %v8489_v42 }
 0xe05   : > { %v8828_v34 = vadd.f32 %v6618_v23, %v3487_v24  ;;  %v4140_v36 = vcombine.low %v4123_v30, %v4131_v4  ;;  %v4139_v39 = vrot.slane %v4132_v31, %v8496_v53 }
 0xe06   : > { %v4173_v37 = vrot.slane %v4166_v33, %v8489_v42  ;;  %v4181_v28 = vrot.slane %v6650_v35, %v8489_v42  ;;  %v4182_v29 = vcombine.low %v4157_v19, %v4165_v21 }
 0xe07   : > { %v3507_v38 = vpack.c.bf16 %v8828_v34, %v8828_v34  ;;  %v4147_v40 = vrot.slane %v4140_v36, %v8496_v53 }
 0xe08   : > { %v4190_v41 = vcombine.low %v4173_v37, %v4181_v28  ;;  %v4189_v7 = vrot.slane %v4182_v29, %v8496_v53 }
 0xe09   : > { %7047 = vmatmul.mubr.bf16.vlgmr.msra.gmra.mrb[40].mxu1 %v3507_v38  ;;  %v4148_v9 = vcombine.low %v4139_v39, %v4147_v40  ;;  %v8836_v5 = vcombine.high %v4139_v39, %v4147_v40 }
 0xe0a   : > { %v4197_v10 = vrot.slane %v4190_v41, %v8496_v53  ;;  %7052 = vmatprep.mubr.msk.bf16.mxu1 %vm7926_vm0, %v7925_v6 }
 0xe0b   : > { %v4203_v27 = vshrl.u32 %v4148_v9, 16  ;;  %v4209_v51 = vshrl.u32 %v8836_v5, 16 }
 0xe0c   : > { %v4198_v26 = vcombine.low %v4189_v7, %v4197_v10  ;;  %v8842_v50 = vcombine.high %v4189_v7, %v4197_v10 }
 0xe0e   : > { %v4202_v55 = vpack.i.b16 %v4198_v26, %v4148_v9  ;;  %v4204_v56 = vshrl.u32 %v4198_v26, 16  ;;  %v4208_v57 = vpack.i.b16 %v8842_v50, %v8836_v5  ;;  %v4210_v62 = vshrl.u32 %v8842_v50, 16 }
 0xe10   : > { %v4488_v58 = vsel %vm1723_vm1, %v4202_v55, 0  ;;  %v8849_v59 = vpack.i.b16 %v4204_v56, %v4203_v27  ;;  %v8851_v60 = vpack.i.b16 %v4210_v62, %v4209_v51 }
 0xe11   : > { %7051 = vmatpush3.bf16.xpose.msra.mxu1 %v4488_v58 }
 0xe12   : > { %7056 = vmatprep.subr.bf16.mxu1 %v7925_v6 }
 0xedc   : > { %v3615_v61 = vpop.f32.mrb[40].mxu1 }
 0xedd   : > { %v3616_v54 = vadd.f32 %v6622_v25, %v3615_v61  ;;  %v7048_v63 = vpop.f32.mrb[41].mxu1 }
 0xede   : > { %v3618_v2 = vpop.f32.mrb[42].mxu1 }
 0xedf   : > { %v3775_v15 = vpack.c.bf16 %v3616_v54, %v3616_v54  ;;  %v7049_v17 = vpop.f32.mrb[43].mxu1 }
 0xee1   : > { %3779 = vrot.lane.b32.xlu0 %v3775_v15, %s7928_s1  ;;  %3777 = vrot.lane.b32.xlu1 %v3775_v15, %s7929_s25  ;;  %v3789_v0 = vrot.slane %v3775_v15, %v8489_v42 }
 0xee5   : > { %3781 = vrot.lane.b32.xlu1 %v3775_v15, %s7930_s5 }
 0xf53   : > { %v3778_v52 = vpop.permute.xlu1 %3777  ;;  %v3780_v8 = vpop.permute.xlu0 %3779 }
 0xf54   : > { %v3797_v43 = vrot.slane %v3780_v8, %v8489_v42  ;;  %v3823_v23 = vrot.slane %v3778_v52, %v8489_v42 }
 0xf56   : > { %v3798_v44 = vcombine.low %v3789_v0, %v3797_v43  ;;  %v3799_v11 = vcombine.high %v3789_v0, %v3797_v43 }
 0xf57   : > { %v3782_v18 = vpop.permute.xlu1 %3781 }
 0xf58   : > { %v3806_v20 = vrot.slane %v3798_v44, %v8496_v53  ;;  %v3831_v1 = vrot.slane %v3782_v18, %v8489_v42  ;;  %v3813_v24 = vrot.slane %v3799_v11, %v8496_v53  ;;  %v4534_v11 = vsel %vm1723_vm1, %v8849_v59, 0 }
 0xf5a   : > { %v3832_v30 = vcombine.low %v3823_v23, %v3831_v1  ;;  %v3833_v4 = vcombine.high %v3823_v23, %v3831_v1  ;;  %v3814_v31 = vcombine.high %v3806_v20, %v7927_v32  ;;  %v3815_v19 = vcombine.high %v3813_v24, %v7927_v32 }
 0xf5b   : > { %v3854_v21 = vshrl.u32 %v3806_v20, 16  ;;  %v3870_v39 = vshrl.u32 %v3813_v24, 16  ;;  %v4580_v23 = vsel %vm1723_vm1, %v4208_v57, 0 }
 0xf5c   : > { %v3840_v33 = vrot.slane %v3832_v30, %v8496_v53  ;;  %v3847_v35 = vrot.slane %v3833_v4, %v8496_v53  ;;  %v3862_v38 = vshrl.u32 %v3814_v31, 16  ;;  %v3878_v27 = vshrl.u32 %v3815_v19, 16 }
 0xf5d   : > { %v4626_v4 = vsel %vm1723_vm1, %v8851_v60, 0 }
 0xf5e   : > { %v3848_v36 = vcombine.high %v3840_v33, %v7927_v32  ;;  %v3849_v37 = vcombine.high %v3847_v35, %v7927_v32  ;;  %v3852_v28 = vpack.i.b16 %v3840_v33, %v3806_v20  ;;  %v3855_v29 = vshrl.u32 %v3840_v33, 16 }
 0xf5f   : > { %v3868_v40 = vpack.i.b16 %v3847_v35, %v3813_v24  ;;  %v3871_v41 = vshrl.u32 %v3847_v35, 16 }
 0xf60   : > { %v3856_v9 = vpack.i.b16 %v3855_v29, %v3854_v21  ;;  %v3860_v7 = vpack.i.b16 %v3848_v36, %v3814_v31  ;;  %v3863_v10 = vshrl.u32 %v3848_v36, 16  ;;  %v3876_v26 = vpack.i.b16 %v3849_v37, %v3815_v19 }
 0xf61   : > { %v3872_v51 = vpack.i.b16 %v3871_v41, %v3870_v39  ;;  %v3879_v55 = vshrl.u32 %v3849_v37, 16  ;;  %v3882_v56 = vcombine.low %v3852_v28, %v3868_v40 }
 0xf62   : > { %v3864_v62 = vpack.i.b16 %v3863_v10, %v3862_v38  ;;  %v3890_v58 = vcombine.low %v3860_v7, %v3876_v26 }
 0xf63   : > { %v3880_v25 = vpack.i.b16 %v3879_v55, %v3878_v27  ;;  %v3907_v61 = vcombine.low %v3856_v9, %v3872_v51  ;;  %v3889_v63 = vrot.slane %v3882_v56, %v8489_v42 }
 0xf64   : > { %v3897_v54 = vrot.slane %v3890_v58, %v8489_v42 }
 0xf65   : > { %v3915_v2 = vcombine.low %v3864_v62, %v3880_v25  ;;  %v3914_v17 = vrot.slane %v3907_v61, %v8489_v42 }
 0xf66   : > { %v3898_v15 = vcombine.low %v3889_v63, %v3897_v54 }
 0xf67   : > { %v3922_v52 = vrot.slane %v3915_v2, %v8489_v42 }
 0xf68   : > { %v3905_v0 = vrot.slane %v3898_v15, %v8496_v53 }
 0xf69   : > { %v3923_v8 = vcombine.low %v3914_v17, %v3922_v52 }
 0xf6a   : > { %v3935_v20 = vshrl.u32 %v3905_v0, 16  ;;  %v3906_v24 = vcombine.high %v3905_v0, %v7927_v32 }
 0xf6b   : > { %v3930_v43 = vrot.slane %v3923_v8, %v8496_v53 }
 0xf6c   : > { %v3941_v50 = vshrl.u32 %v3906_v24, 16 }
 0xf6d   : > { %v3934_v44 = vpack.i.b16 %v3930_v43, %v3905_v0  ;;  %v3936_v18 = vshrl.u32 %v3930_v43, 16  ;;  %v3931_v59 = vcombine.high %v3930_v43, %v7927_v32 }
 0xf6f   : > { %7053 = vmatmul.mubr.msk.bf16.vlgmr.msra.gmra.mrb[44].mxu1 %vm1723_vm1, %v3934_v44  ;;  %v3937_v1 = vpack.i.b16 %v3936_v18, %v3935_v20  ;;  %v3940_v30 = vpack.i.b16 %v3931_v59, %v3906_v24  ;;  %v3942_v5 = vshrl.u32 %v3931_v59, 16 }
 0xf70   : > { %7057 = vmatpush3.bf16.xpose.msra.mxu1 %v4534_v11  ;;  %7058 = vmatprep.mubr.msk.bf16.mxu1 %vm7926_vm0, %v7925_v6 }
 0xf71   : > { %7062 = vmatprep.subr.bf16.mxu1 %v7925_v6  ;;  %v3943_v57 = vpack.i.b16 %v3942_v5, %v3941_v50 }
 0xf77   : > { %7059 = vmatmul.mubr.msk.bf16.vlgmr.msra.gmra.mrb[48].mxu1 %vm1723_vm1, %v3937_v1 }
 0xf78   : > { %7063 = vmatpush3.bf16.xpose.msra.mxu1 %v4580_v23  ;;  %7064 = vmatprep.mubr.msk.bf16.mxu1 %vm7926_vm0, %v7925_v6 }
 0xf79   : > { %7068 = vmatprep.subr.bf16.mxu1 %v7925_v6 }
 0xf7f   : > { %7065 = vmatmul.mubr.msk.bf16.vlgmr.msra.gmra.mrb[52].mxu1 %vm1723_vm1, %v3940_v30 }
 0xf80   : > { %7069 = vmatpush3.bf16.xpose.msra.mxu1 %v4626_v4  ;;  %7070 = vmatprep.mubr.msk.bf16.mxu1 %vm7926_vm0, %v7925_v6  ;;  %v4224_v4 = vshrl.u32 %v8789_v22, 16 }
 0xf81   : > { %7080 = vmatprep.subr.bf16.mxu1 %v7925_v6 }
 0xf87   : > { %7071 = vmatmul.mubr.msk.bf16.vlgmr.msra.gmra.mrb[56].mxu1 %vm1723_vm1, %v3943_v57 }
 0xf88   : > { %7082 = vmatprep.mubr.msk.bf16.mxu1 %vm7926_vm0, %v7925_v6 }
0x1042   : > { %v4524_v31 = vpop.f32.mrb[44].mxu1 }
0x1043   : > { %v7054_v33 = vpop.f32.mrb[45].mxu1  ;;  %v4668_v35 = vsel %vm1908_vm2, %v4524_v31, -inf }
0x1044   : > { %4669 = vmax.xlane.f32.xlu0 %v4668_v35  ;;  %v4527_v60 = vpop.f32.mrb[46].mxu1 }
0x1045   : > { %v7055_v19 = vpop.f32.mrb[47].mxu1 }
0x104a   : > { %v4570_v21 = vpop.f32.mrb[48].mxu1 }
0x104b   : > { %v7060_v36 = vpop.f32.mrb[49].mxu1  ;;  %v4671_v37 = vsel %vm1908_vm2, %v4570_v21, -inf }
0x104c   : > { %4672 = vmax.xlane.f32.xlu1 %v4671_v37  ;;  %v4573_v28 = vpop.f32.mrb[50].mxu1 }
0x104d   : > { %v7061_v29 = vpop.f32.mrb[51].mxu1 }
0x1052   : > { %v4616_v38 = vpop.f32.mrb[52].mxu1 }
0x1053   : > { %v7066_v39 = vpop.f32.mrb[53].mxu1  ;;  %v4674_v40 = vsel %vm1908_vm2, %v4616_v38, -inf }
0x1054   : > { %4675 = vmax.xlane.f32.xlu0 %v4674_v40  ;;  %v4619_v41 = vpop.f32.mrb[54].mxu1 }
0x1055   : > { %v7067_v9 = vpop.f32.mrb[55].mxu1 }
0x105a   : > { %v4662_v7 = vpop.f32.mrb[56].mxu1 }
0x105b   : > { %v7072_v10 = vpop.f32.mrb[57].mxu1  ;;  %v4677_v26 = vsel %vm1908_vm2, %v4662_v7, -inf }
0x105c   : > { %4678 = vmax.xlane.f32.xlu0 %v4677_v26  ;;  %v4665_v27 = vpop.f32.mrb[58].mxu1 }
0x105d   : > { %4216 = vrot.lane.b32.xlu1 %v8789_v22, %s7928_s1  ;;  %v7073_v51 = vpop.f32.mrb[59].mxu1 }
0x1061   : > { %4218 = vrot.lane.b32.xlu1 %v8789_v22, %s7930_s5 }
0x1072   : > { %4214 = vrot.lane.b32.xlu0 %v8789_v22, %s7929_s25 }
0x10d1   : > { %v4670_v55 = vpop.xlane.xlu0 %4669 }
0x10d2   : > { %v4680_v56 = vsub.f32 %v4524_v31, %v4670_v55 }
0x10d4   : > { %v4684_v62 = vmul.f32 1.442695, %v4680_v56 }
0x10d6   : > { %7465 = vpow2.f32 %v4684_v62 }
0x10d9   : > { %v4673_v58 = vpop.xlane.xlu1 %4672 }
0x10da   : > { %v4681_v25 = vsub.f32 %v4570_v21, %v4673_v58 }
0x10dc   : > { %v4686_v61 = vmul.f32 1.442695, %v4681_v25 }
0x10dd   : > { %v4217_v63 = vpop.permute.xlu1 %4216 }
0x10de   : > { %7467 = vpow2.f32 %v4686_v61  ;;  %v4232_v1 = vshrl.u32 %v4217_v63, 16 }
0x10e0   : > { %v8913_v54 = vpop.eup %7465 }
0x10e1   : > { %v4676_v2 = vpop.xlane.xlu0 %4675  ;;  %v4692_v15 = vsel %vm1908_vm2, %v8913_v54, 0.0  ;;  %v4219_v8 = vpop.permute.xlu1 %4218 }
0x10e2   : > { %v4682_v17 = vsub.f32 %v4616_v38, %v4676_v2  ;;  %4693 = vadd.xlane.f32.xlu1 %v4692_v15  ;;  %v4230_v43 = vpack.i.b16 %v4219_v8, %v4217_v63  ;;  %v4233_v44 = vshrl.u32 %v4219_v8, 16 }
0x10e4   : > { %v4688_v52 = vmul.f32 1.442695, %v4682_v17  ;;  %v4234_v59 = vpack.i.b16 %v4233_v44, %v4232_v1  ;;  %v4251_v24 = vcombine.high %v4230_v43, %v8493_v46  ;;  %v4258_v31 = vrot.slane %v4230_v43, %v8489_v42 }
0x10e6   : > { %7469 = vpow2.f32 %v4688_v52  ;;  %v4265_v19 = vrot.slane %v4251_v24, %v8489_v42  ;;  %v4317_v21 = vcombine.high %v4234_v59, %v8493_v46  ;;  %v4324_v38 = vrot.slane %v4234_v59, %v8489_v42 }
0x10e8   : > { %v8917_v0 = vpop.eup %7467  ;;  %v4331_v10 = vrot.slane %v4317_v21, %v8489_v42 }
0x10e9   : > { %v4679_v11 = vpop.xlane.xlu0 %4678  ;;  %v4695_v18 = vsel %vm1908_vm2, %v8917_v0, 0.0 }
0x10ea   : > { %v4683_v20 = vsub.f32 %v4662_v7, %v4679_v11  ;;  %4696 = vadd.xlane.f32.xlu0 %v4695_v18 }
0x10ec   : > { %v4690_v23 = vmul.f32 1.442695, %v4683_v20 }
0x10ed   : > { %v4215_v30 = vpop.permute.xlu0 %4214 }
0x10ee   : > { %7471 = vpow2.f32 %v4690_v23  ;;  %v4222_v5 = vpack.i.b16 %v4215_v30, %v8789_v22  ;;  %v4225_v50 = vshrl.u32 %v4215_v30, 16 }
0x10f0   : > { %v8924_v57 = vpop.eup %7469  ;;  %v4226_v33 = vpack.i.b16 %v4225_v50, %v4224_v4  ;;  %v4236_v35 = vcombine.high %v4222_v5, %v8493_v46  ;;  %v4243_v60 = vrot.slane %v4222_v5, %v8489_v42 }
0x10f1   : > { %v4698_v36 = vsel %vm1908_vm2, %v8924_v57, 0.0 }
0x10f2   : > { %v4250_v37 = vrot.slane %v4236_v35, %v8489_v42  ;;  %v4266_v22 = vcombine.low %v4243_v60, %v4258_v31  ;;  %v4267_v28 = vcombine.high %v4243_v60, %v4258_v31  ;;  %v4302_v29 = vcombine.high %v4226_v33, %v8493_v46  ;;  %4699 = vadd.xlane.f32.xlu0 %v4698_v36 }
0x10f3   : > { %v4309_v39 = vrot.slane %v4226_v33, %v8489_v42 }
0x10f4   : > { %v4274_v40 = vrot.slane %v4266_v22, %v8496_v53  ;;  %v4281_v41 = vrot.slane %v4267_v28, %v8496_v53  ;;  %v4282_v9 = vcombine.low %v4250_v37, %v4265_v19  ;;  %v4283_v7 = vcombine.high %v4250_v37, %v4265_v19 }
0x10f5   : > { %v4316_v26 = vrot.slane %v4302_v29, %v8489_v42  ;;  %v4332_v27 = vcombine.low %v4309_v39, %v4324_v38  ;;  %v4333_v51 = vcombine.high %v4309_v39, %v4324_v38 }
0x10f6   : > { %v4290_v55 = vrot.slane %v4282_v9, %v8496_v53  ;;  %v4297_v46 = vrot.slane %v4283_v7, %v8496_v53  ;;  %v4368_v56 = vcombine.low %v4274_v40, %v4281_v41  ;;  %v6651_v62 = vcombine.high %v4274_v40, %v4281_v41 }
0x10f7   : > { %v4340_v58 = vrot.slane %v4332_v27, %v8496_v53  ;;  %v4347_v25 = vrot.slane %v4333_v51, %v8496_v53  ;;  %v4348_v61 = vcombine.low %v4316_v26, %v4331_v10  ;;  %v4349_v63 = vcombine.high %v4316_v26, %v4331_v10 }
0x10f8   : > { %v8945_v2 = vpop.eup %7471  ;;  %v4375_v15 = vrot.slane %v4368_v56, %v8489_v42  ;;  %v4383_v17 = vrot.slane %v6651_v62, %v8489_v42  ;;  %v4384_v52 = vcombine.low %v4290_v55, %v4297_v46  ;;  %v6652_v8 = vcombine.high %v4290_v55, %v4297_v46 }
0x10f9   : > { %v4356_v43 = vrot.slane %v4348_v61, %v8496_v53  ;;  %v4363_v44 = vrot.slane %v4349_v63, %v8496_v53  ;;  %v4418_v11 = vcombine.low %v4340_v58, %v4347_v25  ;;  %v6653_v18 = vcombine.high %v4340_v58, %v4347_v25 }
0x10fa   : > { %v4391_v20 = vrot.slane %v4384_v52, %v8489_v42  ;;  %v4399_v1 = vrot.slane %v6652_v8, %v8489_v42  ;;  %v4701_v23 = vsel %vm1908_vm2, %v8945_v2, 0.0  ;;  %v4400_v59 = vcombine.low %v4375_v15, %v4383_v17 }
0x10fb   : > { %v4425_v24 = vrot.slane %v4418_v11, %v8489_v42  ;;  %v4433_v30 = vrot.slane %v6653_v18, %v8489_v42  ;;  %v4434_v4 = vcombine.low %v4356_v43, %v4363_v44  ;;  %v6654_v5 = vcombine.high %v4356_v43, %v4363_v44  ;;  %4702 = vadd.xlane.f32.xlu0 %v4701_v23  ;;  %v7381_v44 = vld [vmem:[#allocation13 + $0x40] sm:$0xff]   ;;  %v7382_v11 = vld [vmem:[#allocation13 + $0x48] sm:$0xff]   ;;  %v7384_v18 = vld [vmem:[#allocation13 + $0x58] sm:$0xff]  }
0x10fc   : > { %v4408_v50 = vcombine.low %v4391_v20, %v4399_v1  ;;  %v4407_v60 = vrot.slane %v4400_v59, %v8496_v53  ;;  %v7386_v20 = vld [vmem:[#allocation13 + $0x68] sm:$0xff]  }
0x10fd   : > { %v4441_v31 = vrot.slane %v4434_v4, %v8489_v42  ;;  %v4449_v33 = vrot.slane %v6654_v5, %v8489_v42  ;;  %v4450_v35 = vcombine.low %v4425_v24, %v4433_v30 }
0x10fe   : > { %v4415_v19 = vrot.slane %v4408_v50, %v8496_v53 }
0x10ff   : > { %v4458_v21 = vcombine.low %v4441_v31, %v4449_v33  ;;  %v4457_v22 = vrot.slane %v4450_v35, %v8496_v53 }
0x1100   : > { %v4416_v36 = vcombine.low %v4407_v60, %v4415_v19  ;;  %v4417_v37 = vcombine.high %v4407_v60, %v4415_v19 }
0x1101   : > { %v4465_v28 = vrot.slane %v4458_v21, %v8496_v53 }
0x1102   : > { %v4472_v39 = vshrl.u32 %v4416_v36, 16  ;;  %v4480_v40 = vshrl.u32 %v4417_v37, 16 }
0x1103   : > { %v4466_v29 = vcombine.low %v4457_v22, %v4465_v28  ;;  %v4467_v38 = vcombine.high %v4457_v22, %v4465_v28 }
0x1105   : > { %v4470_v41 = vpack.i.b16 %v4466_v29, %v4416_v36  ;;  %v4473_v9 = vshrl.u32 %v4466_v29, 16  ;;  %v4478_v7 = vpack.i.b16 %v4467_v38, %v4417_v37  ;;  %v4481_v10 = vshrl.u32 %v4467_v38, 16 }
0x1107   : > { %7075 = vmatpush3.bf16.msra.mxu0 %v4470_v41  ;;  %v4474_v26 = vpack.i.b16 %v4473_v9, %v4472_v39  ;;  %v4482_v27 = vpack.i.b16 %v4481_v10, %v4480_v40 }
0x1108   : > { %7086 = vmatprep.subr.bf16.mxu0 %v7925_v6 }
0x1109   : > { %7081 = vmatpush3.bf16.msra.mxu1 %v4474_v26 }
0x110a   : > { %7092 = vmatprep.subr.bf16.mxu1 %v7925_v6 }
0x116f   : > { %v4694_v51 = vpop.xlane.xlu1 %4693 }
0x1170   : > { %7473 = vrcp.f32 %v4694_v51 }
0x1177   : > { %v4697_v55 = vpop.xlane.xlu0 %4696 }
0x1178   : > { %7475 = vrcp.f32 %v4697_v55 }
0x117a   : > { %v7474_v46 = vpop.eup %7473 }
0x117b   : > { %v4708_v56 = vmul.f32 %v7474_v46, %v8913_v54 }
0x117d   : > { %v4712_v62 = vpack.c.bf16 %v4708_v56, %v4708_v56 }
0x117f   : > { %7077 = vmatmul.mubr.msk.bf16.vlgmr.msra.gmra.mrb[32].mxu0 %vm1908_vm2, %v4712_v62  ;;  %v4700_v58 = vpop.xlane.xlu0 %4699 }
0x1180   : > { %7087 = vmatpush3.bf16.msra.mxu0 %v4478_v7  ;;  %7477 = vrcp.f32 %v4700_v58  ;;  %7088 = vmatprep.mubr.msk.bf16.mxu0 %vm7926_vm0, %v7925_v6  ;;  %v7387_v7 = vld [vmem:[#allocation13 + $0x70] sm:$0xff]   ;;  %v7388_v58 = vld [vmem:[#allocation13 + $0x78] sm:$0xff]  }
0x1181   : > { %7098 = vmatprep.subr.bf16.mxu0 %v7925_v6 }
0x1182   : > { %v7476_v25 = vpop.eup %7475 }
0x1183   : > { %v4709_v61 = vmul.f32 %v7476_v25, %v8917_v0 }
0x1185   : > { %v4713_v63 = vpack.c.bf16 %v4709_v61, %v4709_v61 }
0x1187   : > { %7083 = vmatmul.mubr.msk.bf16.vlgmr.msra.gmra.mrb[60].mxu1 %vm1908_vm2, %v4713_v63 }
0x1188   : > { %7093 = vmatpush3.bf16.msra.mxu1 %v4482_v27  ;;  %v4703_v15 = vpop.xlane.xlu0 %4702  ;;  %7094 = vmatprep.mubr.msk.bf16.mxu1 %vm7926_vm0, %v7925_v6 }
0x1189   : > { %7479 = vrcp.f32 %v4703_v15 }
0x118a   : > { %v7478_v54 = vpop.eup %7477 }
0x118b   : > { %v4710_v17 = vmul.f32 %v7478_v54, %v8924_v57  ;;  %v7383_v57 = vld [vmem:[#allocation13 + $0x50] sm:$0xff]  }
0x118d   : > { %v4714_v52 = vpack.c.bf16 %v4710_v17, %v4710_v17 }
0x118f   : > { %7089 = vmatmul.mubr.msk.bf16.vlgmr.msra.gmra.mrb[36].mxu0 %vm1908_vm2, %v4714_v52 }
0x1190   : > { %7114 = vmatprep.mubr.msk.bf16.mxu0 %vm7926_vm0, %v7925_v6  ;;  %7099 = vmatpush3.bf16.msra.mxu0 %v7381_v44 }
0x1191   : > { %7100 = vmatprep.subr.bf16.mxu0 %v7925_v6 }
0x1193   : > { %v7480_v8 = vpop.eup %7479 }
0x1194   : > { %v4711_v0 = vmul.f32 %v7480_v8, %v8945_v2  ;;  %7101 = vmatpush3.bf16.msra.mxu0 %v7382_v11  ;;  %v7385_v2 = vld [vmem:[#allocation13 + $0x60] sm:$0xff]  }
0x1195   : > { %7102 = vmatprep.subr.bf16.mxu0 %v7925_v6 }
0x1196   : > { %v4715_v43 = vpack.c.bf16 %v4711_v0, %v4711_v0 }
0x1198   : > { %7095 = vmatmul.mubr.msk.bf16.vlgmr.msra.gmra.mrb[64].mxu1 %vm1908_vm2, %v4715_v43  ;;  %7103 = vmatpush3.bf16.msra.mxu0 %v7383_v57 }
0x1199   : > { %5639 = vmatprep.mubr.bf16.mxu1 %v7927_v32  ;;  %7104 = vmatprep.subr.bf16.mxu0 %v7925_v6 }
0x119c   : > { %7105 = vmatpush3.bf16.msra.mxu0 %v7384_v18 }
0x119d   : > { %7106 = vmatprep.subr.bf16.mxu0 %v7925_v6 }
0x11a0   : > { %7107 = vmatpush3.bf16.msra.mxu0 %v7385_v2 }
0x11a1   : > { %7108 = vmatprep.subr.bf16.mxu0 %v7925_v6 }
0x11a4   : > { %7109 = vmatpush3.bf16.msra.mxu0 %v7386_v20 }
0x11a5   : > { %7110 = vmatprep.subr.bf16.mxu0 %v7925_v6 }
0x11a8   : > { %7111 = vmatpush3.bf16.msra.mxu0 %v7387_v7 }
0x11a9   : > { %7112 = vmatprep.subr.bf16.mxu0 %v7925_v6 }
0x11ac   : > { %7113 = vmatpush3.bf16.msra.mxu0 %v7388_v58 }
0x1252   : > { %v4753_v1 = vpop.f32.mrb[32].mxu0 }
0x1253   : > { %v7078_v23 = vpop.f32.mrb[33].mxu0 }
0x1254   : > { %v4756_v59 = vpop.f32.mrb[34].mxu0 }
0x1255   : > { %v7079_v24 = vpop.f32.mrb[35].mxu0 }
0x125a   : > { %v4796_v30 = vpop.f32.mrb[60].mxu1 }
0x125b   : > { %v7084_v4 = vpop.f32.mrb[61].mxu1 }
0x125c   : > { %v4799_v5 = vpop.f32.mrb[62].mxu1 }
0x125d   : > { %v7085_v50 = vpop.f32.mrb[63].mxu1 }
0x1262   : > { %v4839_v31 = vpop.f32.mrb[36].mxu0 }
0x1263   : > { %v4888_v33 = vcombine.low %v4753_v1, %v4839_v31  ;;  %v4889_v35 = vcombine.high %v4753_v1, %v4839_v31  ;;  %v7090_v60 = vpop.f32.mrb[37].mxu0  ;;  %v6665_v31 = vld [vmem:[#allocation14 + $0x1] ss:$0 sm:$0xff] }
0x1264   : > { %v4842_v19 = vpop.f32.mrb[38].mxu0 }
0x1265   : > { %v7091_v21 = vpop.f32.mrb[39].mxu0  ;;  %v4896_v38 = vrot.slane %v4888_v33, %v8489_v42  ;;  %v4903_v39 = vrot.slane %v4889_v35, %v8489_v42 }
0x126b   : > { %v4882_v36 = vpop.f32.mrb[64].mxu1 }
0x126c   : > { %v4904_v37 = vcombine.low %v4796_v30, %v4882_v36  ;;  %v4905_v22 = vcombine.high %v4796_v30, %v4882_v36  ;;  %v7096_v28 = vpop.f32.mrb[65].mxu1 }
0x126d   : > { %v4885_v29 = vpop.f32.mrb[66].mxu1  ;;  %v5181_v28 = vld [vmem:[#allocation17 + $0x208] sm:$0xff] }
0x126e   : > { %v4912_v40 = vrot.slane %v4904_v37, %v8489_v42  ;;  %v4919_v41 = vrot.slane %v4905_v22, %v8489_v42  ;;  %v7097_v9 = vpop.f32.mrb[67].mxu1  ;;  %v5180_v37 = vld [vmem:[#allocation17 + $0x200] sm:$0xff] }
0x126f   : > { %v5184_v22 = vld [vmem:[#allocation17 + $0x220] sm:$0xff] }
0x1270   : > { %v4920_v10 = vcombine.low %v4896_v38, %v4912_v40  ;;  %v4921_v26 = vcombine.high %v4896_v38, %v4912_v40  ;;  %v4936_v27 = vcombine.low %v4903_v39, %v4919_v41  ;;  %v4937_v51 = vcombine.high %v4903_v39, %v4919_v41  ;;  %v5185_v39 = vld [vmem:[#allocation17 + $0x228] sm:$0xff]  ;;  %v5188_v40 = vld [vmem:[#allocation17 + $0x240] sm:$0xff] }
0x1271   : > { %v6677_v29 = vcombine.low %v5180_v37, %v5184_v22  ;;  %v6678_v38 = vcombine.high %v5180_v37, %v5184_v22  ;;  %v5192_v41 = vld [vmem:[#allocation17 + $0x260] sm:$0xff]  ;;  %v6679_v9 = vcombine.low %v5181_v28, %v5185_v39  ;;  %v6680_v7 = vcombine.high %v5181_v28, %v5185_v39  ;;  %v5233_v37 = vld [vmem:[#allocation17 + $0x3a8] sm:$0xff]  ;;  %v5182_v39 = vld [vmem:[#allocation17 + $0x210] sm:$0xff] }
0x1272   : > { %v4928_v55 = vrot.slane %v4920_v10, %v8496_v53  ;;  %v4935_v46 = vrot.slane %v4921_v26, %v8496_v53  ;;  %v4944_v56 = vrot.slane %v4936_v27, %v8496_v53  ;;  %v4951_v62 = vrot.slane %v4937_v51, %v8496_v53  ;;  %v5189_v26 = vld [vmem:[#allocation17 + $0x248] sm:$0xff]  ;;  %v5196_v51 = vld [vmem:[#allocation17 + $0x280] sm:$0xff] }
0x1273   : > { %v6686_v10 = vcombine.high %v5188_v40, %v5192_v41  ;;  %v5193_v27 = vld [vmem:[#allocation17 + $0x268] sm:$0xff]  ;;  %5607 = vmatprep.subr.bf16.mxu1 %v6678_v38  ;;  %5648 = vmatprep.subr.bf16.mxu0 %v6680_v7  ;;  %v5236_v38 = vld [vmem:[#allocation17 + $0x3c0] sm:$0xff] }
0x1274   : > { %v4956_v25 = vcombine.low %v4928_v55, %v4935_v46  ;;  %v6663_v61 = vcombine.high %v4928_v55, %v4935_v46  ;;  %v4972_v63 = vcombine.low %v4944_v56, %v4951_v62  ;;  %v6664_v15 = vcombine.high %v4944_v56, %v4951_v62  ;;  %v5200_v55 = vld [vmem:[#allocation17 + $0x2a0] sm:$0xff]  ;;  %v5197_v46 = vld [vmem:[#allocation17 + $0x288] sm:$0xff]  ;;  %5608 = vmatpush1.bf16.msra.mxu1 %v6677_v29 }
0x1275   : > { %v5201_v56 = vld [vmem:[#allocation17 + $0x2a8] sm:$0xff]  ;;  %v6685_v62 = vcombine.low %v5188_v40, %v5192_v41  ;;  %5609 = vmatprep.subr.bf16.mxu1 %v6686_v10  ;;  %v6687_v58 = vcombine.low %v5189_v26, %v5193_v27  ;;  %v5186_v40 = vld [vmem:[#allocation17 + $0x230] sm:$0xff]  ;;  %v5183_v10 = vld [vmem:[#allocation17 + $0x218] sm:$0xff] }
0x1276   : > { %v4963_v54 = vrot.slane %v4956_v25, %v8489_v42  ;;  %v4971_v17 = vrot.slane %v6663_v61, %v8489_v42  ;;  %v4979_v52 = vrot.slane %v4972_v63, %v8489_v42  ;;  %v4987_v8 = vrot.slane %v6664_v15, %v8489_v42 }
0x1277   : > { %v6694_v25 = vcombine.high %v5196_v51, %v5200_v55  ;;  %v6696_v61 = vcombine.high %v5197_v46, %v5201_v56  ;;  %v6693_v63 = vcombine.low %v5196_v51, %v5200_v55  ;;  %v6695_v15 = vcombine.low %v5197_v46, %v5201_v56  ;;  %v5241_v51 = vld [vmem:[#allocation17 + $0x3e8] sm:$0xff] }
0x1278   : > { %v4989_v0 = vcombine.high %v4963_v54, %v4971_v17  ;;  %v5005_v43 = vcombine.high %v4979_v52, %v4987_v8  ;;  %v4988_v44 = vcombine.low %v4963_v54, %v4971_v17  ;;  %v5004_v11 = vcombine.low %v4979_v52, %v4987_v8  ;;  %5610 = vmatpush1.bf16.msra.mxu1 %v6685_v62 }
0x1279   : > { %5611 = vmatprep.subr.bf16.mxu1 %v6694_v25  ;;  %v6681_v7 = vcombine.low %v5182_v39, %v5186_v40 }
0x127a   : > { %v5003_v6 = vrot.slane %v4989_v0, %v8496_v53  ;;  %v5019_v57 = vrot.slane %v5005_v43, %v8496_v53  ;;  %v4996_v18 = vrot.slane %v4988_v44, %v8496_v53  ;;  %v5012_v2 = vrot.slane %v5004_v11, %v8496_v53  ;;  %v5204_v0 = vld [vmem:[#allocation17 + $0x2c0] sm:$0xff]  ;;  %v5205_v44 = vld [vmem:[#allocation17 + $0x2c8] sm:$0xff] }
0x127b   : > { %v5208_v43 = vld [vmem:[#allocation17 + $0x2e0] sm:$0xff] }
0x127c   : > { %v5022_v20 = vcombine.low %v5003_v6, %v5019_v57  ;;  %v5021_v1 = vcombine.high %v4996_v18, %v5012_v2  ;;  %v5023_v23 = vcombine.high %v5003_v6, %v5019_v57  ;;  %v5020_v59 = vcombine.low %v4996_v18, %v5012_v2  ;;  %5612 = vmatpush1.bf16.msra.mxu1 %v6693_v63  ;;  %v5209_v6 = vld [vmem:[#allocation17 + $0x2e8] sm:$0xff] }
0x127d   : > { %v6702_v11 = vcombine.high %v5204_v0, %v5208_v43  ;;  %v6701_v57 = vcombine.low %v5204_v0, %v5208_v43  ;;  %v6703_v18 = vcombine.low %v5205_v44, %v5209_v6  ;;  %v6704_v2 = vcombine.high %v5205_v44, %v5209_v6  ;;  %v6674_v0 = vld [vmem:[#allocation16 + $0x2] ss:$0 sm:$0xff]  ;;  %v6675_v44 = vld [vmem:[#allocation16 + $0x3] ss:$0 sm:$0xff]  ;;  %v5190_v6 = vld [vmem:[#allocation17 + $0x250] sm:$0xff] }
0x127e   : > { %5029 = vrot.lane.b32.xlu0 %v5022_v20, %s7928_s1  ;;  %5025 = vrot.lane.b32.xlu1 %v5021_v1, %s7930_s5  ;;  %v5212_v20 = vld [vmem:[#allocation17 + $0x300] sm:$0xff]  ;;  %s6248_s1 = sshll.u32 %s679_s11, 4  ;;  %s9090_s1 = int_to_ptr.vmem [resolvable:$true] %s6248_s1 }
0x127f   : > { %5613 = vmatprep.subr.bf16.mxu1 %v6702_v11  ;;  %v5216_v1 = vld [vmem:[#allocation17 + $0x320] sm:$0xff]  ;;  %s7813_s16 = scalar_lea.vmem %s9090_s1, 128  ;;  %p7820_p11 = scmp.lt.s32.totalorder %s9090_s1, %s7818_s17 }
0x1280   : > { %5614 = vmatpush1.bf16.msra.mxu1 %v6701_v57  ;;  %v5194_v57 = vld [vmem:[#allocation17 + $0x270] sm:$0xff]  ;;  %p7814_p5 = scmp.ne.s32.totalorder %s9090_s1, %s7813_s16  ;;  %p7821_p3 = scmp.lt.s32.totalorder %s7819_s2, %s7813_s16 }
0x1282   : > { %5033 = vrot.lane.b32.xlu1 %v5023_v23, %s7929_s25  ;;  %v5213_v23 = vld [vmem:[#allocation17 + $0x308] sm:$0xff]  ;;  %p7815_p9 = pnand %p7814_p5, %p9217_p7  ;;  %p7822_p12 = por %p7821_p3, %p7820_p11 }
0x1284   : > { %p7816_p8 = pneg %p7815_p9 }
0x1286   : > { %p7823_p1 = pnand %p7822_p12, %p7816_p8 }
0x12f0   : > { %v5026_v42 = vpop.permute.xlu1 %5025  ;;  %v5030_v24 = vpop.permute.xlu0 %5029 }
0x12f1   : > { %v5036_v30 = vsel %vm1723_vm1, %v5020_v59, %v5026_v42  ;;  %v6709_v59 = vcombine.low %v5212_v20, %v5216_v1  ;;  %v6710_v42 = vcombine.high %v5212_v20, %v5216_v1 }
0x12f2   : > { %v5037_v5 = vsel %vm2278_vm3, %v5036_v30, %v5030_v24  ;;  %v5217_v24 = vld [vmem:[#allocation17 + $0x328] sm:$0xff]  ;;  %v5220_v30 = vld [vmem:[#allocation17 + $0x340] sm:$0xff] }
0x12f3   : > { %5615 = vmatprep.subr.bf16.mxu1 %v6710_v42  ;;  %v5198_v42 = vld [vmem:[#allocation17 + $0x290] sm:$0xff] }
0x12f4   : > { %v5034_v4 = vpop.permute.xlu1 %5033  ;;  %5616 = vmatpush1.bf16.msra.mxu1 %v6709_v59 }
0x12f5   : > { %v5038_v50 = vsel %vm2280_vm4, %v5037_v5, %v5034_v4  ;;  %v5224_v4 = vld [vmem:[#allocation17 + $0x360] sm:$0xff]  ;;  %v6711_v5 = vcombine.low %v5213_v23, %v5217_v24 }
0x12f6   : > { %v5039_v53 = vpack.c.bf16 %v5038_v50, %v5038_v50  ;;  %v6712_v50 = vcombine.high %v5213_v23, %v5217_v24  ;;  %v6717_v22 = vcombine.low %v5220_v30, %v5224_v4  ;;  %v6690_v23 = vcombine.high %v5190_v6, %v5194_v57  ;;  %v5202_v24 = vld [vmem:[#allocation17 + $0x2b0] sm:$0xff] }
0x12f8   : > { %7115 = vmatmul.mubr.bf16.vlgmr.msra.gmra.mrb[40].mxu0 %v5039_v53  ;;  %v6718_v53 = vcombine.high %v5220_v30, %v5224_v4  ;;  %v5199_v30 = vld [vmem:[#allocation17 + $0x298] sm:$0xff] }
0x12f9   : > { %5680 = vmatprep.mubr.bf16.mxu0 %v7927_v32  ;;  %5649 = vmatpush1.bf16.msra.mxu0 %v6679_v9  ;;  %v5240_v9 = vld [vmem:[#allocation17 + $0x3e0] sm:$0xff]  ;;  %v5203_v4 = vld [vmem:[#allocation17 + $0x2b8] sm:$0xff] }
0x12fa   : > { %5617 = vmatprep.subr.bf16.mxu1 %v6718_v53  ;;  %v6734_v56 = vcombine.high %v5236_v38, %v5240_v9  ;;  %v6700_v53 = vcombine.high %v5199_v30, %v5203_v4 }
0x12fb   : > { %5618 = vmatpush1.bf16.msra.mxu1 %v6717_v22 }
0x13cb   : > { %v5147_v33 = vpop.f32.mrb[40].mxu0 }
0x13cc   : > { %v5148_v35 = vadd.f32 %v6665_v31, %v5147_v33  ;;  %v7116_v60 = vpop.f32.mrb[41].mxu0  ;;  %v5221_v31 = vld [vmem:[#allocation17 + $0x348] sm:$0xff] }
0x13cd   : > { %v5150_v19 = vpop.f32.mrb[42].mxu0  ;;  %v5225_v33 = vld [vmem:[#allocation17 + $0x368] sm:$0xff] }
0x13ce   : > { %v9012_v21 = vadd.f32 %v5148_v35, %v8828_v34  ;;  %v7117_v36 = vpop.f32.mrb[43].mxu0  ;;  %v6688_v34 = vcombine.high %v5189_v26, %v5193_v27  ;;  %v5228_v35 = vld [vmem:[#allocation17 + $0x380] sm:$0xff]  ;;  %v6720_v60 = vcombine.high %v5221_v31, %v5225_v33  ;;  %v6719_v28 = vcombine.low %v5221_v31, %v5225_v33  ;;  %v5187_v26 = vld [vmem:[#allocation17 + $0x238] sm:$0xff]  ;;  %v5237_v27 = vld [vmem:[#allocation17 + $0x3c8] sm:$0xff] }
0x13cf   : > { %v5232_v19 = vld [vmem:[#allocation17 + $0x3a0] sm:$0xff]  ;;  %v5229_v36 = vld [vmem:[#allocation17 + $0x388] sm:$0xff]  ;;  %v6736_v62 = vcombine.high %v5237_v27, %v5241_v51  ;;  %v6735_v25 = vcombine.low %v5237_v27, %v5241_v51  ;;  %v6684_v63 = vcombine.high %v5183_v10, %v5187_v26  ;;  %v5206_v31 = vld [vmem:[#allocation17 + $0x2d0] sm:$0xff] }
0x13d0   : > { %5157 = vadd.xlane.f32.xlu1 %v9012_v21  ;;  %5650 = vmatprep.subr.bf16.mxu0 %v6688_v34  ;;  %v6726_v29 = vcombine.high %v5228_v35, %v5232_v19  ;;  %v6728_v41 = vcombine.high %v5229_v36, %v5233_v37  ;;  %v6683_v34 = vcombine.low %v5183_v10, %v5187_v26  ;;  %v5210_v33 = vld [vmem:[#allocation17 + $0x2f0] sm:$0xff]  ;;  %v5223_v26 = vld [vmem:[#allocation17 + $0x358] sm:$0xff] }
0x13d1   : > { %5651 = vmatpush1.bf16.msra.mxu0 %v6687_v58  ;;  %v6725_v55 = vcombine.low %v5228_v35, %v5232_v19  ;;  %v6727_v46 = vcombine.low %v5229_v36, %v5233_v37  ;;  %v6733_v58 = vcombine.low %v5236_v38, %v5240_v9  ;;  %v5207_v35 = vld [vmem:[#allocation17 + $0x2d8] sm:$0xff]  ;;  %v6697_v19 = vcombine.low %v5198_v42, %v5202_v24  ;;  %v5226_v10 = vld [vmem:[#allocation17 + $0x370] sm:$0xff] }
0x13d2   : > { %5652 = vmatprep.subr.bf16.mxu0 %v6696_v61  ;;  %5619 = vmatprep.subr.bf16.mxu1 %v6726_v29  ;;  %v6682_v61 = vcombine.high %v5182_v39, %v5186_v40  ;;  %v6699_v36 = vcombine.low %v5199_v30, %v5203_v4  ;;  %v6706_v37 = vcombine.high %v5206_v31, %v5210_v33  ;;  %v5218_v29 = vld [vmem:[#allocation17 + $0x330] sm:$0xff]  ;;  %v5215_v38 = vld [vmem:[#allocation17 + $0x318] sm:$0xff] }
0x13d3   : > { %5620 = vmatpush1.bf16.msra.mxu1 %v6725_v55  ;;  %v5219_v39 = vld [vmem:[#allocation17 + $0x338] sm:$0xff]  ;;  %v6705_v40 = vcombine.low %v5206_v31, %v5210_v33 }
0x13d4   : > { %5621 = vmatprep.subr.bf16.mxu1 %v6734_v56  ;;  %v5227_v27 = vld [vmem:[#allocation17 + $0x378] sm:$0xff]  ;;  %v5230_v56 = vld [vmem:[#allocation17 + $0x390] sm:$0xff] }
0x13d5   : > { %5653 = vmatpush1.bf16.msra.mxu0 %v6695_v15 }
0x13d6   : > { %5654 = vmatprep.subr.bf16.mxu0 %v6704_v2  ;;  %v5195_v2 = vld [vmem:[#allocation17 + $0x278] sm:$0xff] }
0x13d7   : > { %5622 = vmatpush1.bf16.msra.mxu1 %v6733_v58  ;;  %v5231_v58 = vld [vmem:[#allocation17 + $0x398] sm:$0xff] }
0x13d8   : > { %5689 = vmatprep.subr.bf16.mxu1 %v6682_v61 }
0x13d9   : > { %5655 = vmatpush1.bf16.msra.mxu0 %v6703_v18  ;;  %v5191_v18 = vld [vmem:[#allocation17 + $0x258] sm:$0xff] }
0x13da   : > { %5656 = vmatprep.subr.bf16.mxu0 %v6712_v50  ;;  %v6692_v59 = vcombine.high %v5191_v18, %v5195_v2  ;;  %v6698_v50 = vcombine.high %v5198_v42, %v5202_v24 }
0x13dd   : > { %5657 = vmatpush1.bf16.msra.mxu0 %v6711_v5  ;;  %v6691_v5 = vcombine.low %v5191_v18, %v5195_v2 }
0x13de   : > { %5658 = vmatprep.subr.bf16.mxu0 %v6720_v60  ;;  %v5211_v60 = vld [vmem:[#allocation17 + $0x2f8] sm:$0xff] }
0x13df   : > { %v6708_v22 = vcombine.high %v5207_v35, %v5211_v60 }
0x13e1   : > { %5659 = vmatpush1.bf16.msra.mxu0 %v6719_v28  ;;  %v5214_v28 = vld [vmem:[#allocation17 + $0x310] sm:$0xff] }
0x13e2   : > { %5660 = vmatprep.subr.bf16.mxu0 %v6728_v41  ;;  %v6707_v41 = vcombine.low %v5207_v35, %v5211_v60  ;;  %v6714_v9 = vcombine.high %v5214_v28, %v5218_v29  ;;  %v6713_v51 = vcombine.low %v5214_v28, %v5218_v29 }
0x13e5   : > { %5661 = vmatpush1.bf16.msra.mxu0 %v6727_v46  ;;  %v6724_v46 = vcombine.high %v5223_v26, %v5227_v27 }
0x13e6   : > { %5662 = vmatprep.subr.bf16.mxu0 %v6736_v62  ;;  %v5234_v62 = vld [vmem:[#allocation17 + $0x3b0] sm:$0xff] }
0x13e9   : > { %5663 = vmatpush1.bf16.msra.mxu0 %v6735_v25  ;;  %v5235_v25 = vld [vmem:[#allocation17 + $0x3b8] sm:$0xff] }
0x13ea   : > { %5730 = vmatprep.subr.bf16.mxu0 %v6684_v63  ;;  %v6723_v63 = vcombine.low %v5223_v26, %v5227_v27 }
0x145d   : > { %v5158_v54 = vpop.xlane.xlu1 %5157 }
0x145e   : > { %v5159_v17 = vmul.f32 0.0078125, %v5158_v54 }
0x1460   : > { %v9016_v52 = vsub.f32 %v9012_v21, %v5159_v17 }
0x1462   : > { %v5161_v8 = vmul.f32 %v9016_v52, %v9016_v52 }
0x1464   : > { %5162 = vadd.xlane.f32.xlu0 %v5161_v8 }
0x14f1   : > { %v5163_v15 = vpop.xlane.xlu0 %5162 }
0x14f2   : > { %v5164_v54 = vmul.f32 0.0078125, %v5163_v15  ;;  %v6730_v15 = vcombine.high %v5230_v56, %v5234_v62 }
0x14f4   : > { %v5165_v17 = vadd.f32 1e-05, %v5164_v54  ;;  %v6732_v54 = vcombine.high %v5231_v58, %v5235_v25 }
0x14f6   : > { %7481 = vrsqrt.f32 %v5165_v17  ;;  %v5238_v17 = vld [vmem:[#allocation17 + $0x3d0] sm:$0xff] }
0x1500   : > { %v7482_v8 = vpop.eup %7481 }
0x1501   : > { %v5167_v43 = vmul.f32 %v7482_v8, %v9016_v52  ;;  %v6689_v52 = vcombine.low %v5190_v6, %v5194_v57  ;;  %v5242_v8 = vld [vmem:[#allocation17 + $0x3f0] sm:$0xff] }
0x1502   : > { %v6738_v6 = vcombine.high %v5238_v17, %v5242_v8  ;;  %v6737_v18 = vcombine.low %v5238_v17, %v5242_v8 }
0x1503   : > { %v5172_v11 = vmul.f32 %v6674_v0, %v5167_v43  ;;  %v5239_v0 = vld [vmem:[#allocation17 + $0x3d8] sm:$0xff] }
0x1504   : > { %v5243_v43 = vld [vmem:[#allocation17 + $0x3f8] sm:$0xff] }
0x1505   : > { %v5177_v20 = vadd.f32 %v6675_v44, %v5172_v11  ;;  %v6729_v44 = vcombine.low %v5230_v56, %v5234_v62  ;;  %v6731_v11 = vcombine.low %v5231_v58, %v5235_v25  ;;  %v6740_v57 = vcombine.high %v5239_v0, %v5243_v43 }
0x1506   : > { %v6739_v2 = vcombine.low %v5239_v0, %v5243_v43 }
0x1507   : > { %v9021_v1 = vpack.c.bf16 %v5177_v20, %v5177_v20  ;;  %v6676_v20 = vld [vmem:[%s9213_s28 + $0x8] sm:$0xff] }
0x1508   : > { %v5254_v42 = vrot.slane %v6676_v20, %v8470_v14  ;;  %v5262_v24 = vrot.slane %v6676_v20, %v8721_v12  ;;  %v5266_v27 = vrot.slane %v6676_v20, %v2503_v45 }
0x1509   : > { %5640 = vmatmul.mubr.bf16.vlgmr.msra.gmra.mrb[68].mxu1 %v9021_v1  ;;  %5681 = vmatmul.mubr.bf16.vlgmr.msra.gmra.mrb[44].mxu0 %v9021_v1 }
0x150a   : > { %5690 = vmatpush1.bf16.msra.mxu1 %v6681_v7  ;;  %5731 = vmatpush1.bf16.msra.mxu0 %v6683_v34  ;;  %v5222_v7 = vld [vmem:[#allocation17 + $0x350] sm:$0xff]  ;;  %v6715_v34 = vcombine.low %v5215_v38, %v5219_v39 }
0x150b   : > { %5691 = vmatprep.subr.bf16.mxu1 %v6690_v23  ;;  %5732 = vmatprep.subr.bf16.mxu0 %v6692_v59  ;;  %v6722_v55 = vcombine.high %v5222_v7, %v5226_v10  ;;  %v6721_v61 = vcombine.low %v5222_v7, %v5226_v10  ;;  %v5250_v23 = vrot.slane %v6676_v20, %v8473_v16 }
0x150c   : > { %5721 = vmatprep.mubr.bf16.mxu1 %v7927_v32  ;;  %5762 = vmatprep.mubr.bf16.mxu0 %v7927_v32  ;;  %v6716_v32 = vcombine.high %v5215_v38, %v5219_v39  ;;  %v5258_v59 = vrot.slane %v6676_v20, %v8715_v3 }
0x150e   : > { %5692 = vmatpush1.bf16.msra.mxu1 %v6689_v52  ;;  %5733 = vmatpush1.bf16.msra.mxu0 %v6691_v5 }
0x150f   : > { %5693 = vmatprep.subr.bf16.mxu1 %v6698_v50  ;;  %5734 = vmatprep.subr.bf16.mxu0 %v6700_v53 }
0x1512   : > { %5694 = vmatpush1.bf16.msra.mxu1 %v6697_v19  ;;  %5735 = vmatpush1.bf16.msra.mxu0 %v6699_v36 }
0x1513   : > { %5695 = vmatprep.subr.bf16.mxu1 %v6706_v37  ;;  %5736 = vmatprep.subr.bf16.mxu0 %v6708_v22 }
0x1516   : > { %5696 = vmatpush1.bf16.msra.mxu1 %v6705_v40  ;;  %5737 = vmatpush1.bf16.msra.mxu0 %v6707_v41 }
0x1517   : > { %5697 = vmatprep.subr.bf16.mxu1 %v6714_v9  ;;  %5738 = vmatprep.subr.bf16.mxu0 %v6716_v32 }
0x151a   : > { %5698 = vmatpush1.bf16.msra.mxu1 %v6713_v51  ;;  %5739 = vmatpush1.bf16.msra.mxu0 %v6715_v34  ;;  %v5274_v51 = vrot.slane %v6676_v20, %v2511_v47 }
0x151b   : > { %5699 = vmatprep.subr.bf16.mxu1 %v6722_v55  ;;  %5740 = vmatprep.subr.bf16.mxu0 %v6724_v46  ;;  %v5270_v55 = vrot.slane %v6676_v20, %v2507_v48  ;;  %v5278_v46 = vrot.slane %v6676_v20, %v2515_v49 }
0x151e   : > { %5700 = vmatpush1.bf16.msra.mxu1 %v6721_v61  ;;  %5741 = vmatpush1.bf16.msra.mxu0 %v6723_v63 }
0x151f   : > { %5701 = vmatprep.subr.bf16.mxu1 %v6730_v15  ;;  %5742 = vmatprep.subr.bf16.mxu0 %v6732_v54 }
0x1522   : > { %5702 = vmatpush1.bf16.msra.mxu1 %v6729_v44  ;;  %5743 = vmatpush1.bf16.msra.mxu0 %v6731_v11 }
0x1523   : > { %5703 = vmatprep.subr.bf16.mxu1 %v6738_v6  ;;  %5744 = vmatprep.subr.bf16.mxu0 %v6740_v57 }
0x1526   : > { %5704 = vmatpush1.bf16.msra.mxu1 %v6737_v18  ;;  %5745 = vmatpush1.bf16.msra.mxu0 %v6739_v2 }
0x1529   : > { %5722 = vmatmul.mubr.bf16.vlgmr.msra.gmra.mrb[72].mxu1 %v9021_v1  ;;  %5763 = vmatmul.mubr.bf16.vlgmr.msra.gmra.mrb[48].mxu0 %v9021_v1 }
0x15dc   : > { %v5641_v30 = vpop.f32.mrb[68].mxu1  ;;  %v5682_v4 = vpop.f32.mrb[44].mxu0 }
0x15dd   : > { %v5642_v52 = vadd.f32 %v5641_v30, %v5250_v23  ;;  %v5683_v5 = vadd.f32 %v5682_v4, %v5258_v59  ;;  %v5643_v50 = vpop.f32.mrb[69].mxu1  ;;  %v5684_v53 = vpop.f32.mrb[45].mxu0  ;;  %v7389_v23 = vld [vmem:[#allocation19 + $0x140] sm:$0xff]   ;;  %v7393_v30 = vld [vmem:[#allocation19 + $0x148] sm:$0xff]  }
0x15de   : > { %v5644_v31 = vadd.f32 %v5643_v50, %v5254_v42  ;;  %v5685_v1 = vadd.f32 %v5684_v53, %v5262_v24  ;;  %v5645_v33 = vpop.f32.mrb[70].mxu1  ;;  %v5686_v35 = vpop.f32.mrb[46].mxu0  ;;  %v7390_v59 = vld [vmem:[#allocation19 + $0x1c0] sm:$0xff]   ;;  %v7394_v4 = vld [vmem:[#allocation19 + $0x1c8] sm:$0xff]   ;;  %6898 = vmatprep.subr.bf16.mxu1 %v7389_v23 }
0x15df   : > { %v6741_v60 = vmul.f32 -1.442695, %v5642_v52  ;;  %v6743_v19 = vmul.f32 -1.442695, %v5683_v5  ;;  %v5646_v36 = vpop.f32.mrb[71].mxu1  ;;  %v5687_v37 = vpop.f32.mrb[47].mxu0  ;;  %6920 = vmatprep.subr.bf16.mxu0 %v7390_v59 }
0x15e0   : > { %v6742_v22 = vmul.f32 -1.442695, %v5644_v31  ;;  %v6744_v28 = vmul.f32 -1.442695, %v5685_v1  ;;  %v7391_v42 = vld [vmem:[#allocation19 + $0x100] sm:$0xff]  }
0x15e1   : > { %7483 = vpow2.f32 %v6741_v60  ;;  %v7392_v24 = vld [vmem:[#allocation19 + $0x180] sm:$0xff]   ;;  %6899 = vmatpush3.bf16.msra.mxu1 %v7391_v42 }
0x15e2   : > { %7485 = vpow2.f32 %v6743_v19  ;;  %6921 = vmatpush3.bf16.msra.mxu0 %v7392_v24  ;;  %6900 = vmatprep.subr.bf16.mxu1 %v7393_v30 }
0x15e3   : > { %7487 = vpow2.f32 %v6742_v22  ;;  %6922 = vmatprep.subr.bf16.mxu0 %v7394_v4 }
0x15e4   : > { %7489 = vpow2.f32 %v6744_v28 }
0x15eb   : > { %v7484_v29 = vpop.eup %7483 }
0x15ec   : > { %v7486_v38 = vpop.eup %7485  ;;  %v5783_v39 = vadd.f32 1.0, %v7484_v29 }
0x15ed   : > { %v7488_v40 = vpop.eup %7487  ;;  %v5785_v41 = vadd.f32 1.0, %v7486_v38  ;;  %v7397_v38 = vld [vmem:[#allocation19 + $0x150] sm:$0xff]  }
0x15ee   : > { %v7490_v9 = vpop.eup %7489  ;;  %7491 = vrcp.f32 %v5783_v39  ;;  %v5784_v32 = vadd.f32 1.0, %v7488_v40  ;;  %v7398_v39 = vld [vmem:[#allocation19 + $0x1d0] sm:$0xff]  }
0x15ef   : > { %7493 = vrcp.f32 %v5785_v41  ;;  %v5786_v7 = vadd.f32 1.0, %v7490_v9  ;;  %v7399_v40 = vld [vmem:[#allocation19 + $0x110] sm:$0xff]   ;;  %v7401_v9 = vld [vmem:[#allocation19 + $0x158] sm:$0xff]  }
0x15f0   : > { %7495 = vrcp.f32 %v5784_v32  ;;  %v7400_v41 = vld [vmem:[#allocation19 + $0x190] sm:$0xff]   ;;  %v7402_v32 = vld [vmem:[#allocation19 + $0x1d8] sm:$0xff]  }
0x15f1   : > { %7497 = vrcp.f32 %v5786_v7  ;;  %v7403_v7 = vld [vmem:[#allocation19 + $0x118] sm:$0xff]  }
0x15f8   : > { %v7492_v10 = vpop.eup %7491 }
0x15f9   : > { %v7494_v26 = vpop.eup %7493  ;;  %v5795_v25 = vmul.f32 %v7492_v10, %v5642_v52  ;;  %v7395_v52 = vld [vmem:[#allocation19 + $0x108] sm:$0xff]   ;;  %v7404_v10 = vld [vmem:[#allocation19 + $0x198] sm:$0xff]  }
0x15fa   : > { %v7496_v34 = vpop.eup %7495  ;;  %v5797_v61 = vmul.f32 %v7494_v26, %v5683_v5  ;;  %v7396_v5 = vld [vmem:[#allocation19 + $0x188] sm:$0xff]   ;;  %6901 = vmatpush3.bf16.msra.mxu1 %v7395_v52  ;;  %v7405_v26 = vld [vmem:[#allocation19 + $0x160] sm:$0xff]  }
0x15fb   : > { %v7498_v56 = vpop.eup %7497  ;;  %v5796_v45 = vmul.f32 %v7496_v34, %v5644_v31  ;;  %6923 = vmatpush3.bf16.msra.mxu0 %v7396_v5  ;;  %6902 = vmatprep.subr.bf16.mxu1 %v7397_v38  ;;  %v7408_v34 = vld [vmem:[#allocation19 + $0x1a0] sm:$0xff]  }
0x15fc   : > { %v5723_v62 = vpop.f32.mrb[72].mxu1  ;;  %v5764_v58 = vpop.f32.mrb[48].mxu0  ;;  %v5798_v8 = vmul.f32 %v7498_v56, %v5685_v1  ;;  %6924 = vmatprep.subr.bf16.mxu0 %v7398_v39  ;;  %v7411_v56 = vld [vmem:[#allocation19 + $0x128] sm:$0xff]  }
0x15fd   : > { %v5724_v63 = vadd.f32 %v5723_v62, %v5266_v27  ;;  %v5765_v15 = vadd.f32 %v5764_v58, %v5274_v51  ;;  %v5725_v54 = vpop.f32.mrb[73].mxu1  ;;  %v5766_v17 = vpop.f32.mrb[49].mxu0  ;;  %v7406_v27 = vld [vmem:[#allocation19 + $0x1e0] sm:$0xff]   ;;  %v7412_v62 = vld [vmem:[#allocation19 + $0x1a8] sm:$0xff]   ;;  %v7413_v58 = vld [vmem:[#allocation19 + $0x170] sm:$0xff]  }
0x15fe   : > { %v5726_v0 = vadd.f32 %v5725_v54, %v5270_v55  ;;  %v5767_v47 = vadd.f32 %v5766_v17, %v5278_v46  ;;  %v5727_v43 = vpop.f32.mrb[74].mxu1  ;;  %v5768_v44 = vpop.f32.mrb[50].mxu0  ;;  %6903 = vmatpush3.bf16.msra.mxu1 %v7399_v40  ;;  %v7407_v51 = vld [vmem:[#allocation19 + $0x120] sm:$0xff]   ;;  %v7409_v55 = vld [vmem:[#allocation19 + $0x168] sm:$0xff]   ;;  %v7418_v54 = vld [vmem:[#allocation19 + $0x1f8] sm:$0xff]  }
0x15ff   : > { %v5799_v11 = vmul.f32 %v5795_v25, %v5724_v63  ;;  %v5801_v48 = vmul.f32 %v5797_v61, %v5765_v15  ;;  %v5728_v6 = vpop.f32.mrb[75].mxu1  ;;  %v5769_v13 = vpop.f32.mrb[51].mxu0  ;;  %6925 = vmatpush3.bf16.msra.mxu0 %v7400_v41  ;;  %6904 = vmatprep.subr.bf16.mxu1 %v7401_v9  ;;  %v7410_v46 = vld [vmem:[#allocation19 + $0x1e8] sm:$0xff]   ;;  %v7414_v25 = vld [vmem:[#allocation19 + $0x1f0] sm:$0xff]   ;;  %v7417_v15 = vld [vmem:[#allocation19 + $0x178] sm:$0xff]  }
0x1600   : > { %v5800_v49 = vmul.f32 %v5796_v45, %v5726_v0  ;;  %v5802_v57 = vmul.f32 %v5798_v8, %v5767_v47  ;;  %6926 = vmatprep.subr.bf16.mxu0 %v7402_v32  ;;  %v7415_v61 = vld [vmem:[#allocation19 + $0x130] sm:$0xff]   ;;  %v7419_v17 = vld [vmem:[#allocation19 + $0x138] sm:$0xff]   ;;  %v6745_v43 = vld [vmem:[%s9214_s3 + $0x8] ss:$2 sm:$0xf] }
0x1601   : > { %v7416_v63 = vld [vmem:[#allocation19 + $0x1b0] sm:$0xff]   ;;  %v7420_v45 = vld [vmem:[#allocation19 + $0x1b8] sm:$0xff]   ;;  %v6746_v44 = vld [vmem:[%s9214_s3 + $0x9] ss:$2 sm:$0xf]  ;;  %v5837_v6 = vrot.slane %v6745_v43, %v8473_v16  ;;  %v5845_v13 = vrot.slane %v6745_v43, %v8715_v3 }
0x1602   : > { %v5807_v18 = vadd.f32 %v5800_v49, %v5799_v11  ;;  %6905 = vmatpush3.bf16.msra.mxu1 %v7403_v7 }
0x1603   : > { %6927 = vmatpush3.bf16.msra.mxu0 %v7404_v10  ;;  %6906 = vmatprep.subr.bf16.mxu1 %v7405_v26 }
0x1604   : > { %v5808_v2 = vadd.f32 %v5807_v18, %v5801_v48  ;;  %6928 = vmatprep.subr.bf16.mxu0 %v7406_v27  ;;  %v5874_v18 = vrot.slane %v6746_v44, %v8721_v12 }
0x1606   : > { %v5809_v20 = vadd.f32 %v5808_v2, %v5802_v57  ;;  %6907 = vmatpush3.bf16.msra.mxu1 %v7407_v51  ;;  %v5862_v2 = vrot.slane %v6746_v44, %v8473_v16 }
0x1607   : > { %6929 = vmatpush3.bf16.msra.mxu0 %v7408_v34  ;;  %6908 = vmatprep.subr.bf16.mxu1 %v7409_v55 }
0x1608   : > { %5810 = vadd.xlane.f32.xlu0 %v5809_v20  ;;  %6930 = vmatprep.subr.bf16.mxu0 %v7410_v46  ;;  %v5870_v20 = vrot.slane %v6746_v44, %v8715_v3 }
0x160a   : > { %6909 = vmatpush3.bf16.msra.mxu1 %v7411_v56 }
0x160b   : > { %6931 = vmatpush3.bf16.msra.mxu0 %v7412_v62  ;;  %6910 = vmatprep.subr.bf16.mxu1 %v7413_v58 }
0x160c   : > { %6932 = vmatprep.subr.bf16.mxu0 %v7414_v25 }
0x160e   : > { %6911 = vmatpush3.bf16.msra.mxu1 %v7415_v61 }
0x160f   : > { %6933 = vmatpush3.bf16.msra.mxu0 %v7416_v63  ;;  %6912 = vmatprep.subr.bf16.mxu1 %v7417_v15 }
0x1610   : > { %6934 = vmatprep.subr.bf16.mxu0 %v7418_v54 }
0x1612   : > { %6913 = vmatpush3.bf16.msra.mxu1 %v7419_v17 }
0x1613   : > { %6935 = vmatpush3.bf16.msra.mxu0 %v7420_v45 }
0x1695   : > { %v5811_v50 = vpop.xlane.xlu0 %5810 }
0x1696   : > { %v5812_v53 = vmul.f32 0.001953125, %v5811_v50 }
0x1698   : > { %v9044_v31 = vsub.f32 %v5799_v11, %v5812_v53  ;;  %v9046_v1 = vsub.f32 %v5800_v49, %v5812_v53  ;;  %v9048_v33 = vsub.f32 %v5801_v48, %v5812_v53  ;;  %v9050_v35 = vsub.f32 %v5802_v57, %v5812_v53 }
0x1699   : > { %v5841_v11 = vrot.slane %v6745_v43, %v8470_v14  ;;  %v5849_v48 = vrot.slane %v6745_v43, %v8721_v12  ;;  %v5866_v57 = vrot.slane %v6746_v44, %v8470_v14 }
0x169a   : > { %v5817_v60 = vmul.f32 %v9044_v31, %v9044_v31  ;;  %v5818_v19 = vmul.f32 %v9046_v1, %v9046_v1  ;;  %v5819_v36 = vmul.f32 %v9048_v33, %v9048_v33  ;;  %v5820_v22 = vmul.f32 %v9050_v35, %v9050_v35 }
0x169c   : > { %v5821_v37 = vadd.f32 %v5818_v19, %v5817_v60 }
0x169e   : > { %v5822_v28 = vadd.f32 %v5821_v37, %v5819_v36 }
0x16a0   : > { %v5823_v29 = vadd.f32 %v5822_v28, %v5820_v22 }
0x16a2   : > { %5824 = vadd.xlane.f32.xlu1 %v5823_v29 }
0x172f   : > { %v5825_v8 = vpop.xlane.xlu1 %5824 }
0x1730   : > { %v5826_v0 = vmul.f32 0.001953125, %v5825_v8 }
0x1732   : > { %v5827_v47 = vadd.f32 1e-06, %v5826_v0 }
0x1734   : > { %7499 = vrsqrt.f32 %v5827_v47 }
0x173e   : > { %v7500_v49 = vpop.eup %7499 }
0x173f   : > { %v5830_v23 = vmul.f32 %v7500_v49, %v9046_v1  ;;  %v5832_v59 = vmul.f32 %v7500_v49, %v9050_v35  ;;  %v5829_v42 = vmul.f32 %v7500_v49, %v9044_v31  ;;  %v5831_v24 = vmul.f32 %v7500_v49, %v9048_v33  ;;  %v6748_v33 = vld [vmem:[%s9215_s30 + $0x1] ss:$0 sm:$0xff] }
0x1741   : > { %v5855_v30 = vmul.f32 %v5841_v11, %v5830_v23  ;;  %v5857_v4 = vmul.f32 %v5849_v48, %v5832_v59  ;;  %v5854_v52 = vmul.f32 %v5837_v6, %v5829_v42  ;;  %v5856_v5 = vmul.f32 %v5845_v13, %v5831_v24 }
0x1743   : > { %v5880_v50 = vadd.f32 %v5866_v57, %v5855_v30  ;;  %v5882_v14 = vadd.f32 %v5874_v18, %v5857_v4  ;;  %v5879_v53 = vadd.f32 %v5862_v2, %v5854_v52  ;;  %v5881_v12 = vadd.f32 %v5870_v20, %v5856_v5 }
0x1745   : > { %v5884_v60 = vpack.c.bf16 %v5880_v50, %v5880_v50  ;;  %v5886_v16 = vpack.c.bf16 %v5882_v14, %v5882_v14  ;;  %v5883_v19 = vpack.c.bf16 %v5879_v53, %v5879_v53  ;;  %v5885_v3 = vpack.c.bf16 %v5881_v12, %v5881_v12 }
0x1747   : > { %6184 = vmatprep.mubr.bf16.mxu1 %v5884_v60  ;;  %6224 = vmatprep.mubr.bf16.mxu0 %v5886_v16 }
0x1748   : > { %6185 = vmatmul.mubr.bf16.vlgmr.msra.gmra.mrb[76].mxu1 %v5883_v19  ;;  %6225 = vmatmul.mubr.bf16.vlgmr.msra.gmra.mrb[52].mxu0 %v5885_v3 }
0x181b   : > { %v6914_v31 = vpop.f32.mrb[76].mxu1  ;;  %v6936_v1 = vpop.f32.mrb[52].mxu0 }
0x181c   : > { %v6915_v35 = vpop.f32.mrb[77].mxu1  ;;  %v6937_v36 = vpop.f32.mrb[53].mxu0 }
0x181d   : > { %v6916_v37 = vadd.f32 %v6915_v35, %v6914_v31  ;;  %v6938_v22 = vadd.f32 %v6937_v36, %v6936_v1  ;;  %v6917_v28 = vpop.f32.mrb[78].mxu1  ;;  %v6939_v29 = vpop.f32.mrb[54].mxu0 }
0x181e   : > { %v6918_v38 = vpop.f32.mrb[79].mxu1  ;;  %v6940_v39 = vpop.f32.mrb[55].mxu0 }
0x181f   : > { %v6187_v40 = vadd.f32 %v6916_v37, %v6748_v33 }
0x1821   : > { %v6227_v41 = vadd.f32 %v6938_v22, %v6187_v40 }
0x1823   : > { %v6232_v9 = vadd.f32 %v6227_v41, %v9012_v21 }
0x1825   : > { %6233 = vst [vmem:[%s679_s11] sm:$0xff] %v6232_v9 }
0x1826   : > { %7826 = shalt.err (!%p7823_p1)
}
0x1827   : > { %s7827_s29 = scalar_lea.hbm %s9088_s27, 128  ;;  %s7831_s25 = scalar_lea.hbm %s9216_s0, 256 }
0x1828   : > { %p7828_p13 = scmp.ne.s32.totalorder %s9088_s27, %s7827_s29  ;;  %p7832_p2 = scmp.lt.u32.totalorder %s9088_s27, %s9216_s0 }
0x1829   : > { %p7833_p4 = scmp.lt.u32.totalorder %s7831_s25, %s7827_s29  ;;  %p7835_p5 = scmp.lt.u32.totalorder %s7827_s29, %s9088_s27 }
0x182a   : > { %p7829_p0 = pnand %p7828_p13, %p9217_p7 }
0x182b   : > { %p7834_p10 = por %p7833_p4, %p7832_p2 }
0x182c   : > { %p7830_p6 = pneg %p7829_p0 }
0x182d   : > { %p7836_p9 = por %p7835_p5, %p7834_p10 }
0x182f   : > { %p7837_p8 = pnand %p7836_p9, %p7830_p6 }
0x1831   : > { %7840 = shalt.err (!%p7837_p8)
}
0x1832   : > { %7158 = dma.vmem_to_hbm [thread:$0]  (%p9217_p7), %s9090_s1, 128, %s9088_s27, %s6235_s6  }
0x1833 PF: > { %s6260_s16 = sand.u32 1, %s7891_s18   ;;  %p9218_p11 = scmp.ne.s32.totalorder %s9194_s12, 0 }
0x1834   : > { %p9219_p3 = scmp.ge.s32.totalorder %s7903_s21, 2  ;;  %s6261_s17 = scalar_lea.sflag [#allocation4], %s6260_s16 }
0x1836   : > { %p7196_p12 = pnand %p9219_p3, %p9218_p11 }
0x1838   : > { %7886 = dma.done.wait (!%p7196_p12), %s6261_s17, 128  }
0x1839   : > { %7888 = vsyncadd (!%p7196_p12), %s6261_s17, 4294967168  ;;  %p35_p1 = scmp.ge.s32.totalorder %s8266_s26, 4   ;;  %s9220_s18 = smov %s7895_s19 }
0x183a   : > { %s9221_s19 = smov %s7899_s20  ;;  %s9222_s20 = smov %s8277_s4 }
0x183b   : > { %s9223_s21 = smov %s8266_s26  ;;  %37 = sbr.rel (!%p35_p1) target bundleno = 23 (0x17), region = 189 }
0x1842   :  { %6266 = vsyncpa [#allocation3], 1 }
0x1843   :  { %6268 = vsyncpa [#allocation3 + $0x1], 1 }
0x1844   :  { %6269 = vsyncpa [#allocation6], 1 }
0x1845   :  { %6271 = vsyncpa [#allocation6 + $0x1], 1 }
0x1846   :  { %6272 = vsyncpa [#allocation9], 1 }
0x1847   :  { %6273 = vsyncpa [#allocation12], 1 }
0x1848   :  { %6274 = vsyncpa [#allocation15], 1 }
0x1849   :  { %6275 = vsyncpa [#allocation18], 1 }
0x184a   :  { %6276 = vsyncpa [#allocation4], 1 }
0x184b   :  { %6278 = vsyncpa [#allocation4 + $0x1], 1 }

</bundles_post_ra>
